<compile_context>
chip_gen: v7x
topology: tpu7x:2x2x1
jax: 0.10.0
libtpu: 0.0.40
codegen_flags: <defaults>
</compile_context>

<pallas_src>
import jax
import jax.numpy as jnp
from jax import lax
from jax.experimental import pallas as pl
from jax.experimental.pallas import tpu as pltpu

BN_EPS = 1e-5


# ----------------------------------------------------------------------------
# Fused Pallas kernel: one grid step == one sample, everything stays in VMEM.
# ----------------------------------------------------------------------------
def _mnist_fused_kernel(x_ref, b1, sb1, b2, sb2, b3, s_sel, t_sel,
                        b4, sb4, b5, sb5, p_pad, b7, sb7, w8t, o_ref):
    f32 = jnp.float32

    def conv(x, b_ref):
        """Valid conv over rows: acc = sum_kh x[kh:kh+Ho, :] @ B_kh."""
        kh_n, _, n_out = b_ref.shape
        ho = x.shape[0] - kh_n + 1
        acc = jnp.dot(x[0:ho, :], b_ref[0], preferred_element_type=f32)
        for kh in range(1, kh_n):
            acc = acc + jnp.dot(x[kh:kh + ho, :], b_ref[kh],
                                preferred_element_type=f32)
        return acc

    def relu_bn(acc, sb_ref):
        sb = sb_ref[...]                      # (2, Wo*Cout): row0=scale, row1=bias
        return jnp.maximum(acc, 0.0) * sb[0:1, :] + sb[1:2, :]

    x0 = x_ref[0]                                           # (28, 28)   == (H, W*1)
    a1 = relu_bn(conv(x0, b1), sb1)                         # (26, 26*6)
    a2 = relu_bn(conv(a1, b2), sb2)                         # (24, 24*32)
    a3 = conv(a2, b3)                                       # (24, 24*6)  1x1, no relu/bn

    # 2x2 max-pool: pair-max along W via lane-selection matmuls, then along H.
    cols = jnp.maximum(
        jnp.dot(a3, s_sel[0], preferred_element_type=f32),
        jnp.dot(a3, s_sel[1], preferred_element_type=f32))  # (24, 12*6)
    a3p = jnp.maximum(
        jnp.dot(t_sel[0], cols, preferred_element_type=f32),
        jnp.dot(t_sel[1], cols, preferred_element_type=f32))  # (12, 12*6)

    a4 = relu_bn(conv(a3p, b4), sb4)                        # (10, 10*16)
    a5 = relu_bn(conv(a4, b5), sb5)                         # (8,  8*16)

    # convblock7 (pad=1): zero-pad rows via constant matrix; W-padding folded in b7.
    a5p = jnp.dot(p_pad[...], a5, preferred_element_type=f32)  # (10, 8*16)
    a7 = relu_bn(conv(a5p, b7), sb7)                        # (8, 8*16)

    # GAP (mean over 8x8) + 1x1 conv (16->10, no bias) + log_softmax.
    rsum = jnp.sum(a7, axis=0, keepdims=True)               # (1, 128)
    logits = jnp.dot(rsum, w8t[...], preferred_element_type=f32) * (1.0 / 64.0)
    m = jnp.max(logits, axis=-1, keepdims=True)
    z = logits - m
    lse = jnp.log(jnp.sum(jnp.exp(z), axis=-1, keepdims=True))
    o_ref[0] = (z - lse).astype(o_ref.dtype)                # (1, 10)


# ----------------------------------------------------------------------------
# Host-side constant construction (pure JAX, tiny): banded conv weights,
# pooling / padding selection matrices, tiled BN affines.
# ----------------------------------------------------------------------------
def _banded(w_hwio, w_in, pad):
    """Per-kh banded matrices B: (KH, W_in*Cin, Wo*Cout).

    B_kh[(wo+kw-pad)*Cin + ci, wo*Cout + co] = w[kh, kw, ci, co] (valid terms only).
    """
    KH, KW, Cin, Cout = w_hwio.shape
    Wo = w_in - KW + 1 + 2 * pad
    eye = jnp.eye(Wo, dtype=jnp.float32)
    taps = []
    for kh in range(KH):
        B = jnp.zeros((w_in * Cin, Wo * Cout), jnp.float32)
        for kw in range(KW):
            s = kw - pad
            K = jnp.kron(eye, w_hwio[kh, kw].astype(jnp.float32))  # (Wo*Cin, Wo*Cout)
            a = max(0, -s)
            b = min(Wo, w_in - s)
            B = B.at[(a + s) * Cin:(b + s) * Cin, :].add(K[a * Cin:b * Cin, :])
        taps.append(B)
    return jnp.stack(taps)


def _pool_mats(h_in, w_in, c):
    """0/1 selection matrices realizing a 2x2 max-pool as matmul + elementwise max."""
    wp, hp = w_in // 2, h_in // 2
    eyec = jnp.eye(c, dtype=jnp.float32)
    wi = jnp.arange(wp)
    e0 = jnp.zeros((w_in, wp), jnp.float32).at[2 * wi, wi].set(1.0)
    e1 = jnp.zeros((w_in, wp), jnp.float32).at[2 * wi + 1, wi].set(1.0)
    s_sel = jnp.stack([jnp.kron(e0, eyec), jnp.kron(e1, eyec)])   # (2, w_in*c, wp*c)
    hi = jnp.arange(hp)
    t0 = jnp.zeros((hp, h_in), jnp.float32).at[hi, 2 * hi].set(1.0)
    t1 = jnp.zeros((hp, h_in), jnp.float32).at[hi, 2 * hi + 1].set(1.0)
    t_sel = jnp.stack([t0, t1])                                   # (2, hp, h_in)
    return s_sel, t_sel


def _tiled_sb(scale, bias, wo):
    return jnp.stack([jnp.tile(scale.astype(jnp.float32), wo),
                      jnp.tile(bias.astype(jnp.float32), wo)])    # (2, wo*C)


def _fold_consts(p):
    b1 = _banded(p["w1"], 28, 0)                 # (3, 28,   26*6)
    sb1 = _tiled_sb(p["s1"], p["b1"], 26)
    b2 = _banded(p["w2"], 26, 0)                 # (3, 26*6, 24*32)
    sb2 = _tiled_sb(p["s2"], p["b2"], 24)
    b3 = _banded(p["w3"], 24, 0)                 # (1, 24*32, 24*6)
    s_sel, t_sel = _pool_mats(24, 24, 6)
    b4 = _banded(p["w4"], 12, 0)                 # (3, 12*6, 10*16)
    sb4 = _tiled_sb(p["s4"], p["b4"], 10)
    b5 = _banded(p["w5"], 10, 0)                 # (3, 10*16, 8*16)
    sb5 = _tiled_sb(p["s5"], p["b5"], 8)
    b7 = _banded(p["w7"], 8, 1)                  # (3, 8*16, 8*16)  ("same" along W)
    sb7 = _tiled_sb(p["s7"], p["b7"], 8)
    r = jnp.arange(8)
    p_pad = jnp.zeros((10, 8), jnp.float32).at[r + 1, r].set(1.0)  # zero row pad
    w8t = jnp.tile(p["w8"].reshape(16, 10).astype(jnp.float32), (8, 1))  # (128, 10)
    return (b1, sb1, b2, sb2, b3, s_sel, t_sel, b4, sb4, b5, sb5,
            p_pad, b7, sb7, w8t)


# ----------------------------------------------------------------------------
# Forward pass (single fused pallas_call) and pure-JAX reference
# ----------------------------------------------------------------------------
def mnist_forward(x_nchw, p):
    N, Cin, H, W = x_nchw.shape
    assert (Cin, H, W) == (1, 28, 28)
    x = x_nchw.reshape(N, H, W).astype(jnp.float32)        # per-sample (H, W*Cin)

    consts = _fold_consts(p)
    (b1, sb1, b2, sb2, b3, s_sel, t_sel, b4, sb4, b5, sb5,
     p_pad, b7, sb7, w8t) = consts

    in_specs = [pl.BlockSpec((1, H, W), lambda n: (n, 0, 0))]
    for c in consts:
        nd = c.ndim
        in_specs.append(pl.BlockSpec(c.shape, lambda n, _nd=nd: (0,) * _nd))

    def conv_flops(b, h_in):
        kh_n, k_dim, n_dim = b.shape
        return kh_n * 2 * (h_in - kh_n + 1) * k_dim * n_dim

    per_sample = (conv_flops(b1, 28) + conv_flops(b2, 26) + conv_flops(b3, 24)
                  + conv_flops(b4, 12) + conv_flops(b5, 10) + conv_flops(b7, 10)
                  + 2 * 2 * 24 * 144 * 72 + 2 * 2 * 12 * 24 * 72    # maxpool selects
                  + 2 * 10 * 8 * 128                                # row zero-pad
                  + 2 * 1 * 128 * 10)                               # GAP FC
    bytes_accessed = 4 * (x.size + sum(int(c.size) for c in consts) + N * 10)

    out = pl.pallas_call(
        _mnist_fused_kernel,
        out_shape=jax.ShapeDtypeStruct((N, 1, 10), jnp.float32),
        grid=(N,),
        in_specs=in_specs,
        out_specs=pl.BlockSpec((1, 1, 10), lambda n: (n, 0, 0)),
        compiler_params=pltpu.CompilerParams(
            dimension_semantics=("parallel",),
            vmem_limit_bytes=32 * 1024 * 1024),
        cost_estimate=pl.CostEstimate(
            flops=int(N * per_sample),
            transcendentals=11 * N,
            bytes_accessed=int(bytes_accessed)),
    )(x, *consts)
    return out.reshape(N, 10)


def reference_forward(x_nchw, p):
    """Pure-JAX (lax.conv) reference with identical eval-mode semantics."""
    dn = ("NHWC", "HWIO", "NHWC")

    def conv(x, w, pad=0):
        return lax.conv_general_dilated(
            x, w, (1, 1), [(pad, pad), (pad, pad)], dimension_numbers=dn)

    def block(x, w, s, b, relu, pad=0):
        y = conv(x, w, pad)
        if relu:
            y = jnp.maximum(y, 0.0)
        return y * s + b

    x = jnp.transpose(x_nchw, (0, 2, 3, 1)).astype(jnp.float32)
    x = block(x, p["w1"], p["s1"], p["b1"], True)
    x = block(x, p["w2"], p["s2"], p["b2"], True)
    x = conv(x, p["w3"])
    N, H, W, C = x.shape
    x = x.reshape(N, H // 2, 2, W // 2, 2, C).max(axis=(2, 4))
    x = block(x, p["w4"], p["s4"], p["b4"], True)
    x = block(x, p["w5"], p["s5"], p["b5"], True)
    x = block(x, p["w7"], p["s7"], p["b7"], True, pad=1)
    x = jnp.mean(x, axis=(1, 2), keepdims=True)
    x = conv(x, p["w8"]).reshape(-1, 10)
    return jax.nn.log_softmax(x, axis=-1)


# ----------------------------------------------------------------------------
# Parameters (deterministic synthetic init; shapes from MNISTClassifier)
# ----------------------------------------------------------------------------
def _bn_fold(key, c):
    k1, k2, k3, k4 = jax.random.split(key, 4)
    gamma = 1.0 + 0.1 * jax.random.normal(k1, (c,), jnp.float32)
    beta = 0.1 * jax.random.normal(k2, (c,), jnp.float32)
    running_mean = 0.1 * jax.random.normal(k3, (c,), jnp.float32)
    running_var = 1.0 + 0.1 * jnp.abs(jax.random.normal(k4, (c,), jnp.float32))
    scale = gamma / jnp.sqrt(running_var + BN_EPS)
    bias = beta - running_mean * scale
    return scale, bias


def init_params(key):
    ks = jax.random.split(key, 12)

    def conv_w(k, kh, kw, cin, cout):
        fan_in = kh * kw * cin
        return jax.random.normal(k, (kh, kw, cin, cout), jnp.float32) / jnp.sqrt(
            float(fan_in))

    p = {}
    p["w1"] = conv_w(ks[0], 3, 3, 1, 6)
    p["s1"], p["b1"] = _bn_fold(ks[1], 6)
    p["w2"] = conv_w(ks[2], 3, 3, 6, 32)
    p["s2"], p["b2"] = _bn_fold(ks[3], 32)
    p["w3"] = conv_w(ks[4], 1, 1, 32, 6)           # convblock3: no ReLU / no BN
    p["w4"] = conv_w(ks[5], 3, 3, 6, 16)
    p["s4"], p["b4"] = _bn_fold(ks[6], 16)
    p["w5"] = conv_w(ks[7], 3, 3, 16, 16)
    p["s5"], p["b5"] = _bn_fold(ks[8], 16)
    p["w7"] = conv_w(ks[9], 3, 3, 16, 16)          # convblock7: padding=1
    p["s7"], p["b7"] = _bn_fold(ks[10], 16)
    p["w8"] = conv_w(ks[11], 1, 1, 16, 10)         # convblock8: no ReLU / no BN
    return p


# ----------------------------------------------------------------------------
if __name__ == "__main__":
    key = jax.random.PRNGKey(0)
    k_params, k_x = jax.random.split(key)
    params = init_params(k_params)
    # MNIST-shaped input (small batch): NCHW (2, 1, 28, 28)
    x = jax.random.normal(k_x, (2, 1, 28, 28), jnp.float32)

    out = jax.jit(mnist_forward)(x, params)
    out = jax.block_until_ready(out)

    ref = reference_forward(x, params)
    max_err = float(jnp.max(jnp.abs(out - ref)))
    assert out.shape == (2, 10), out.shape
    assert max_err < 2e-4, f"mismatch vs reference: {max_err}"

    print("KERNEL_OK")
</pallas_src>

<mosaic_0001>
module attributes {stable_mosaic.version = 11 : i64} {
  func.func @_mnist_fused_kernel(%arg0: i32, %arg1: memref<1x28x28xf32, #tpu.memory_space<vmem>>, %arg2: memref<3x28x156xf32, #tpu.memory_space<vmem>>, %arg3: memref<2x156xf32, #tpu.memory_space<vmem>>, %arg4: memref<3x156x768xf32, #tpu.memory_space<vmem>>, %arg5: memref<2x768xf32, #tpu.memory_space<vmem>>, %arg6: memref<1x768x144xf32, #tpu.memory_space<vmem>>, %arg7: memref<2x144x72xf32, #tpu.memory_space<vmem>>, %arg8: memref<2x12x24xf32, #tpu.memory_space<vmem>>, %arg9: memref<3x72x160xf32, #tpu.memory_space<vmem>>, %arg10: memref<2x160xf32, #tpu.memory_space<vmem>>, %arg11: memref<3x160x128xf32, #tpu.memory_space<vmem>>, %arg12: memref<2x128xf32, #tpu.memory_space<vmem>>, %arg13: memref<10x8xf32, #tpu.memory_space<vmem>>, %arg14: memref<3x128x128xf32, #tpu.memory_space<vmem>>, %arg15: memref<2x128xf32, #tpu.memory_space<vmem>>, %arg16: memref<128x10xf32, #tpu.memory_space<vmem>>, %arg17: memref<1x1x10xf32, #tpu.memory_space<vmem>>) attributes {dimension_semantics = [#tpu.dimension_semantics<parallel>], iteration_bounds = array<i64: 2>, scalar_prefetch = 0 : i64, scratch_operands = 0 : i64, tpu.core_type = #tpu.core_type<tc>, window_params = [{transform_indices = @transform_0, window_bounds = array<i64: 1, 28, 28>}, {pipeline_mode = #tpu.pipeline_mode<synchronous>, transform_indices = @transform_1, window_bounds = array<i64: 3, 28, 156>}, {pipeline_mode = #tpu.pipeline_mode<synchronous>, transform_indices = @transform_2, window_bounds = array<i64: 2, 156>}, {pipeline_mode = #tpu.pipeline_mode<synchronous>, transform_indices = @transform_3, window_bounds = array<i64: 3, 156, 768>}, {pipeline_mode = #tpu.pipeline_mode<synchronous>, transform_indices = @transform_4, window_bounds = array<i64: 2, 768>}, {pipeline_mode = #tpu.pipeline_mode<synchronous>, transform_indices = @transform_5, window_bounds = array<i64: 1, 768, 144>}, {pipeline_mode = #tpu.pipeline_mode<synchronous>, transform_indices = @transform_6, window_bounds = array<i64: 2, 144, 72>}, {pipeline_mode = #tpu.pipeline_mode<synchronous>, transform_indices = @transform_7, window_bounds = array<i64: 2, 12, 24>}, {pipeline_mode = #tpu.pipeline_mode<synchronous>, transform_indices = @transform_8, window_bounds = array<i64: 3, 72, 160>}, {pipeline_mode = #tpu.pipeline_mode<synchronous>, transform_indices = @transform_9, window_bounds = array<i64: 2, 160>}, {pipeline_mode = #tpu.pipeline_mode<synchronous>, transform_indices = @transform_10, window_bounds = array<i64: 3, 160, 128>}, {pipeline_mode = #tpu.pipeline_mode<synchronous>, transform_indices = @transform_11, window_bounds = array<i64: 2, 128>}, {pipeline_mode = #tpu.pipeline_mode<synchronous>, transform_indices = @transform_12, window_bounds = array<i64: 10, 8>}, {pipeline_mode = #tpu.pipeline_mode<synchronous>, transform_indices = @transform_13, window_bounds = array<i64: 3, 128, 128>}, {pipeline_mode = #tpu.pipeline_mode<synchronous>, transform_indices = @transform_14, window_bounds = array<i64: 2, 128>}, {pipeline_mode = #tpu.pipeline_mode<synchronous>, transform_indices = @transform_15, window_bounds = array<i64: 128, 10>}, {transform_indices = @transform_16, window_bounds = array<i64: 1, 1, 10>}]} {
    %c0 = arith.constant 0 : index
    %c0_0 = arith.constant 0 : index
    %c0_1 = arith.constant 0 : index
    %0 = vector.load %arg1[%c0, %c0_0, %c0_1] : memref<1x28x28xf32, #tpu.memory_space<vmem>>, vector<1x28x28xf32>
    %1 = vector.shape_cast %0 : vector<1x28x28xf32> to vector<28x28xf32>
    %2 = vector.extract_strided_slice %1 {offsets = [0, 0], sizes = [26, 28], strides = [1, 1]} : vector<28x28xf32> to vector<26x28xf32>
    %c0_2 = arith.constant 0 : index
    %c0_3 = arith.constant 0 : index
    %c0_4 = arith.constant 0 : index
    %3 = vector.load %arg2[%c0_2, %c0_3, %c0_4] : memref<3x28x156xf32, #tpu.memory_space<vmem>>, vector<1x28x156xf32>
    %4 = vector.shape_cast %3 : vector<1x28x156xf32> to vector<28x156xf32>
    %cst = arith.constant dense<0.000000e+00> : vector<26x156xf32>
    %5 = tpu.matmul %2, %4, %cst {dimension_numbers = #tpu.dot_dimension_numbers<[1], [0], [0], [1], [0, 0, 1, 1], [], []>} : vector<26x28xf32>, vector<28x156xf32>, vector<26x156xf32> -> vector<26x156xf32>
    %6 = vector.extract_strided_slice %1 {offsets = [1, 0], sizes = [26, 28], strides = [1, 1]} : vector<28x28xf32> to vector<26x28xf32>
    %c1 = arith.constant 1 : index
    %c0_5 = arith.constant 0 : index
    %c0_6 = arith.constant 0 : index
    %7 = vector.load %arg2[%c1, %c0_5, %c0_6] : memref<3x28x156xf32, #tpu.memory_space<vmem>>, vector<1x28x156xf32>
    %8 = vector.shape_cast %7 : vector<1x28x156xf32> to vector<28x156xf32>
    %cst_7 = arith.constant dense<0.000000e+00> : vector<26x156xf32>
    %9 = tpu.matmul %6, %8, %cst_7 {dimension_numbers = #tpu.dot_dimension_numbers<[1], [0], [0], [1], [0, 0, 1, 1], [], []>} : vector<26x28xf32>, vector<28x156xf32>, vector<26x156xf32> -> vector<26x156xf32>
    %10 = arith.addf %5, %9 : vector<26x156xf32>
    %11 = vector.extract_strided_slice %1 {offsets = [2, 0], sizes = [26, 28], strides = [1, 1]} : vector<28x28xf32> to vector<26x28xf32>
    %c2 = arith.constant 2 : index
    %c0_8 = arith.constant 0 : index
    %c0_9 = arith.constant 0 : index
    %12 = vector.load %arg2[%c2, %c0_8, %c0_9] : memref<3x28x156xf32, #tpu.memory_space<vmem>>, vector<1x28x156xf32>
    %13 = vector.shape_cast %12 : vector<1x28x156xf32> to vector<28x156xf32>
    %cst_10 = arith.constant dense<0.000000e+00> : vector<26x156xf32>
    %14 = tpu.matmul %11, %13, %cst_10 {dimension_numbers = #tpu.dot_dimension_numbers<[1], [0], [0], [1], [0, 0, 1, 1], [], []>} : vector<26x28xf32>, vector<28x156xf32>, vector<26x156xf32> -> vector<26x156xf32>
    %15 = arith.addf %10, %14 : vector<26x156xf32>
    %c0_11 = arith.constant 0 : index
    %c0_12 = arith.constant 0 : index
    %16 = vector.load %arg3[%c0_11, %c0_12] : memref<2x156xf32, #tpu.memory_space<vmem>>, vector<2x156xf32>
    %cst_13 = arith.constant 0.000000e+00 : f32
    %17 = vector.broadcast %cst_13 : f32 to vector<26x156xf32>
    %18 = arith.maximumf %15, %17 : vector<26x156xf32>
    %19 = vector.extract_strided_slice %16 {offsets = [0, 0], sizes = [1, 156], strides = [1, 1]} : vector<2x156xf32> to vector<1x156xf32>
    %20 = vector.broadcast %19 : vector<1x156xf32> to vector<26x156xf32>
    %21 = arith.mulf %18, %20 : vector<26x156xf32>
    %22 = vector.extract_strided_slice %16 {offsets = [1, 0], sizes = [1, 156], strides = [1, 1]} : vector<2x156xf32> to vector<1x156xf32>
    %23 = vector.broadcast %22 : vector<1x156xf32> to vector<26x156xf32>
    %24 = arith.addf %21, %23 : vector<26x156xf32>
    %25 = vector.extract_strided_slice %24 {offsets = [0, 0], sizes = [24, 156], strides = [1, 1]} : vector<26x156xf32> to vector<24x156xf32>
    %c0_14 = arith.constant 0 : index
    %c0_15 = arith.constant 0 : index
    %c0_16 = arith.constant 0 : index
    %26 = vector.load %arg4[%c0_14, %c0_15, %c0_16] : memref<3x156x768xf32, #tpu.memory_space<vmem>>, vector<1x156x768xf32>
    %27 = vector.shape_cast %26 : vector<1x156x768xf32> to vector<156x768xf32>
    %cst_17 = arith.constant dense<0.000000e+00> : vector<24x768xf32>
    %28 = tpu.matmul %25, %27, %cst_17 {dimension_numbers = #tpu.dot_dimension_numbers<[1], [0], [0], [1], [0, 0, 1, 1], [], []>} : vector<24x156xf32>, vector<156x768xf32>, vector<24x768xf32> -> vector<24x768xf32>
    %29 = vector.extract_strided_slice %24 {offsets = [1, 0], sizes = [24, 156], strides = [1, 1]} : vector<26x156xf32> to vector<24x156xf32>
    %c1_18 = arith.constant 1 : index
    %c0_19 = arith.constant 0 : index
    %c0_20 = arith.constant 0 : index
    %30 = vector.load %arg4[%c1_18, %c0_19, %c0_20] : memref<3x156x768xf32, #tpu.memory_space<vmem>>, vector<1x156x768xf32>
    %31 = vector.shape_cast %30 : vector<1x156x768xf32> to vector<156x768xf32>
    %cst_21 = arith.constant dense<0.000000e+00> : vector<24x768xf32>
    %32 = tpu.matmul %29, %31, %cst_21 {dimension_numbers = #tpu.dot_dimension_numbers<[1], [0], [0], [1], [0, 0, 1, 1], [], []>} : vector<24x156xf32>, vector<156x768xf32>, vector<24x768xf32> -> vector<24x768xf32>
    %33 = arith.addf %28, %32 : vector<24x768xf32>
    %34 = vector.extract_strided_slice %24 {offsets = [2, 0], sizes = [24, 156], strides = [1, 1]} : vector<26x156xf32> to vector<24x156xf32>
    %c2_22 = arith.constant 2 : index
    %c0_23 = arith.constant 0 : index
    %c0_24 = arith.constant 0 : index
    %35 = vector.load %arg4[%c2_22, %c0_23, %c0_24] : memref<3x156x768xf32, #tpu.memory_space<vmem>>, vector<1x156x768xf32>
    %36 = vector.shape_cast %35 : vector<1x156x768xf32> to vector<156x768xf32>
    %cst_25 = arith.constant dense<0.000000e+00> : vector<24x768xf32>
    %37 = tpu.matmul %34, %36, %cst_25 {dimension_numbers = #tpu.dot_dimension_numbers<[1], [0], [0], [1], [0, 0, 1, 1], [], []>} : vector<24x156xf32>, vector<156x768xf32>, vector<24x768xf32> -> vector<24x768xf32>
    %38 = arith.addf %33, %37 : vector<24x768xf32>
    %c0_26 = arith.constant 0 : index
    %c0_27 = arith.constant 0 : index
    %39 = vector.load %arg5[%c0_26, %c0_27] : memref<2x768xf32, #tpu.memory_space<vmem>>, vector<2x768xf32>
    %cst_28 = arith.constant 0.000000e+00 : f32
    %40 = vector.broadcast %cst_28 : f32 to vector<24x768xf32>
    %41 = arith.maximumf %38, %40 : vector<24x768xf32>
    %42 = vector.extract_strided_slice %39 {offsets = [0, 0], sizes = [1, 768], strides = [1, 1]} : vector<2x768xf32> to vector<1x768xf32>
    %43 = vector.broadcast %42 : vector<1x768xf32> to vector<24x768xf32>
    %44 = arith.mulf %41, %43 : vector<24x768xf32>
    %45 = vector.extract_strided_slice %39 {offsets = [1, 0], sizes = [1, 768], strides = [1, 1]} : vector<2x768xf32> to vector<1x768xf32>
    %46 = vector.broadcast %45 : vector<1x768xf32> to vector<24x768xf32>
    %47 = arith.addf %44, %46 : vector<24x768xf32>
    %c0_29 = arith.constant 0 : index
    %c0_30 = arith.constant 0 : index
    %c0_31 = arith.constant 0 : index
    %48 = vector.load %arg6[%c0_29, %c0_30, %c0_31] : memref<1x768x144xf32, #tpu.memory_space<vmem>>, vector<1x768x144xf32>
    %49 = vector.shape_cast %48 : vector<1x768x144xf32> to vector<768x144xf32>
    %cst_32 = arith.constant dense<0.000000e+00> : vector<24x144xf32>
    %50 = tpu.matmul %47, %49, %cst_32 {dimension_numbers = #tpu.dot_dimension_numbers<[1], [0], [0], [1], [0, 0, 1, 1], [], []>} : vector<24x768xf32>, vector<768x144xf32>, vector<24x144xf32> -> vector<24x144xf32>
    %c0_33 = arith.constant 0 : index
    %c0_34 = arith.constant 0 : index
    %c0_35 = arith.constant 0 : index
    %51 = vector.load %arg7[%c0_33, %c0_34, %c0_35] : memref<2x144x72xf32, #tpu.memory_space<vmem>>, vector<1x144x72xf32>
    %52 = vector.shape_cast %51 : vector<1x144x72xf32> to vector<144x72xf32>
    %cst_36 = arith.constant dense<0.000000e+00> : vector<24x72xf32>
    %53 = tpu.matmul %50, %52, %cst_36 {dimension_numbers = #tpu.dot_dimension_numbers<[1], [0], [0], [1], [0, 0, 1, 1], [], []>} : vector<24x144xf32>, vector<144x72xf32>, vector<24x72xf32> -> vector<24x72xf32>
    %c1_37 = arith.constant 1 : index
    %c0_38 = arith.constant 0 : index
    %c0_39 = arith.constant 0 : index
    %54 = vector.load %arg7[%c1_37, %c0_38, %c0_39] : memref<2x144x72xf32, #tpu.memory_space<vmem>>, vector<1x144x72xf32>
    %55 = vector.shape_cast %54 : vector<1x144x72xf32> to vector<144x72xf32>
    %cst_40 = arith.constant dense<0.000000e+00> : vector<24x72xf32>
    %56 = tpu.matmul %50, %55, %cst_40 {dimension_numbers = #tpu.dot_dimension_numbers<[1], [0], [0], [1], [0, 0, 1, 1], [], []>} : vector<24x144xf32>, vector<144x72xf32>, vector<24x72xf32> -> vector<24x72xf32>
    %57 = arith.maximumf %53, %56 : vector<24x72xf32>
    %c0_41 = arith.constant 0 : index
    %c0_42 = arith.constant 0 : index
    %c0_43 = arith.constant 0 : index
    %58 = vector.load %arg8[%c0_41, %c0_42, %c0_43] : memref<2x12x24xf32, #tpu.memory_space<vmem>>, vector<1x12x24xf32>
    %59 = vector.shape_cast %58 : vector<1x12x24xf32> to vector<12x24xf32>
    %cst_44 = arith.constant dense<0.000000e+00> : vector<12x72xf32>
    %60 = tpu.matmul %59, %57, %cst_44 {dimension_numbers = #tpu.dot_dimension_numbers<[1], [0], [0], [1], [0, 0, 1, 1], [], []>} : vector<12x24xf32>, vector<24x72xf32>, vector<12x72xf32> -> vector<12x72xf32>
    %c1_45 = arith.constant 1 : index
    %c0_46 = arith.constant 0 : index
    %c0_47 = arith.constant 0 : index
    %61 = vector.load %arg8[%c1_45, %c0_46, %c0_47] : memref<2x12x24xf32, #tpu.memory_space<vmem>>, vector<1x12x24xf32>
    %62 = vector.shape_cast %61 : vector<1x12x24xf32> to vector<12x24xf32>
    %cst_48 = arith.constant dense<0.000000e+00> : vector<12x72xf32>
    %63 = tpu.matmul %62, %57, %cst_48 {dimension_numbers = #tpu.dot_dimension_numbers<[1], [0], [0], [1], [0, 0, 1, 1], [], []>} : vector<12x24xf32>, vector<24x72xf32>, vector<12x72xf32> -> vector<12x72xf32>
    %64 = arith.maximumf %60, %63 : vector<12x72xf32>
    %65 = vector.extract_strided_slice %64 {offsets = [0, 0], sizes = [10, 72], strides = [1, 1]} : vector<12x72xf32> to vector<10x72xf32>
    %c0_49 = arith.constant 0 : index
    %c0_50 = arith.constant 0 : index
    %c0_51 = arith.constant 0 : index
    %66 = vector.load %arg9[%c0_49, %c0_50, %c0_51] : memref<3x72x160xf32, #tpu.memory_space<vmem>>, vector<1x72x160xf32>
    %67 = vector.shape_cast %66 : vector<1x72x160xf32> to vector<72x160xf32>
    %cst_52 = arith.constant dense<0.000000e+00> : vector<10x160xf32>
    %68 = tpu.matmul %65, %67, %cst_52 {dimension_numbers = #tpu.dot_dimension_numbers<[1], [0], [0], [1], [0, 0, 1, 1], [], []>} : vector<10x72xf32>, vector<72x160xf32>, vector<10x160xf32> -> vector<10x160xf32>
    %69 = vector.extract_strided_slice %64 {offsets = [1, 0], sizes = [10, 72], strides = [1, 1]} : vector<12x72xf32> to vector<10x72xf32>
    %c1_53 = arith.constant 1 : index
    %c0_54 = arith.constant 0 : index
    %c0_55 = arith.constant 0 : index
    %70 = vector.load %arg9[%c1_53, %c0_54, %c0_55] : memref<3x72x160xf32, #tpu.memory_space<vmem>>, vector<1x72x160xf32>
    %71 = vector.shape_cast %70 : vector<1x72x160xf32> to vector<72x160xf32>
    %cst_56 = arith.constant dense<0.000000e+00> : vector<10x160xf32>
    %72 = tpu.matmul %69, %71, %cst_56 {dimension_numbers = #tpu.dot_dimension_numbers<[1], [0], [0], [1], [0, 0, 1, 1], [], []>} : vector<10x72xf32>, vector<72x160xf32>, vector<10x160xf32> -> vector<10x160xf32>
    %73 = arith.addf %68, %72 : vector<10x160xf32>
    %74 = vector.extract_strided_slice %64 {offsets = [2, 0], sizes = [10, 72], strides = [1, 1]} : vector<12x72xf32> to vector<10x72xf32>
    %c2_57 = arith.constant 2 : index
    %c0_58 = arith.constant 0 : index
    %c0_59 = arith.constant 0 : index
    %75 = vector.load %arg9[%c2_57, %c0_58, %c0_59] : memref<3x72x160xf32, #tpu.memory_space<vmem>>, vector<1x72x160xf32>
    %76 = vector.shape_cast %75 : vector<1x72x160xf32> to vector<72x160xf32>
    %cst_60 = arith.constant dense<0.000000e+00> : vector<10x160xf32>
    %77 = tpu.matmul %74, %76, %cst_60 {dimension_numbers = #tpu.dot_dimension_numbers<[1], [0], [0], [1], [0, 0, 1, 1], [], []>} : vector<10x72xf32>, vector<72x160xf32>, vector<10x160xf32> -> vector<10x160xf32>
    %78 = arith.addf %73, %77 : vector<10x160xf32>
    %c0_61 = arith.constant 0 : index
    %c0_62 = arith.constant 0 : index
    %79 = vector.load %arg10[%c0_61, %c0_62] : memref<2x160xf32, #tpu.memory_space<vmem>>, vector<2x160xf32>
    %cst_63 = arith.constant 0.000000e+00 : f32
    %80 = vector.broadcast %cst_63 : f32 to vector<10x160xf32>
    %81 = arith.maximumf %78, %80 : vector<10x160xf32>
    %82 = vector.extract_strided_slice %79 {offsets = [0, 0], sizes = [1, 160], strides = [1, 1]} : vector<2x160xf32> to vector<1x160xf32>
    %83 = vector.broadcast %82 : vector<1x160xf32> to vector<10x160xf32>
    %84 = arith.mulf %81, %83 : vector<10x160xf32>
    %85 = vector.extract_strided_slice %79 {offsets = [1, 0], sizes = [1, 160], strides = [1, 1]} : vector<2x160xf32> to vector<1x160xf32>
    %86 = vector.broadcast %85 : vector<1x160xf32> to vector<10x160xf32>
    %87 = arith.addf %84, %86 : vector<10x160xf32>
    %88 = vector.extract_strided_slice %87 {offsets = [0, 0], sizes = [8, 160], strides = [1, 1]} : vector<10x160xf32> to vector<8x160xf32>
    %c0_64 = arith.constant 0 : index
    %c0_65 = arith.constant 0 : index
    %c0_66 = arith.constant 0 : index
    %89 = vector.load %arg11[%c0_64, %c0_65, %c0_66] : memref<3x160x128xf32, #tpu.memory_space<vmem>>, vector<1x160x128xf32>
    %90 = vector.shape_cast %89 : vector<1x160x128xf32> to vector<160x128xf32>
    %cst_67 = arith.constant dense<0.000000e+00> : vector<8x128xf32>
    %91 = tpu.matmul %88, %90, %cst_67 {dimension_numbers = #tpu.dot_dimension_numbers<[1], [0], [0], [1], [0, 0, 1, 1], [], []>} : vector<8x160xf32>, vector<160x128xf32>, vector<8x128xf32> -> vector<8x128xf32>
    %92 = vector.extract_strided_slice %87 {offsets = [1, 0], sizes = [8, 160], strides = [1, 1]} : vector<10x160xf32> to vector<8x160xf32>
    %c1_68 = arith.constant 1 : index
    %c0_69 = arith.constant 0 : index
    %c0_70 = arith.constant 0 : index
    %93 = vector.load %arg11[%c1_68, %c0_69, %c0_70] : memref<3x160x128xf32, #tpu.memory_space<vmem>>, vector<1x160x128xf32>
    %94 = vector.shape_cast %93 : vector<1x160x128xf32> to vector<160x128xf32>
    %cst_71 = arith.constant dense<0.000000e+00> : vector<8x128xf32>
    %95 = tpu.matmul %92, %94, %cst_71 {dimension_numbers = #tpu.dot_dimension_numbers<[1], [0], [0], [1], [0, 0, 1, 1], [], []>} : vector<8x160xf32>, vector<160x128xf32>, vector<8x128xf32> -> vector<8x128xf32>
    %96 = arith.addf %91, %95 : vector<8x128xf32>
    %97 = vector.extract_strided_slice %87 {offsets = [2, 0], sizes = [8, 160], strides = [1, 1]} : vector<10x160xf32> to vector<8x160xf32>
    %c2_72 = arith.constant 2 : index
    %c0_73 = arith.constant 0 : index
    %c0_74 = arith.constant 0 : index
    %98 = vector.load %arg11[%c2_72, %c0_73, %c0_74] : memref<3x160x128xf32, #tpu.memory_space<vmem>>, vector<1x160x128xf32>
    %99 = vector.shape_cast %98 : vector<1x160x128xf32> to vector<160x128xf32>
    %cst_75 = arith.constant dense<0.000000e+00> : vector<8x128xf32>
    %100 = tpu.matmul %97, %99, %cst_75 {dimension_numbers = #tpu.dot_dimension_numbers<[1], [0], [0], [1], [0, 0, 1, 1], [], []>} : vector<8x160xf32>, vector<160x128xf32>, vector<8x128xf32> -> vector<8x128xf32>
    %101 = arith.addf %96, %100 : vector<8x128xf32>
    %c0_76 = arith.constant 0 : index
    %c0_77 = arith.constant 0 : index
    %102 = vector.load %arg12[%c0_76, %c0_77] : memref<2x128xf32, #tpu.memory_space<vmem>>, vector<2x128xf32>
    %cst_78 = arith.constant 0.000000e+00 : f32
    %103 = vector.broadcast %cst_78 : f32 to vector<8x128xf32>
    %104 = arith.maximumf %101, %103 : vector<8x128xf32>
    %105 = vector.extract_strided_slice %102 {offsets = [0, 0], sizes = [1, 128], strides = [1, 1]} : vector<2x128xf32> to vector<1x128xf32>
    %106 = vector.broadcast %105 : vector<1x128xf32> to vector<8x128xf32>
    %107 = arith.mulf %104, %106 : vector<8x128xf32>
    %108 = vector.extract_strided_slice %102 {offsets = [1, 0], sizes = [1, 128], strides = [1, 1]} : vector<2x128xf32> to vector<1x128xf32>
    %109 = vector.broadcast %108 : vector<1x128xf32> to vector<8x128xf32>
    %110 = arith.addf %107, %109 : vector<8x128xf32>
    %c0_79 = arith.constant 0 : index
    %c0_80 = arith.constant 0 : index
    %111 = vector.load %arg13[%c0_79, %c0_80] : memref<10x8xf32, #tpu.memory_space<vmem>>, vector<10x8xf32>
    %cst_81 = arith.constant dense<0.000000e+00> : vector<10x128xf32>
    %112 = tpu.matmul %111, %110, %cst_81 {dimension_numbers = #tpu.dot_dimension_numbers<[1], [0], [0], [1], [0, 0, 1, 1], [], []>} : vector<10x8xf32>, vector<8x128xf32>, vector<10x128xf32> -> vector<10x128xf32>
    %113 = vector.extract_strided_slice %112 {offsets = [0, 0], sizes = [8, 128], strides = [1, 1]} : vector<10x128xf32> to vector<8x128xf32>
    %c0_82 = arith.constant 0 : index
    %c0_83 = arith.constant 0 : index
    %c0_84 = arith.constant 0 : index
    %114 = vector.load %arg14[%c0_82, %c0_83, %c0_84] : memref<3x128x128xf32, #tpu.memory_space<vmem>>, vector<1x128x128xf32>
    %115 = vector.shape_cast %114 : vector<1x128x128xf32> to vector<128x128xf32>
    %cst_85 = arith.constant dense<0.000000e+00> : vector<8x128xf32>
    %116 = tpu.matmul %113, %115, %cst_85 {dimension_numbers = #tpu.dot_dimension_numbers<[1], [0], [0], [1], [0, 0, 1, 1], [], []>} : vector<8x128xf32>, vector<128x128xf32>, vector<8x128xf32> -> vector<8x128xf32>
    %117 = vector.extract_strided_slice %112 {offsets = [1, 0], sizes = [8, 128], strides = [1, 1]} : vector<10x128xf32> to vector<8x128xf32>
    %c1_86 = arith.constant 1 : index
    %c0_87 = arith.constant 0 : index
    %c0_88 = arith.constant 0 : index
    %118 = vector.load %arg14[%c1_86, %c0_87, %c0_88] : memref<3x128x128xf32, #tpu.memory_space<vmem>>, vector<1x128x128xf32>
    %119 = vector.shape_cast %118 : vector<1x128x128xf32> to vector<128x128xf32>
    %cst_89 = arith.constant dense<0.000000e+00> : vector<8x128xf32>
    %120 = tpu.matmul %117, %119, %cst_89 {dimension_numbers = #tpu.dot_dimension_numbers<[1], [0], [0], [1], [0, 0, 1, 1], [], []>} : vector<8x128xf32>, vector<128x128xf32>, vector<8x128xf32> -> vector<8x128xf32>
    %121 = arith.addf %116, %120 : vector<8x128xf32>
    %122 = vector.extract_strided_slice %112 {offsets = [2, 0], sizes = [8, 128], strides = [1, 1]} : vector<10x128xf32> to vector<8x128xf32>
    %c2_90 = arith.constant 2 : index
    %c0_91 = arith.constant 0 : index
    %c0_92 = arith.constant 0 : index
    %123 = vector.load %arg14[%c2_90, %c0_91, %c0_92] : memref<3x128x128xf32, #tpu.memory_space<vmem>>, vector<1x128x128xf32>
    %124 = vector.shape_cast %123 : vector<1x128x128xf32> to vector<128x128xf32>
    %cst_93 = arith.constant dense<0.000000e+00> : vector<8x128xf32>
    %125 = tpu.matmul %122, %124, %cst_93 {dimension_numbers = #tpu.dot_dimension_numbers<[1], [0], [0], [1], [0, 0, 1, 1], [], []>} : vector<8x128xf32>, vector<128x128xf32>, vector<8x128xf32> -> vector<8x128xf32>
    %126 = arith.addf %121, %125 : vector<8x128xf32>
    %c0_94 = arith.constant 0 : index
    %c0_95 = arith.constant 0 : index
    %127 = vector.load %arg15[%c0_94, %c0_95] : memref<2x128xf32, #tpu.memory_space<vmem>>, vector<2x128xf32>
    %cst_96 = arith.constant 0.000000e+00 : f32
    %128 = vector.broadcast %cst_96 : f32 to vector<8x128xf32>
    %129 = arith.maximumf %126, %128 : vector<8x128xf32>
    %130 = vector.extract_strided_slice %127 {offsets = [0, 0], sizes = [1, 128], strides = [1, 1]} : vector<2x128xf32> to vector<1x128xf32>
    %131 = vector.broadcast %130 : vector<1x128xf32> to vector<8x128xf32>
    %132 = arith.mulf %129, %131 : vector<8x128xf32>
    %133 = vector.extract_strided_slice %127 {offsets = [1, 0], sizes = [1, 128], strides = [1, 1]} : vector<2x128xf32> to vector<1x128xf32>
    %134 = vector.broadcast %133 : vector<1x128xf32> to vector<8x128xf32>
    %135 = arith.addf %132, %134 : vector<8x128xf32>
    %cst_97 = arith.constant dense<0.000000e+00> : vector<128xf32>
    %136 = vector.multi_reduction <add>, %135, %cst_97 [0] : vector<8x128xf32> to vector<128xf32>
    %137 = vector.shape_cast %136 : vector<128xf32> to vector<1x128xf32>
    %c0_98 = arith.constant 0 : index
    %c0_99 = arith.constant 0 : index
    %138 = vector.load %arg16[%c0_98, %c0_99] : memref<128x10xf32, #tpu.memory_space<vmem>>, vector<128x10xf32>
    %cst_100 = arith.constant dense<0.000000e+00> : vector<1x10xf32>
    %139 = tpu.matmul %137, %138, %cst_100 {dimension_numbers = #tpu.dot_dimension_numbers<[1], [0], [0], [1], [0, 0, 1, 1], [], []>} : vector<1x128xf32>, vector<128x10xf32>, vector<1x10xf32> -> vector<1x10xf32>
    %cst_101 = arith.constant 1.562500e-02 : f32
    %140 = vector.broadcast %cst_101 : f32 to vector<1x10xf32>
    %141 = arith.mulf %139, %140 : vector<1x10xf32>
    %cst_102 = arith.constant dense<0xFF800000> : vector<1xf32>
    %142 = vector.multi_reduction <maximumf>, %141, %cst_102 [1] : vector<1x10xf32> to vector<1xf32>
    %143 = vector.shape_cast %142 : vector<1xf32> to vector<1x1xf32>
    %144 = vector.broadcast %143 : vector<1x1xf32> to vector<1x10xf32>
    %145 = arith.subf %141, %144 : vector<1x10xf32>
    %146 = math.exp %145 : vector<1x10xf32>
    %cst_103 = arith.constant dense<0.000000e+00> : vector<1xf32>
    %147 = vector.multi_reduction <add>, %146, %cst_103 [1] : vector<1x10xf32> to vector<1xf32>
    %148 = vector.shape_cast %147 : vector<1xf32> to vector<1x1xf32>
    %149 = math.log %148 : vector<1x1xf32>
    %150 = vector.broadcast %149 : vector<1x1xf32> to vector<1x10xf32>
    %151 = arith.subf %145, %150 : vector<1x10xf32>
    %c0_104 = arith.constant 0 : index
    %c0_105 = arith.constant 0 : index
    %c0_106 = arith.constant 0 : index
    %152 = vector.load %arg17[%c0_104, %c0_105, %c0_106] : memref<1x1x10xf32, #tpu.memory_space<vmem>>, vector<1x1x10xf32>
    %153 = vector.shape_cast %152 : vector<1x1x10xf32> to vector<1x10xf32>
    %154 = vector.shape_cast %151 : vector<1x10xf32> to vector<1x1x10xf32>
    tpu.vector_store %arg17[%c0_104, %c0_105, %c0_106], %154 {strides = array<i32>} : memref<1x1x10xf32, #tpu.memory_space<vmem>>, vector<1x1x10xf32>,
    return
  }
  func.func @transform_0(%arg0: i32) -> (i32, i32, i32) {
    %c0_i32 = arith.constant 0 : i32
    %c0_i32_0 = arith.constant 0 : i32
    %c0_i32_1 = arith.constant 0 : i32
    return %arg0, %c0_i32, %c0_i32_0 : i32, i32, i32
  }
  func.func @transform_1(%arg0: i32) -> (i32, i32, i32) {
    %c0_i32 = arith.constant 0 : i32
    %c0_i32_0 = arith.constant 0 : i32
    %c0_i32_1 = arith.constant 0 : i32
    %c0_i32_2 = arith.constant 0 : i32
    return %c0_i32, %c0_i32_0, %c0_i32_1 : i32, i32, i32
  }
  func.func @transform_2(%arg0: i32) -> (i32, i32) {
    %c0_i32 = arith.constant 0 : i32
    %c0_i32_0 = arith.constant 0 : i32
    %c0_i32_1 = arith.constant 0 : i32
    return %c0_i32, %c0_i32_0 : i32, i32
  }
  func.func @transform_3(%arg0: i32) -> (i32, i32, i32) {
    %c0_i32 = arith.constant 0 : i32
    %c0_i32_0 = arith.constant 0 : i32
    %c0_i32_1 = arith.constant 0 : i32
    %c0_i32_2 = arith.constant 0 : i32
    return %c0_i32, %c0_i32_0, %c0_i32_1 : i32, i32, i32
  }
  func.func @transform_4(%arg0: i32) -> (i32, i32) {
    %c0_i32 = arith.constant 0 : i32
    %c0_i32_0 = arith.constant 0 : i32
    %c0_i32_1 = arith.constant 0 : i32
    return %c0_i32, %c0_i32_0 : i32, i32
  }
  func.func @transform_5(%arg0: i32) -> (i32, i32, i32) {
    %c0_i32 = arith.constant 0 : i32
    %c0_i32_0 = arith.constant 0 : i32
    %c0_i32_1 = arith.constant 0 : i32
    %c0_i32_2 = arith.constant 0 : i32
    return %c0_i32, %c0_i32_0, %c0_i32_1 : i32, i32, i32
  }
  func.func @transform_6(%arg0: i32) -> (i32, i32, i32) {
    %c0_i32 = arith.constant 0 : i32
    %c0_i32_0 = arith.constant 0 : i32
    %c0_i32_1 = arith.constant 0 : i32
    %c0_i32_2 = arith.constant 0 : i32
    return %c0_i32, %c0_i32_0, %c0_i32_1 : i32, i32, i32
  }
  func.func @transform_7(%arg0: i32) -> (i32, i32, i32) {
    %c0_i32 = arith.constant 0 : i32
    %c0_i32_0 = arith.constant 0 : i32
    %c0_i32_1 = arith.constant 0 : i32
    %c0_i32_2 = arith.constant 0 : i32
    return %c0_i32, %c0_i32_0, %c0_i32_1 : i32, i32, i32
  }
  func.func @transform_8(%arg0: i32) -> (i32, i32, i32) {
    %c0_i32 = arith.constant 0 : i32
    %c0_i32_0 = arith.constant 0 : i32
    %c0_i32_1 = arith.constant 0 : i32
    %c0_i32_2 = arith.constant 0 : i32
    return %c0_i32, %c0_i32_0, %c0_i32_1 : i32, i32, i32
  }
  func.func @transform_9(%arg0: i32) -> (i32, i32) {
    %c0_i32 = arith.constant 0 : i32
    %c0_i32_0 = arith.constant 0 : i32
    %c0_i32_1 = arith.constant 0 : i32
    return %c0_i32, %c0_i32_0 : i32, i32
  }
  func.func @transform_10(%arg0: i32) -> (i32, i32, i32) {
    %c0_i32 = arith.constant 0 : i32
    %c0_i32_0 = arith.constant 0 : i32
    %c0_i32_1 = arith.constant 0 : i32
    %c0_i32_2 = arith.constant 0 : i32
    return %c0_i32, %c0_i32_0, %c0_i32_1 : i32, i32, i32
  }
  func.func @transform_11(%arg0: i32) -> (i32, i32) {
    %c0_i32 = arith.constant 0 : i32
    %c0_i32_0 = arith.constant 0 : i32
    %c0_i32_1 = arith.constant 0 : i32
    return %c0_i32, %c0_i32_0 : i32, i32
  }
  func.func @transform_12(%arg0: i32) -> (i32, i32) {
    %c0_i32 = arith.constant 0 : i32
    %c0_i32_0 = arith.constant 0 : i32
    %c0_i32_1 = arith.constant 0 : i32
    return %c0_i32, %c0_i32_0 : i32, i32
  }
  func.func @transform_13(%arg0: i32) -> (i32, i32, i32) {
    %c0_i32 = arith.constant 0 : i32
    %c0_i32_0 = arith.constant 0 : i32
    %c0_i32_1 = arith.constant 0 : i32
    %c0_i32_2 = arith.constant 0 : i32
    return %c0_i32, %c0_i32_0, %c0_i32_1 : i32, i32, i32
  }
  func.func @transform_14(%arg0: i32) -> (i32, i32) {
    %c0_i32 = arith.constant 0 : i32
    %c0_i32_0 = arith.constant 0 : i32
    %c0_i32_1 = arith.constant 0 : i32
    return %c0_i32, %c0_i32_0 : i32, i32
  }
  func.func @transform_15(%arg0: i32) -> (i32, i32) {
    %c0_i32 = arith.constant 0 : i32
    %c0_i32_0 = arith.constant 0 : i32
    %c0_i32_1 = arith.constant 0 : i32
    return %c0_i32, %c0_i32_0 : i32, i32
  }
  func.func @transform_16(%arg0: i32) -> (i32, i32, i32) {
    %c0_i32 = arith.constant 0 : i32
    %c0_i32_0 = arith.constant 0 : i32
    %c0_i32_1 = arith.constant 0 : i32
    return %arg0, %c0_i32, %c0_i32_0 : i32, i32, i32
  }
}

</mosaic_0001>

<bundles_post_ra>
// kernel: tile.63
= control target key start
LH: loop header
LB: loop body
LE: loop exit
PB: predicated region body
PF: predicated region fallthrough
CT: control target
= control target key end

     0   :  { %vm9_vm0 = vcmask 15360   ;;  %s229_s12 = smov 126   ;;  %s230_s13 = smov 114   ;;  %vm3_vm1 = vcmask 48128   ;;  %vm13_vm2 = vcmask 31744   ;;  %vm16_vm3 = vcmask 1048560   ;;  %s351_s0 = inlined_call_operand.vmem [shape: f32[26,6], index: 0, kind: input, shape index: {}]   ;;  %s352_s1 = inlined_call_operand.vmem [shape: f32[1,156], index: 1, kind: output, shape index: {}]  }
   0x1   :  { %v177_v0 = vld [vmem:[%s351_s0 + $0x15] sm:$0x1]   ;;  %v180_v3 = vld [vmem:[%s351_s0 + $0x13] sm:$0x1]   ;;  %v179_v4 = vld [vmem:[%s351_s0 + $0x14] sm:$0x1]  }
   0x2   :  { %v178_v1 = vld [vmem:[%s351_s0 + $0x15] sm:$0x1]   ;;  %26 = vrot.lane.b32.xlu1 %v180_v3, %s230_s13  ;;  %v181_v5 = vld [vmem:[%s351_s0 + $0x12] sm:$0x1]   ;;  %s231_s18 = smov 120   ;;  %s232_s19 = smov 108  }
   0x3   :  { %v10_v2 = vsel %vm9_vm0, %v178_v1, %v177_v0  ;;  %v182_v6 = vld [vmem:[%s351_s0 + $0x11] sm:$0x1]   ;;  %v183_v7 = vld [vmem:[%s351_s0 + $0x10] sm:$0x1]   ;;  %s233_s24 = smov 102   ;;  %s234_s25 = smov 96  }
   0x4   :  { %11 = vrot.lane.b32.xlu0 %v10_v2, %s229_s12  ;;  %v184_v8 = vld [vmem:[%s351_s0 + $0xf] sm:$0x1]   ;;  %v185_v9 = vld [vmem:[%s351_s0 + $0xe] sm:$0x1]   ;;  %v2_v10 = vld [vmem:[%s351_s0] sm:$0x1]  }
   0x5   :  { %s235_s3 = smov 90   ;;  %s236_s4 = smov 84   ;;  %4 = vst.msk [vmem:[#allocation0] sm:$0x1] %vm3_vm1, %v2_v10   ;;  %v186_v11 = vld [vmem:[%s351_s0 + $0xd] sm:$0x1]  }
   0x6   :  { %32 = vrot.lane.b32.xlu1 %v181_v5, %s232_s19  ;;  %v187_v12 = vld [vmem:[%s351_s0 + $0xc] sm:$0x1]   ;;  %s237_s9 = smov 78   ;;  %s238_s10 = smov 72   ;;  %v188_v13 = vld [vmem:[%s351_s0 + $0xb] sm:$0x1]  }
   0x7   :  { %v189_v14 = vld [vmem:[%s351_s0 + $0xa] sm:$0x1]   ;;  %s239_s15 = smov 66   ;;  %s240_s16 = smov 60   ;;  %v190_v15 = vld [vmem:[%s351_s0 + $0x9] sm:$0x1]  }
   0x8   :  { %20 = vrot.lane.b32.xlu0 %v179_v4, %s231_s18  ;;  %v191_v16 = vld [vmem:[%s351_s0 + $0x8] sm:$0x1]   ;;  %s241_s21 = smov 54   ;;  %s242_s22 = smov 48   ;;  %v192_v17 = vld [vmem:[%s351_s0 + $0x7] sm:$0x1]  }
   0x9   :  { %v193_v18 = vld [vmem:[%s351_s0 + $0x6] sm:$0x1]   ;;  %s243_s27 = smov 42   ;;  %s244_s28 = smov 36   ;;  %v194_v19 = vld [vmem:[%s351_s0 + $0x5] sm:$0x1]  }
   0xa   :  { %44 = vrot.lane.b32.xlu1 %v183_v7, %s234_s25  ;;  %v195_v20 = vld [vmem:[%s351_s0 + $0x4] sm:$0x1]   ;;  %s246_s5 = smov 24   ;;  %v196_v21 = vld [vmem:[%s351_s0 + $0x19] sm:$0x1]   ;;  %s248_s11 = smov 18  }
   0xb   :  { %v197_v22 = vld [vmem:[%s351_s0 + $0x3] sm:$0x1]   ;;  %v198_v23 = vld [vmem:[%s351_s0 + $0x18] sm:$0x1]   ;;  %v199_v24 = vld [vmem:[%s351_s0 + $0x2] sm:$0x1]  }
   0xc   :  { %38 = vrot.lane.b32.xlu0 %v182_v6, %s233_s24  ;;  %s250_s17 = smov 12   ;;  %v200_v25 = vld [vmem:[%s351_s0 + $0x17] sm:$0x1]   ;;  %v201_v26 = vld [vmem:[%s351_s0 + $0x1] sm:$0x1]   ;;  %s252_s23 = smov 6  }
   0xd   :  { %v202_v27 = vld [vmem:[%s351_s0 + $0x16] sm:$0x1]   ;;  %s253_s0 = smov 4   ;;  %vm22_vm4 = vcmask 1032128   ;;  %vm28_vm5 = vcmask 982928   ;;  %vm34_vm6 = vcmask 933728  }
   0xe   :  { %56 = vrot.lane.b32.xlu1 %v185_v9, %s236_s4  ;;  %s245_s4 = smov 30   ;;  %vm40_vm7 = vcmask 884528   ;;  %vm46_vm8 = vcmask 835328   ;;  %vm52_vm9 = vcmask 786128   ;;  %vm58_vm10 = vcmask 736928  }
   0xf   :  { %vm64_vm11 = vcmask 687728   ;;  %vm70_vm12 = vcmask 638528   ;;  %vm76_vm13 = vcmask 589328   ;;  %vm82_vm14 = vcmask 540128  }
  0x10   :  { %50 = vrot.lane.b32.xlu0 %v184_v8, %s235_s3  ;;  %vm88_vm15 = vcmask 490928   ;;  %vm94_vm0 = vcmask 441728   ;;  %vm100_vm1 = vcmask 392528  }
  0x12   :  { %68 = vrot.lane.b32.xlu1 %v187_v12, %s238_s10  ;;  %s247_s10 = smov 22  }
  0x14   :  { %62 = vrot.lane.b32.xlu0 %v186_v11, %s237_s9 }
  0x16   :  { %80 = vrot.lane.b32.xlu1 %v189_v14, %s240_s16  ;;  %s249_s16 = smov 16  }
  0x18   :  { %74 = vrot.lane.b32.xlu0 %v188_v13, %s239_s15 }
  0x1a   :  { %92 = vrot.lane.b32.xlu1 %v191_v16, %s242_s22  ;;  %s251_s22 = smov 10  }
  0x1c   :  { %86 = vrot.lane.b32.xlu0 %v190_v15, %s241_s21 }
  0x1e   :  { %104 = vrot.lane.b32.xlu1 %v193_v18, %s244_s28 }
  0x20   :  { %98 = vrot.lane.b32.xlu0 %v192_v17, %s243_s27 }
  0x22   :  { %116 = vrot.lane.b32.xlu1 %v195_v20, %s246_s5 }
  0x24   :  { %110 = vrot.lane.b32.xlu0 %v194_v19, %s245_s4 }
  0x26   :  { %129 = vrot.lane.b32.xlu1 %v197_v22, %s248_s11 }
  0x28   :  { %122 = vrot.lane.b32.xlu0 %v196_v21, %s247_s10 }
  0x2a   :  { %142 = vrot.lane.b32.xlu1 %v199_v24, %s250_s17 }
  0x2c   :  { %135 = vrot.lane.b32.xlu0 %v198_v23, %s249_s16 }
  0x2e   :  { %155 = vrot.lane.b32.xlu1 %v201_v26, %s252_s23 }
  0x30   :  { %148 = vrot.lane.b32.xlu0 %v200_v25, %s251_s22 }
  0x34   :  { %161 = vrot.lane.b32.xlu0 %v202_v27, %s253_s0 }
  0x74   :  { %v27_v29 = vpop.permute.xlu1 %26  }
  0x76   :  { %v12_v28 = vpop.permute.xlu0 %11  }
  0x77   :  { %15 = vst.msk [vmem:[#allocation0 + $0x8] sm:$0x1] %vm13_vm2, %v12_v28   ;;  %vm106_vm2 = vcmask 343328  }
  0x78   :  { %17 = vst.msk [vmem:[#allocation0] sm:$0x1] %vm16_vm3, %v12_v28   ;;  %v33_v31 = vpop.permute.xlu1 %32   ;;  %vm112_vm3 = vcmask 294128  }
  0x7a   :  { %v21_v30 = vpop.permute.xlu0 %20  }
  0x7b   :  { %23 = vst.msk [vmem:[#allocation0] sm:$0x1] %vm22_vm4, %v21_v30   ;;  %vm118_vm4 = vcmask 244928  }
  0x7c   :  { %29 = vst.msk [vmem:[#allocation0] sm:$0x1] %vm28_vm5, %v27_v29   ;;  %v45_v33 = vpop.permute.xlu1 %44   ;;  %vm124_vm5 = vcmask 228528  }
  0x7d   :  { %35 = vst.msk [vmem:[#allocation0] sm:$0x1] %vm34_vm6, %v33_v31   ;;  %vm131_vm6 = vcmask 195728  }
  0x7e   :  { %v39_v32 = vpop.permute.xlu0 %38  }
  0x7f   :  { %41 = vst.msk [vmem:[#allocation0] sm:$0x1] %vm40_vm7, %v39_v32   ;;  %vm137_vm7 = vcmask 179328  }
  0x80   :  { %47 = vst.msk [vmem:[#allocation0] sm:$0x1] %vm46_vm8, %v45_v33   ;;  %v57_v35 = vpop.permute.xlu1 %56   ;;  %vm144_vm8 = vcmask 146528  }
  0x82   :  { %v51_v34 = vpop.permute.xlu0 %50  }
  0x83   :  { %53 = vst.msk [vmem:[#allocation0] sm:$0x1] %vm52_vm9, %v51_v34   ;;  %vm150_vm9 = vcmask 130128  }
  0x84   :  { %59 = vst.msk [vmem:[#allocation0] sm:$0x1] %vm58_vm10, %v57_v35   ;;  %v69_v37 = vpop.permute.xlu1 %68   ;;  %vm157_vm10 = vcmask 97328  }
  0x86   :  { %v63_v36 = vpop.permute.xlu0 %62  }
  0x87   :  { %65 = vst.msk [vmem:[#allocation0] sm:$0x1] %vm64_vm11, %v63_v36   ;;  %vm163_vm11 = vcmask 80928  }
  0x88   :  { %71 = vst.msk [vmem:[#allocation0] sm:$0x1] %vm70_vm12, %v69_v37   ;;  %v81_v39 = vpop.permute.xlu1 %80  }
  0x8a   :  { %v75_v38 = vpop.permute.xlu0 %74  }
  0x8b   :  { %77 = vst.msk [vmem:[#allocation0] sm:$0x1] %vm76_vm13, %v75_v38  }
  0x8c   :  { %83 = vst.msk [vmem:[#allocation0] sm:$0x1] %vm82_vm14, %v81_v39   ;;  %v93_v41 = vpop.permute.xlu1 %92  }
  0x8e   :  { %v87_v40 = vpop.permute.xlu0 %86  }
  0x8f   :  { %89 = vst.msk [vmem:[#allocation0] sm:$0x1] %vm88_vm15, %v87_v40  }
  0x90   :  { %95 = vst.msk [vmem:[#allocation0] sm:$0x1] %vm94_vm0, %v93_v41   ;;  %v105_v43 = vpop.permute.xlu1 %104  }
  0x92   :  { %v99_v42 = vpop.permute.xlu0 %98  }
  0x93   :  { %101 = vst.msk [vmem:[#allocation0] sm:$0x1] %vm100_vm1, %v99_v42  }
  0x94   :  { %107 = vst.msk [vmem:[#allocation0] sm:$0x1] %vm106_vm2, %v105_v43   ;;  %v117_v45 = vpop.permute.xlu1 %116  }
  0x96   :  { %v111_v44 = vpop.permute.xlu0 %110  }
  0x97   :  { %113 = vst.msk [vmem:[#allocation0] sm:$0x1] %vm112_vm3, %v111_v44  }
  0x98   :  { %119 = vst.msk [vmem:[#allocation0] sm:$0x1] %vm118_vm4, %v117_v45   ;;  %v130_v47 = vpop.permute.xlu1 %129  }
  0x99   :  { %132 = vst.msk [vmem:[#allocation0] sm:$0x1] %vm131_vm6, %v130_v47  }
  0x9a   :  { %v123_v46 = vpop.permute.xlu0 %122  }
  0x9b   :  { %126 = vst.msk [vmem:[#allocation0 + $0x8] sm:$0x1] %vm124_vm5, %v123_v46  }
  0x9c   :  { %v143_v49 = vpop.permute.xlu1 %142  }
  0x9d   :  { %145 = vst.msk [vmem:[#allocation0] sm:$0x1] %vm144_vm8, %v143_v49  }
  0x9e   :  { %v136_v48 = vpop.permute.xlu0 %135  }
  0x9f   :  { %139 = vst.msk [vmem:[#allocation0 + $0x8] sm:$0x1] %vm137_vm7, %v136_v48  }
  0xa0   :  { %v156_v51 = vpop.permute.xlu1 %155  }
  0xa1   :  { %158 = vst.msk [vmem:[#allocation0] sm:$0x1] %vm157_vm10, %v156_v51  }
  0xa2   :  { %v149_v50 = vpop.permute.xlu0 %148  }
  0xa3   :  { %152 = vst.msk [vmem:[#allocation0 + $0x8] sm:$0x1] %vm150_vm9, %v149_v50  }
  0xa6   :  { %v162_v52 = vpop.permute.xlu0 %161  }
  0xa7   :  { %165 = vst.msk [vmem:[#allocation0 + $0x8] sm:$0x1] %vm163_vm11, %v162_v52  }
  0xa8   :  { %v169_v53 = vld [vmem:[#allocation0] sm:$0x1] }
  0xa9   :  { %171 = vst [vmem:[%s352_s1] sm:$0x1] %v169_v53 }
  0xae   :  { %v173_v54 = vld [vmem:[#allocation0 + $0x8] sm:$0x1] }
  0xaf   :  { %203 = vst [vmem:[%s352_s1 + $0x1] sm:$0x1] %v173_v54 }

// kernel: tile.71
= control target key start
LH: loop header
LB: loop body
LE: loop exit
PB: predicated region body
PF: predicated region fallthrough
CT: control target
= control target key end

     0   :  { %s34_s0 = inlined_call_operand.vmem [shape: f32[32], index: 0, kind: input, shape index: {}]   ;;  %s35_s1 = inlined_call_operand.vmem [shape: f32[24,32], index: 1, kind: output, shape index: {}]  }
   0x1   :  { %v4_v0 = vld [vmem:[%s34_s0] ss:$0 sm:$0xff] }
   0x2   :  { %5 = vst [vmem:[%s35_s1] sm:$0xff] %v4_v0  ;;  %10 = vst [vmem:[%s35_s1 + $0x8] sm:$0xff] %v4_v0 }
   0x3   :  { %11 = vst [vmem:[%s35_s1 + $0x10] sm:$0xff] %v4_v0 }

// kernel: tile.73
= control target key start
LH: loop header
LB: loop body
LE: loop exit
PB: predicated region body
PF: predicated region fallthrough
CT: control target
= control target key end

     0   :  { %s77_s8 = smov 96   ;;  %vm3_vm0 = vcmask 261120   ;;  %s79_s15 = smov 64   ;;  %vm10_vm1 = vcmask 1048320   ;;  %vm17_vm2 = vcmask 785920   ;;  %vm24_vm3 = vcmask 523520   ;;  %s120_s0 = inlined_call_operand.vmem [shape: f32[24,32], index: 0, kind: input, shape index: {}]   ;;  %s121_s1 = inlined_call_operand.vmem [shape: f32[1,768], index: 1, kind: output, shape index: {}]  }
   0x1   :  { %v66_v0 = vld [vmem:[%s120_s0 + $0x3] ss:$4 sm:$0x3f]   ;;  %v67_v1 = vld [vmem:[%s120_s0 + $0x2] ss:$4 sm:$0x3f]  }
   0x2   :  { %8 = vrot.lane.b32.xlu0 %v66_v0, %s77_s8  ;;  %v68_v2 = vld [vmem:[%s120_s0 + $0x1] ss:$4 sm:$0x3f]   ;;  %v2_v3 = vld [vmem:[%s120_s0] ss:$4 sm:$0x3f]  }
   0x3   :  { %s78_s0 = smov 32   ;;  %4 = vst.msk [vmem:[#allocation0] ss:$8 sm:$0xf] %vm3_vm0, %v2_v3  }
   0x4   :  { %22 = vrot.lane.b32.xlu1 %v68_v2, %s78_s0  ;;  %5 = vst.msk [vmem:[#allocation0] ss:$8 sm:$0x30] %vm3_vm0, %v2_v3  }
   0x6   :  { %15 = vrot.lane.b32.xlu0 %v67_v1, %s79_s15 }
  0x74   :  { %v9_v4 = vpop.permute.xlu0 %8  }
  0x75   :  { %11 = vst.msk [vmem:[#allocation0] ss:$8 sm:$0xf] %vm10_vm1, %v9_v4   ;;  %12 = vst.msk [vmem:[#allocation0] ss:$8 sm:$0x30] %vm10_vm1, %v9_v4  }
  0x76   :  { %v23_v5 = vpop.permute.xlu1 %22  }
  0x78   :  { %v16_v6 = vpop.permute.xlu0 %15  }
  0x79   :  { %18 = vst.msk [vmem:[#allocation0] ss:$8 sm:$0xf] %vm17_vm2, %v16_v6   ;;  %19 = vst.msk [vmem:[#allocation0] ss:$8 sm:$0x30] %vm17_vm2, %v16_v6  }
  0x7a   :  { %25 = vst.msk [vmem:[#allocation0] ss:$8 sm:$0xf] %vm24_vm3, %v23_v5   ;;  %26 = vst.msk [vmem:[#allocation0] ss:$8 sm:$0x30] %vm24_vm3, %v23_v5  }
  0x81   :  { %v30_v7 = vld [vmem:[#allocation0] sm:$0x1]  ;;  %v34_v8 = vld [vmem:[#allocation0 + $0x8] sm:$0x1]  ;;  %v39_v9 = vld [vmem:[#allocation0 + $0x10] sm:$0x1] }
  0x82   :  { %32 = vst [vmem:[%s121_s1] sm:$0x1] %v30_v7  ;;  %69 = vst [vmem:[%s121_s1 + $0x1] sm:$0x1] %v34_v8  ;;  %v45_v10 = vld [vmem:[#allocation0 + $0x18] sm:$0x1] }
  0x83   :  { %70 = vst [vmem:[%s121_s1 + $0x2] sm:$0x1] %v39_v9  ;;  %v51_v11 = vld [vmem:[#allocation0 + $0x20] sm:$0x1]  ;;  %v57_v12 = vld [vmem:[#allocation0 + $0x28] sm:$0x1] }
  0x84   :  { %71 = vst [vmem:[%s121_s1 + $0x3] sm:$0x1] %v45_v10  ;;  %72 = vst [vmem:[%s121_s1 + $0x4] sm:$0x1] %v51_v11 }
  0x85   :  { %73 = vst [vmem:[%s121_s1 + $0x5] sm:$0x1] %v57_v12 }

// kernel: tile.81
= control target key start
LH: loop header
LB: loop body
LE: loop exit
PB: predicated region body
PF: predicated region fallthrough
CT: control target
= control target key end

     0   :  { %s28_s0 = inlined_call_operand.vmem [shape: f32[16], index: 0, kind: input, shape index: {}]   ;;  %s29_s1 = inlined_call_operand.vmem [shape: f32[10,16], index: 1, kind: output, shape index: {}]  }
   0x1   :  { %v4_v0 = vld [vmem:[%s28_s0] ss:$0 sm:$0xff] }
   0x2   :  { %5 = vst [vmem:[%s29_s1] sm:$0xff] %v4_v0  ;;  %8 = vst [vmem:[%s29_s1 + $0x8] sm:$0xff] %v4_v0 }

// kernel: tile.83
= control target key start
LH: loop header
LB: loop body
LE: loop exit
PB: predicated region body
PF: predicated region fallthrough
CT: control target
= control target key end

     0   :  { %s75_s10 = smov 112   ;;  %s76_s11 = smov 80   ;;  %vm4_vm0 = vcmask 130048   ;;  %vm10_vm1 = vcmask 1048448   ;;  %vm16_vm2 = vcmask 917248   ;;  %vm22_vm3 = vcmask 786048   ;;  %s122_s0 = inlined_call_operand.vmem [shape: f32[10,16], index: 0, kind: input, shape index: {}]   ;;  %s123_s1 = inlined_call_operand.vmem [shape: f32[1,160], index: 1, kind: output, shape index: {}]  }
   0x1   :  { %v60_v0 = vld [vmem:[%s122_s0 + $0x7] sm:$0x1]   ;;  %v62_v1 = vld [vmem:[%s122_s0 + $0x5] sm:$0x1]   ;;  %v61_v2 = vld [vmem:[%s122_s0 + $0x6] sm:$0x1]  }
   0x2   :  { %8 = vrot.lane.b32.xlu0 %v60_v0, %s75_s10  ;;  %20 = vrot.lane.b32.xlu1 %v62_v1, %s76_s11  ;;  %v63_v3 = vld [vmem:[%s122_s0 + $0x4] sm:$0x1]   ;;  %s2_s16 = smov 3  ;;  %s77_s17 = smov 96   ;;  %v64_v5 = vld [vmem:[%s122_s0 + $0x3] sm:$0x1]  }
   0x3   :  { %s78_s18 = smov 64   ;;  %v3_v4 = vld [vmem:[%s122_s0] ss:$8 sm:%s2_s16]   ;;  %v65_v6 = vld [vmem:[%s122_s0 + $0x2] sm:$0x1]   ;;  %s43_s25 = smov 3 }
   0x4   :  { %5 = vst.msk [vmem:[#allocation0] ss:$8 sm:$0x3] %vm4_vm0, %v3_v4   ;;  %s79_s26 = smov 48   ;;  %s80_s27 = smov 32   ;;  %vm28_vm4 = vcmask 654848  }
   0x5   :  { %v66_v7 = vld [vmem:[%s122_s0 + $0x1] ss:$8 sm:%s43_s25]   ;;  %s81_s0 = smov 16   ;;  %vm34_vm5 = vcmask 523648   ;;  %vm40_vm6 = vcmask 392448   ;;  %vm47_vm7 = vcmask 261248  }
   0x6   :  { %14 = vrot.lane.b32.xlu0 %v61_v2, %s77_s17  ;;  %26 = vrot.lane.b32.xlu1 %v63_v3, %s78_s18 }
   0xa   :  { %32 = vrot.lane.b32.xlu0 %v64_v5, %s79_s26  ;;  %38 = vrot.lane.b32.xlu1 %v65_v6, %s80_s27 }
   0xe   :  { %45 = vrot.lane.b32.xlu0 %v66_v7, %s81_s0 }
  0x74   :  { %v9_v8 = vpop.permute.xlu0 %8   ;;  %v21_v9 = vpop.permute.xlu1 %20  }
  0x75   :  { %11 = vst.msk [vmem:[#allocation0] sm:$0x1] %vm10_vm1, %v9_v8  }
  0x78   :  { %v15_v10 = vpop.permute.xlu0 %14   ;;  %v27_v11 = vpop.permute.xlu1 %26  }
  0x79   :  { %17 = vst.msk [vmem:[#allocation0] sm:$0x1] %vm16_vm2, %v15_v10  }
  0x7a   :  { %23 = vst.msk [vmem:[#allocation0] sm:$0x1] %vm22_vm3, %v21_v9  }
  0x7b   :  { %29 = vst.msk [vmem:[#allocation0] sm:$0x1] %vm28_vm4, %v27_v11  }
  0x7c   :  { %v33_v12 = vpop.permute.xlu0 %32   ;;  %v39_v13 = vpop.permute.xlu1 %38  }
  0x7d   :  { %35 = vst.msk [vmem:[#allocation0] sm:$0x1] %vm34_vm5, %v33_v12  }
  0x7e   :  { %41 = vst.msk [vmem:[#allocation0] sm:$0x1] %vm40_vm6, %v39_v13  }
  0x80   :  { %v46_v14 = vpop.permute.xlu0 %45  }
  0x81   :  { %48 = vst.msk [vmem:[#allocation0] ss:$8 sm:$0x3] %vm47_vm7, %v46_v14  }
  0x88   :  { %v52_v15 = vld [vmem:[#allocation0] sm:$0x1]  ;;  %v56_v16 = vld [vmem:[#allocation0 + $0x8] sm:$0x1] }
  0x89   :  { %54 = vst [vmem:[%s123_s1] sm:$0x1] %v52_v15  ;;  %67 = vst [vmem:[%s123_s1 + $0x1] sm:$0x1] %v56_v16 }

// kernel: tile.91
= control target key start
LH: loop header
LB: loop body
LE: loop exit
PB: predicated region body
PF: predicated region fallthrough
CT: control target
= control target key end

     0   :  { %s22_s0 = inlined_call_operand.vmem [shape: f32[16], index: 0, kind: input, shape index: {}]   ;;  %s23_s1 = inlined_call_operand.vmem [shape: f32[8,16], index: 1, kind: output, shape index: {}]  }
   0x1   :  { %v4_v0 = vld [vmem:[%s22_s0] ss:$0 sm:$0xff] }
   0x2   :  { %5 = vst [vmem:[%s23_s1] sm:$0xff] %v4_v0 }

// kernel: tile.93
= control target key start
LH: loop header
LB: loop body
LE: loop exit
PB: predicated region body
PF: predicated region fallthrough
CT: control target
= control target key end

     0   :  { %s67_s10 = smov 112   ;;  %s68_s11 = smov 80   ;;  %vm3_vm0 = vcmask 130048   ;;  %vm9_vm1 = vcmask 1048448   ;;  %vm15_vm2 = vcmask 917248   ;;  %vm21_vm3 = vcmask 786048   ;;  %s111_s0 = inlined_call_operand.vmem [shape: f32[8,16], index: 0, kind: input, shape index: {}]   ;;  %s112_s1 = inlined_call_operand.vmem [shape: f32[1,128], index: 1, kind: output, shape index: {}]  }
   0x1   :  { %v53_v0 = vld [vmem:[%s111_s0 + $0x7] sm:$0x1]   ;;  %v55_v1 = vld [vmem:[%s111_s0 + $0x5] sm:$0x1]   ;;  %v54_v2 = vld [vmem:[%s111_s0 + $0x6] sm:$0x1]  }
   0x2   :  { %7 = vrot.lane.b32.xlu0 %v53_v0, %s67_s10  ;;  %19 = vrot.lane.b32.xlu1 %v55_v1, %s68_s11  ;;  %v56_v3 = vld [vmem:[%s111_s0 + $0x4] sm:$0x1]   ;;  %v2_v4 = vld [vmem:[%s111_s0] sm:$0x1]   ;;  %s69_s18 = smov 96   ;;  %s70_s19 = smov 64  }
   0x3   :  { %4 = vst.msk [vmem:[#allocation0] sm:$0x1] %vm3_vm0, %v2_v4   ;;  %v57_v5 = vld [vmem:[%s111_s0 + $0x3] sm:$0x1]   ;;  %v58_v6 = vld [vmem:[%s111_s0 + $0x2] sm:$0x1]  }
   0x4   :  { %s71_s24 = smov 48   ;;  %s72_s25 = smov 32   ;;  %v59_v7 = vld [vmem:[%s111_s0 + $0x1] sm:$0x1]   ;;  %vm27_vm4 = vcmask 654848   ;;  %vm33_vm5 = vcmask 523648  }
   0x5   :  { %s73_s0 = smov 16   ;;  %vm39_vm6 = vcmask 392448   ;;  %vm45_vm7 = vcmask 261248  }
   0x6   :  { %13 = vrot.lane.b32.xlu0 %v54_v2, %s69_s18  ;;  %25 = vrot.lane.b32.xlu1 %v56_v3, %s70_s19 }
   0xa   :  { %31 = vrot.lane.b32.xlu0 %v57_v5, %s71_s24  ;;  %37 = vrot.lane.b32.xlu1 %v58_v6, %s72_s25 }
   0xe   :  { %43 = vrot.lane.b32.xlu0 %v59_v7, %s73_s0 }
  0x74   :  { %v8_v8 = vpop.permute.xlu0 %7   ;;  %v20_v9 = vpop.permute.xlu1 %19  }
  0x75   :  { %10 = vst.msk [vmem:[#allocation0] sm:$0x1] %vm9_vm1, %v8_v8  }
  0x78   :  { %v14_v10 = vpop.permute.xlu0 %13   ;;  %v26_v11 = vpop.permute.xlu1 %25  }
  0x79   :  { %16 = vst.msk [vmem:[#allocation0] sm:$0x1] %vm15_vm2, %v14_v10  }
  0x7a   :  { %22 = vst.msk [vmem:[#allocation0] sm:$0x1] %vm21_vm3, %v20_v9  }
  0x7b   :  { %28 = vst.msk [vmem:[#allocation0] sm:$0x1] %vm27_vm4, %v26_v11  }
  0x7c   :  { %v32_v12 = vpop.permute.xlu0 %31   ;;  %v38_v13 = vpop.permute.xlu1 %37  }
  0x7d   :  { %34 = vst.msk [vmem:[#allocation0] sm:$0x1] %vm33_vm5, %v32_v12  }
  0x7e   :  { %40 = vst.msk [vmem:[#allocation0] sm:$0x1] %vm39_vm6, %v38_v13  }
  0x80   :  { %v44_v14 = vpop.permute.xlu0 %43  }
  0x81   :  { %46 = vst.msk [vmem:[#allocation0] sm:$0x1] %vm45_vm7, %v44_v14  }
  0x88   :  { %v50_v15 = vld [vmem:[#allocation0] sm:$0x1] }
  0x89   :  { %52 = vst [vmem:[%s112_s1] sm:$0x1] %v50_v15 }

// kernel: mnist_forward.1
= control target key start
LH: loop header
LB: loop body
LE: loop exit
PB: predicated region body
PF: predicated region fallthrough
CT: control target
= control target key end

     0   :  { %s9346_s0 = inlined_call_operand.vmem [shape: f32[2,28,28], index: 0, kind: input, shape index: {}]   ;;  %s9347_s1 = inlined_call_operand.vmem [shape: f32[3,28,156], index: 1, kind: input, shape index: {}]   ;;  %s9348_s2 = inlined_call_operand.vmem [shape: f32[2,156], index: 2, kind: input, shape index: {}]   ;;  %s9349_s3 = inlined_call_operand.vmem [shape: f32[3,156,768], index: 3, kind: input, shape index: {}]   ;;  %s9350_s4 = inlined_call_operand.vmem [shape: f32[2,768], index: 4, kind: input, shape index: {}]   ;;  %s9351_s5 = inlined_call_operand.vmem [shape: f32[1,768,144], index: 5, kind: input, shape index: {}]   ;;  %s9352_s6 = inlined_call_operand.vmem [shape: f32[2,144,72], index: 6, kind: input, shape index: {}]   ;;  %s9353_s7 = inlined_call_operand.vmem [shape: f32[2,12,24], index: 7, kind: input, shape index: {}]   ;;  %s9354_s8 = inlined_call_operand.vmem [shape: f32[3,72,160], index: 8, kind: input, shape index: {}]   ;;  %s9355_s9 = inlined_call_operand.vmem [shape: f32[2,160], index: 9, kind: input, shape index: {}]   ;;  %s9356_s10 = inlined_call_operand.vmem [shape: f32[3,160,128], index: 10, kind: input, shape index: {}]   ;;  %s9357_s11 = inlined_call_operand.vmem [shape: f32[2,128], index: 11, kind: input, shape index: {}]   ;;  %s9358_s12 = inlined_call_operand.vmem [shape: f32[10,8], index: 12, kind: input, shape index: {}]   ;;  %s9359_s13 = inlined_call_operand.vmem [shape: f32[3,128,128], index: 13, kind: input, shape index: {}]   ;;  %s9360_s14 = inlined_call_operand.vmem [shape: f32[2,128], index: 14, kind: input, shape index: {}]   ;;  %s9361_s15 = inlined_call_operand.vmem [shape: f32[128,10], index: 15, kind: input, shape index: {}]   ;;  %s9362_s16 = inlined_call_operand.hbm [shape: f32[2,1,10], index: 16, kind: output, shape index: {}]  }
   0x1   :  { %9370 = sst [smem:[#allocation11_spill]] %s9346_s0 }
   0x2   :  { %9371 = sst [smem:[#allocation12_spill]] %s9362_s16 }
   0x3   :  { %21 = vsyncpa [#allocation3], 0 }
   0x4   :  { %23 = vsyncpa [#allocation3 + $0x1], 0  ;;  %s6291_s21 = smov 0   ;;  %s6293_s22 = smov 0  }
   0x5   :  { %s6295_s23 = smov 0   ;;  %s6297_s24 = smov 0  }
   0x6 LB: > { %9372 = sst [smem:[#allocation5_spill]] %s6187_s21  ;;  %s6312_s25 = sadd.s32 4294967295, %s6199_s24   ;;  %s6199_s24 = sphi %s6297_s24, %s9388_s24   ;;  %s6195_s23 = sphi %s6295_s23, %s9390_s23   ;;  %s6191_s22 = sphi %s6293_s22, %s9392_s22   ;;  %s6187_s21 = sphi %s6291_s21, %s9391_s21  }
   0x7   : > { %9373 = sst [smem:[#allocation6_spill]] %s6195_s23  ;;  %s4392_s26 = sadd.s32 4294967294, %s6199_s24  }
   0x8   : > { %9374 = sst [smem:[#allocation7_spill]] %s6199_s24  ;;  %s6316_s27 = sadd.s32 1, %s6199_s24  }
   0x9   : > { %9375 = sst [smem:[#allocation8_spill]] %s6316_s27  ;;  %s377_s28 = sadd.s32 1, %s6195_s23 }
   0xa   : > { %s374_s29 = ssub.s32 %s6199_s24, %s6316_s27  ;;  %p387_p0 = scmp.ne.s32.totalorder %s6195_s23, %s6191_s22 }
   0xb   : > { %p375_p1 = scmp.eq.s32.totalorder %s374_s29, 0  ;;  %p388_p2 = scmp.eq.s32.totalorder %s6312_s25, 1 }
   0xc   : > { %p393_p3 = scmp.ne.s32.totalorder %s6191_s22, %s6187_s21  ;;  %p394_p4 = scmp.eq.s32.totalorder %s4392_s26, 1 }
   0xd   : > { %s6327_s30 = scalar_select %p375_p1, %s6195_s23, %s377_s28  }
   0xe   : > { %p6329_p5 = por %p388_p2, %p387_p0  ;;  %p6333_p6 = por %p394_p4, %p393_p3 }
   0xf   : > { %9376 = sst [smem:[#allocation9_spill]] %s6327_s30  ;;  %p4395_p7 = scmp.ge.s32.totalorder %s6199_s24, 1 }
  0x10   : > { %s9378_s17 = scalar_select %p6333_p6, 1, 0 }
  0x11   : > { %p465_p8 = scmp.lt.s32.totalorder %s6199_s24, 3 }
  0x12   : > { %9379 = sst [smem:[#allocation10_spill]] %s9378_s17 }
  0x13   : > { %p466_p9 = pnand %p4395_p7, %p465_p8 }
  0x14   : > { %v524_v0 = vld [vmem:[%s9347_s1 + $0x8] sm:$0xff] (!%p466_p9)  ;;  %v526_v1 = vld [vmem:[%s9347_s1 + $0x18] sm:$0xff] (!%p466_p9)  ;;  %v523_v2 = vld [vmem:[%s9347_s1] sm:$0xff] (!%p466_p9)  ;;  %vm561_vm0 = vcmask (!%p466_p9), 1043456   ;;  %v6201_v7 = vmov (!%p466_p9), 0.0   ;;  %p514_p10 = scmp.lt.s32.totalorder (!%p466_p9), %s6312_s25, 1 }
  0x15   : > { %469 = sbr.rel (%p466_p9) target bundleno = 3104 (0xc20), region = 84  ;;  %v5124_v3 = vpack.c.bf16 (!%p466_p9), %v526_v1, %v524_v0  ;;  %v525_v4 = vld [vmem:[%s9347_s1 + $0x10] sm:$0xff] (!%p466_p9)  ;;  %v528_v5 = vld [vmem:[%s9347_s1 + $0x28] sm:$0xff] (!%p466_p9)  ;;  %v530_v6 = vld [vmem:[%s9347_s1 + $0x38] sm:$0xf] (!%p466_p9)  ;;  %735 = vmatprep.mubr.f32.mxu0 (!%p466_p9), %v6201_v7  ;;  %632 = vmatprep.mubr.f32.mxu1 (!%p466_p9), %v6201_v7  ;;  %vm6202_vm1 = vmmov (!%p466_p9), 1  }
  0x16   : > { %v5126_v8 = vpack.c.bf16 (!%p466_p9), %v525_v4, %v523_v2  ;;  %vm6360_vm2 = vmpackc.low (!%p466_p9), %vm561_vm0, %vm6202_vm1  ;;  %v5128_v10 = vpack.c.bf16 (!%p466_p9), %v530_v6, %v528_v5  ;;  %v527_v11 = vld [vmem:[%s9347_s1 + $0x20] sm:$0xff] (!%p466_p9)  ;;  %v529_v12 = vld [vmem:[%s9347_s1 + $0x30] sm:$0xf] (!%p466_p9)  ;;  %s9382_s28 = sld [smem:[#allocation11_spill]] (!%p466_p9)  ;;  %vm552_vm3 = vcmask (!%p466_p9), 228352   ;;  %vm544_vm4 = vcmask (!%p466_p9), 1046528  }
  0x17   : > { %5125 = vmatprep.subr.bf16.mxu0 (!%p466_p9), %v5124_v3  ;;  %v4419_v13 = vld [vmem:[%s9347_s1 + $0x88] sm:$0xff] (!%p466_p9)  ;;  %v4421_v14 = vld [vmem:[%s9347_s1 + $0x98] sm:$0xff] (!%p466_p9)  ;;  %v4418_v15 = vld [vmem:[%s9347_s1 + $0x80] sm:$0xff] (!%p466_p9)  ;;  %v5131_v16 = vpack.c.bf16 (!%p466_p9), %v529_v12, %v527_v11  ;;  %vm769_vm5 = vcmask (!%p466_p9), 1045504   ;;  %vm2816_vm6 = vcmask (!%p466_p9), 130048   ;;  %vm3010_vm7 = vcmask (!%p466_p9), 195584  }
  0x18   : > { %5127 = vmatpush1.bf16.msra.mxu0 (!%p466_p9), %v5126_v8  ;;  %v4420_v17 = vld [vmem:[%s9347_s1 + $0x90] sm:$0xff] (!%p466_p9)  ;;  %v4399_v18 = vld [vmem:[%s9347_s1 + $0x48] sm:$0xff] (!%p466_p9)  ;;  %v4401_v19 = vld [vmem:[%s9347_s1 + $0x58] sm:$0xff] (!%p466_p9)  ;;  %v5134_v20 = vpack.c.bf16 (!%p466_p9), %v4421_v14, %v4419_v13  ;;  %vm3220_vm8 = vcmask (!%p466_p9), 588800   ;;  %vm3592_vm9 = vcmask (!%p466_p9), 261120   ;;  %vm3852_vm10 = vcmask (!%p466_p9), 64512  }
  0x19   : > { %5130 = vmatprep.subr.msk.bf16.mxu0 (!%p466_p9), %vm6360_vm2, %v5128_v10  ;;  %v5114_v21 = vpack.c.bf16 (!%p466_p9), %v4401_v19, %v4399_v18  ;;  %v4398_v22 = vld [vmem:[%s9347_s1 + $0x40] sm:$0xff] (!%p466_p9)  ;;  %v4400_v23 = vld [vmem:[%s9347_s1 + $0x50] sm:$0xff] (!%p466_p9)  ;;  %v4403_v24 = vld [vmem:[%s9347_s1 + $0x68] sm:$0xff] (!%p466_p9)  ;;  %v5136_v31 = vpack.c.bf16 (!%p466_p9), %v4420_v17, %v4418_v15  ;;  %vm6204_vm11 = vmmov (!%p466_p9), 0   ;;  %vm4310_vm12 = vcmask (!%p466_p9), 73728   ;;  %s9383_s23 = sld [smem:[#allocation12_spill]] (!%p466_p9) }
  0x1a   : > { %v5116_v25 = vpack.c.bf16 (!%p466_p9), %v4400_v23, %v4398_v22  ;;  %v4405_v26 = vld [vmem:[%s9347_s1 + $0x78] sm:$0xf] (!%p466_p9)  ;;  %v4402_v27 = vld [vmem:[%s9347_s1 + $0x60] sm:$0xff] (!%p466_p9)  ;;  %v4404_v28 = vld [vmem:[%s9347_s1 + $0x70] sm:$0xf] (!%p466_p9) }
  0x1b   : > { %5115 = vmatprep.subr.bf16.mxu1 (!%p466_p9), %v5114_v21  ;;  %v5118_v29 = vpack.c.bf16 (!%p466_p9), %v4405_v26, %v4403_v24  ;;  %v5121_v34 = vpack.c.bf16 (!%p466_p9), %v4404_v28, %v4402_v27  ;;  %v4423_v35 = vld [vmem:[%s9347_s1 + $0xa8] sm:$0xff] (!%p466_p9)  ;;  %v4422_v36 = vld [vmem:[%s9347_s1 + $0xa0] sm:$0xff] (!%p466_p9)  ;;  %v4425_v38 = vld [vmem:[%s9347_s1 + $0xb8] sm:$0xf] (!%p466_p9) }
  0x1c   : > { %s515_s20 = scalar_select %p514_p10, %s6312_s25, 1  ;;  %5133 = vmatpush1.bf16.msk.msra.mxu0 %vm6360_vm2, %v5131_v16  ;;  %5117 = vmatpush1.bf16.msra.mxu1 %v5116_v25  ;;  %v4424_v39 = vld [vmem:[%s9347_s1 + $0xb0] sm:$0xf]  ;;  %v4433_v40 = vld [vmem:[%s9349_s3 + $0x3c8] sm:$0xff]  ;;  %v5138_v41 = vpack.c.bf16 %v4425_v38, %v4423_v35  ;;  %v4439_v42 = vld [vmem:[%s9349_s3 + $0x3f8] sm:$0xff] }
  0x1d   : > { %5135 = vmatprep.subr.bf16.mxu0 %v5134_v20  ;;  %5120 = vmatprep.subr.msk.bf16.mxu1 %vm6360_vm2, %v5118_v29  ;;  %v4435_v43 = vld [vmem:[%s9349_s3 + $0x3d8] sm:$0xff]  ;;  %v4441_v44 = vld [vmem:[%s9349_s3 + $0x408] sm:$0xff]  ;;  %v5141_v45 = vpack.c.bf16 %v4424_v39, %v4422_v36  ;;  %v5144_v46 = vpack.c.bf16 %v4439_v42, %v4433_v40  ;;  %v4432_v47 = vld [vmem:[%s9349_s3 + $0x3c0] sm:$0xff] }
  0x1e   : > { %s4869_s29 = sshll.u32 %s515_s20, 5  ;;  %v4438_v48 = vld [vmem:[%s9349_s3 + $0x3f0] sm:$0xff]  ;;  %v5186_v50 = vpack.c.bf16 %v4441_v44, %v4435_v43  ;;  %v4445_v51 = vld [vmem:[%s9349_s3 + $0x428] sm:$0xff]  ;;  %v4451_v52 = vld [vmem:[%s9349_s3 + $0x458] sm:$0xff]  ;;  %s4866_s20 = sshll.u32 %s6312_s25, 4 }
  0x1f   : > { %s6403_s24 = scalar_lea.vmem %s9382_s28, %s4869_s29  ;;  %v5146_v55 = vpack.c.bf16 %v4438_v48, %v4432_v47  ;;  %v5148_v56 = vpack.c.bf16 %v4451_v52, %v4445_v51  ;;  %v4444_v57 = vld [vmem:[%s9349_s3 + $0x420] sm:$0xff]  ;;  %v4450_v58 = vld [vmem:[%s9349_s3 + $0x450] sm:$0xff]  ;;  %v4457_v59 = vld [vmem:[%s9349_s3 + $0x488] sm:$0xff]  ;;  %s512_s28 = sand.u32 1, %s6191_s22  }
  0x20   : > { %v6417_v30 = vld [vmem:[%s6403_s24] sm:$0xff]  ;;  %v6421_v33 = vld [vmem:[%s6403_s24 + $0x8] sm:$0xff]  ;;  %v6460_v49 = vld [vmem:[%s6403_s24 + $0x10] sm:$0xff]  ;;  %5123 = vmatpush1.bf16.msk.msra.mxu1 %vm6360_vm2, %v5121_v34  ;;  %v5150_v0 = vpack.c.bf16 %v4450_v58, %v4444_v57  ;;  %s513_s21 = scalar_lea.vmem [#allocation2], %s512_s28  ;;  %s9384_s16 = smov %s9383_s23 }
  0x21   : > { %v545_v32 = vrot.slane %v6417_v30, 1  ;;  %v546_v37 = vrot.slane %v6421_v33, 1  ;;  %4414 = vmatmul.mubr.msk.f32.vlgmr.msra.gmra.mrb[0].mxu0 %vm552_vm3, %v6417_v30  ;;  %v548_v53 = vrot.slane %v6460_v49, 1  ;;  %5145 = vmatprep.subr.bf16.mxu1 %v5144_v46  ;;  %v4463_v60 = vld [vmem:[%s9349_s3 + $0x4b8] sm:$0xff]  ;;  %v4456_v2 = vld [vmem:[%s9349_s3 + $0x480] sm:$0xff]  ;;  %v4462_v3 = vld [vmem:[%s9349_s3 + $0x4b0] sm:$0xff]  ;;  %s9303_s29 = scalar_lea.hbm %s9383_s23, %s4866_s20 }
  0x22   : > { %741 = vmatprep.mubr.f32.mxu0 %v6201_v7  ;;  %5137 = vmatpush1.bf16.msra.mxu0 %v5136_v31  ;;  %v6492_v61 = vld [vmem:[%s6403_s24 + $0x18] sm:$0xf]  ;;  %v5152_v1 = vpack.c.bf16 %v4463_v60, %v4457_v59  ;;  %v770_v4 = vrot.slane %v6417_v30, 2  ;;  %v771_v5 = vrot.slane %v6421_v33, 2  ;;  %v4469_v6 = vld [vmem:[%s9349_s3 + $0x4e8] sm:$0xff]  ;;  %v4434_v10 = vld [vmem:[%s9349_s3 + $0x3d0] sm:$0xff]  ;;  %v5154_v15 = vpack.c.bf16 %v4462_v3, %v4456_v2 }
  0x23   : > { %5140 = vmatprep.subr.msk.bf16.mxu0 %vm6360_vm2, %v5138_v41  ;;  %v547_v54 = vsel %vm544_vm4, %v545_v32, %v546_v37  ;;  %v550_v62 = vrot.slane %v6492_v61, 1  ;;  %v549_v63 = vsel %vm544_vm4, %v546_v37, %v548_v53  ;;  %v4475_v8 = vld [vmem:[%s9349_s3 + $0x518] sm:$0xff]  ;;  %v4440_v11 = vld [vmem:[%s9349_s3 + $0x400] sm:$0xff]  ;;  %v4453_v14 = vld [vmem:[%s9349_s3 + $0x468] sm:$0xff]  ;;  %v773_v19 = vrot.slane %v6460_v49, 2  ;;  %s4337_s18 = sshll.u32 %s513_s21, 4  ;;  %s9305_s18 = int_to_ptr.vmem [resolvable:$true] %s4337_s18 }
  0x24   : > { %4408 = vmatmul.mubr.msk.f32.vlgmr.msra.gmra.mrb[0].mxu1 %vm552_vm3, %v547_v54  ;;  %v4447_v13 = vld [vmem:[%s9349_s3 + $0x438] sm:$0xff]  ;;  %v5156_v16 = vpack.c.bf16 %v4475_v8, %v4469_v6  ;;  %v4468_v17 = vld [vmem:[%s9349_s3 + $0x4e0] sm:$0xff]  ;;  %v4474_v18 = vld [vmem:[%s9349_s3 + $0x510] sm:$0xff]  ;;  %v772_v20 = vsel %vm769_vm5, %v770_v4, %v771_v5  ;;  %v5188_v21 = vpack.c.bf16 %v4440_v11, %v4434_v10  ;;  %s4325_s27 = scalar_lea.sflag [#allocation3], %s512_s28  ;;  %s6137_s30 = scalar_lea.vmem %s9305_s18, 16 }
  0x25   : > { %4415 = vmatmul.mubr.msk.f32.gmra.mrb[2].mxu0 %vm552_vm3, %v6421_v33  ;;  %638 = vmatprep.mubr.f32.mxu1 %v6201_v7  ;;  %v551_v12 = vsel %vm544_vm4, %v548_v53, %v550_v62  ;;  %v4481_v22 = vld [vmem:[%s9349_s3 + $0x548] sm:$0xff]  ;;  %v4487_v23 = vld [vmem:[%s9349_s3 + $0x578] sm:$0xff]  ;;  %v5190_v24 = vpack.c.bf16 %v4453_v14, %v4447_v13  ;;  %v4446_v25 = vld [vmem:[%s9349_s3 + $0x430] sm:$0xff]  ;;  %v5158_v29 = vpack.c.bf16 %v4474_v18, %v4468_v17  ;;  %v775_v33 = vrot.slane %v6492_v61, 2  ;;  %p6138_p11 = scmp.ne.s32.totalorder %s9305_s18, %s6137_s30  ;;  %s6205_s25 = smov [#allocation2]  }
  0x26   : > { %747 = vmatprep.mubr.f32.mxu0 %v6201_v7  ;;  %5143 = vmatpush1.bf16.msk.msra.mxu0 %vm6360_vm2, %v5141_v45  ;;  %v4452_v26 = vld [vmem:[%s9349_s3 + $0x460] sm:$0xff]  ;;  %v4459_v27 = vld [vmem:[%s9349_s3 + $0x498] sm:$0xff]  ;;  %v4465_v28 = vld [vmem:[%s9349_s3 + $0x4c8] sm:$0xff]  ;;  %v5160_v30 = vpack.c.bf16 %v4487_v23, %v4481_v22  ;;  %v774_v34 = vsel %vm769_vm5, %v771_v5, %v773_v19  ;;  %s6141_s17 = sshll.u32 %s6205_s25, 4  ;;  %s6142_s17 = int_to_ptr.vmem [resolvable:$false] %s6141_s17 }
  0x27   : > { %5187 = vmatprep.subr.bf16.mxu0 %v5186_v50  ;;  %5147 = vmatpush1.bf16.msra.mxu1 %v5146_v55  ;;  %v4480_v31 = vld [vmem:[%s9349_s3 + $0x540] sm:$0xff]  ;;  %v4486_v32 = vld [vmem:[%s9349_s3 + $0x570] sm:$0xff]  ;;  %v5192_v35 = vpack.c.bf16 %v4452_v26, %v4446_v25  ;;  %v4493_v36 = vld [vmem:[%s9349_s3 + $0x5a8] sm:$0xff]  ;;  %v5194_v38 = vpack.c.bf16 %v4465_v28, %v4459_v27  ;;  %v776_v47 = vsel %vm769_vm5, %v773_v19, %v775_v33  ;;  %p6139_p12 = pnand %p6138_p11, %p6329_p5  ;;  %s6143_s26 = scalar_lea.vmem %s6142_s17, 32 }
  0x28   : > { %5149 = vmatprep.subr.bf16.mxu1 %v5148_v56  ;;  %4409 = vmatmul.mubr.msk.f32.gmra.mrb[2].mxu1 %vm552_vm3, %v549_v63  ;;  %v4499_v37 = vld [vmem:[%s9349_s3 + $0x5d8] sm:$0xff]  ;;  %v4458_v39 = vld [vmem:[%s9349_s3 + $0x490] sm:$0xff]  ;;  %v4464_v40 = vld [vmem:[%s9349_s3 + $0x4c0] sm:$0xff]  ;;  %v5162_v43 = vpack.c.bf16 %v4486_v32, %v4480_v31  ;;  %p6144_p0 = scmp.lt.s32.totalorder %s9305_s18, %s6142_s17  ;;  %p6145_p1 = scmp.lt.s32.totalorder %s6143_s26, %s6137_s30 }
  0x29   : > { %4416 = vmatmul.mubr.msk.f32.gmra.mrb[4].mxu0 %vm552_vm3, %v6460_v49  ;;  %644 = vmatprep.mubr.f32.mxu1 %v6201_v7  ;;  %v4471_v41 = vld [vmem:[%s9349_s3 + $0x4f8] sm:$0xff]  ;;  %v4477_v42 = vld [vmem:[%s9349_s3 + $0x528] sm:$0xff]  ;;  %v5164_v44 = vpack.c.bf16 %v4499_v37, %v4493_v36  ;;  %v4492_v45 = vld [vmem:[%s9349_s3 + $0x5a0] sm:$0xff]  ;;  %v5196_v48 = vpack.c.bf16 %v4464_v40, %v4458_v39  ;;  %p6140_p13 = pneg %p6139_p12 }
  0x2a   : > { %753 = vmatprep.mubr.f32.mxu0 %v6201_v7  ;;  %v4498_v46 = vld [vmem:[%s9349_s3 + $0x5d0] sm:$0xff]  ;;  %v5198_v49 = vpack.c.bf16 %v4477_v42, %v4471_v41  ;;  %v4476_v51 = vld [vmem:[%s9349_s3 + $0x520] sm:$0xff]  ;;  %v4483_v52 = vld [vmem:[%s9349_s3 + $0x558] sm:$0xff]  ;;  %p6146_p2 = por %p6145_p1, %p6144_p0 }
  0x2b   : > { %5151 = vmatpush1.bf16.msra.mxu1 %v5150_v0  ;;  %v4470_v50 = vld [vmem:[%s9349_s3 + $0x4f0] sm:$0xff]  ;;  %v4489_v53 = vld [vmem:[%s9349_s3 + $0x588] sm:$0xff]  ;;  %v5166_v54 = vpack.c.bf16 %v4498_v46, %v4492_v45  ;;  %v4488_v58 = vld [vmem:[%s9349_s3 + $0x580] sm:$0xff] }
  0x2c   : > { %5153 = vmatprep.subr.bf16.mxu1 %v5152_v1  ;;  %4410 = vmatmul.mubr.msk.f32.gmra.mrb[4].mxu1 %vm552_vm3, %v551_v12  ;;  %v5200_v55 = vpack.c.bf16 %v4476_v51, %v4470_v50  ;;  %v5202_v56 = vpack.c.bf16 %v4489_v53, %v4483_v52  ;;  %v4482_v57 = vld [vmem:[%s9349_s3 + $0x550] sm:$0xff]  ;;  %v4495_v59 = vld [vmem:[%s9349_s3 + $0x5b8] sm:$0xff]  ;;  %v4501_v60 = vld [vmem:[%s9349_s3 + $0x5e8] sm:$0xff]  ;;  %p6147_p3 = pnand %p6146_p2, %p6140_p13 }
  0x2d   : > { %4417 = vmatmul.mubr.msk.f32.gmra.mrb[6].mxu0 %vm552_vm3, %v6492_v61  ;;  %650 = vmatprep.mubr.f32.mxu1 %v6201_v7  ;;  %v5204_v61 = vpack.c.bf16 %v4488_v58, %v4482_v57  ;;  %v4494_v63 = vld [vmem:[%s9349_s3 + $0x5b0] sm:$0xff]  ;;  %v4500_v0 = vld [vmem:[%s9349_s3 + $0x5e0] sm:$0xff]  ;;  %v4505_v2 = vld [vmem:[%s9349_s3 + $0x608] sm:$0xff]  ;;  %v898_v58 = vlaneseq }
  0x2e   : > { %855 = vmatprep.mubr.f32.mxu0 %v6201_v7  ;;  %v5208_v1 = vpack.c.bf16 %v4500_v0, %v4494_v63  ;;  %v4511_v3 = vld [vmem:[%s9349_s3 + $0x638] sm:$0xff]  ;;  %v4513_v6 = vld [vmem:[%s9349_s3 + $0x648] sm:$0xff]  ;;  %v4504_v8 = vld [vmem:[%s9349_s3 + $0x600] sm:$0xff] }
  0x2f   : > { %5155 = vmatpush1.bf16.msra.mxu1 %v5154_v15  ;;  %v4507_v4 = vld [vmem:[%s9349_s3 + $0x618] sm:$0xff]  ;;  %v5168_v5 = vpack.c.bf16 %v4511_v3, %v4505_v2  ;;  %v4510_v10 = vld [vmem:[%s9349_s3 + $0x630] sm:$0xff]  ;;  %v4512_v14 = vld [vmem:[%s9349_s3 + $0x640] sm:$0xff] }
  0x30   : > { %5157 = vmatprep.subr.bf16.mxu1 %v5156_v16  ;;  %4411 = vmatmul.mubr.msk.f32.gmra.mrb[6].mxu1 %vm552_vm3, %v550_v62  ;;  %v5206_v62 = vpack.c.bf16 %v4501_v60, %v4495_v59  ;;  %v5210_v11 = vpack.c.bf16 %v4513_v6, %v4507_v4  ;;  %v5170_v12 = vpack.c.bf16 %v4510_v10, %v4504_v8  ;;  %v4506_v13 = vld [vmem:[%s9349_s3 + $0x610] sm:$0xff]  ;;  %v4517_v16 = vld [vmem:[%s9349_s3 + $0x668] sm:$0xff]  ;;  %v4523_v17 = vld [vmem:[%s9349_s3 + $0x698] sm:$0xff]  ;;  %v6748_v60 = vshrl.u32 %v898_v58, 7 }
  0x31   : > { %4428 = vmatmul.mubr.msk.f32.vlgmr.msra.gmra.mrb[0].mxu0 %vm552_vm3, %v772_v20  ;;  %v5212_v15 = vpack.c.bf16 %v4512_v14, %v4506_v13  ;;  %v4519_v18 = vld [vmem:[%s9349_s3 + $0x678] sm:$0xff]  ;;  %v5172_v19 = vpack.c.bf16 %v4523_v17, %v4517_v16  ;;  %v4525_v20 = vld [vmem:[%s9349_s3 + $0x6a8] sm:$0xff]  ;;  %v4522_v22 = vld [vmem:[%s9349_s3 + $0x690] sm:$0xff] }
  0x32   : > { %861 = vmatprep.mubr.f32.mxu0 %v6201_v7  ;;  %5189 = vmatpush1.bf16.msra.mxu0 %v5188_v21  ;;  %v4516_v21 = vld [vmem:[%s9349_s3 + $0x660] sm:$0xff]  ;;  %v5214_v23 = vpack.c.bf16 %v4525_v20, %v4519_v18  ;;  %v4518_v25 = vld [vmem:[%s9349_s3 + $0x670] sm:$0xff]  ;;  %v4529_v28 = vld [vmem:[%s9349_s3 + $0x6c8] sm:$0xff]  ;;  %v6761_v4 = vsub.s32 3, %v6748_v60  ;;  %v6765_v8 = vsub.s32 1, %v6748_v60 }
  0x33   : > { %5191 = vmatprep.subr.bf16.mxu0 %v5190_v24  ;;  %5159 = vmatpush1.bf16.msra.mxu1 %v5158_v29  ;;  %v5174_v24 = vpack.c.bf16 %v4522_v22, %v4516_v21  ;;  %v4524_v26 = vld [vmem:[%s9349_s3 + $0x6a0] sm:$0xff]  ;;  %v4535_v29 = vld [vmem:[%s9349_s3 + $0x6f8] sm:$0xff]  ;;  %v4537_v32 = vld [vmem:[%s9349_s3 + $0x708] sm:$0xff] }
  0x34   : > { %5161 = vmatprep.subr.bf16.mxu1 %v5160_v30  ;;  %v5216_v27 = vpack.c.bf16 %v4524_v26, %v4518_v25  ;;  %v4531_v30 = vld [vmem:[%s9349_s3 + $0x6d8] sm:$0xff]  ;;  %v5176_v31 = vpack.c.bf16 %v4535_v29, %v4529_v28  ;;  %v4530_v37 = vld [vmem:[%s9349_s3 + $0x6d0] sm:$0xff]  ;;  %v4541_v40 = vld [vmem:[%s9349_s3 + $0x728] sm:$0xff] }
  0x35   : > { %4429 = vmatmul.mubr.msk.f32.gmra.mrb[2].mxu0 %vm552_vm3, %v774_v34  ;;  %v4534_v34 = vld [vmem:[%s9349_s3 + $0x6f0] sm:$0xff]  ;;  %v4547_v41 = vld [vmem:[%s9349_s3 + $0x758] sm:$0xf]  ;;  %v4540_v45 = vld [vmem:[%s9349_s3 + $0x720] sm:$0xff] }
  0x36   : > { %867 = vmatprep.mubr.f32.mxu0 %v6201_v7  ;;  %5193 = vmatpush1.bf16.msra.mxu0 %v5192_v35  ;;  %v5218_v35 = vpack.c.bf16 %v4537_v32, %v4531_v30  ;;  %v4543_v42 = vld [vmem:[%s9349_s3 + $0x738] sm:$0xff]  ;;  %v4546_v46 = vld [vmem:[%s9349_s3 + $0x750] sm:$0xf]  ;;  %v4548_v50 = vld [vmem:[%s9349_s3 + $0x760] sm:$0xf] }
  0x37   : > { %5195 = vmatprep.subr.bf16.mxu0 %v5194_v38  ;;  %5163 = vmatpush1.bf16.msra.mxu1 %v5162_v43  ;;  %v4536_v38 = vld [vmem:[%s9349_s3 + $0x700] sm:$0xff]  ;;  %v5180_v43 = vpack.c.bf16 %v4547_v41, %v4541_v40  ;;  %v4437_v52 = vld [vmem:[%s9349_s3 + $0x3e8] sm:$0xff]  ;;  %v4443_v53 = vld [vmem:[%s9349_s3 + $0x418] sm:$0xff] }
  0x38   : > { %5165 = vmatprep.subr.bf16.mxu1 %v5164_v44  ;;  %v5220_v39 = vpack.c.bf16 %v4536_v38, %v4530_v37  ;;  %v4549_v44 = vld [vmem:[%s9349_s3 + $0x768] sm:$0xf]  ;;  %v888_v0 = vld [vmem:[%s9348_s2] sm:$0xf]  ;;  %v4442_v38 = vld [vmem:[%s9349_s3 + $0x410] sm:$0xff] }
  0x39   : > { %4430 = vmatmul.mubr.msk.f32.gmra.mrb[4].mxu0 %vm552_vm3, %v776_v47  ;;  %v5222_v47 = vpack.c.bf16 %v4549_v44, %v4543_v42  ;;  %v931_v16 = vrot.slane %v888_v0, %v6761_v4  ;;  %v927_v20 = vrot.slane %v888_v0, %v6765_v8  ;;  %v4436_v37 = vld [vmem:[%s9349_s3 + $0x3e0] sm:$0xff]  ;;  %v952_v42 = vld [vmem:[%s9349_s3 + $0x10] sm:$0xff]  ;;  %v965_v58 = vld [vmem:[%s9349_s3 + $0x78] sm:$0xff] }
  0x3a   : > { %873 = vmatprep.mubr.f32.mxu0 %v6201_v7  ;;  %5197 = vmatpush1.bf16.msra.mxu0 %v5196_v48  ;;  %v5183_v48 = vpack.c.bf16 %v4546_v46, %v4540_v45  ;;  %v2387_v9 = vld [vmem:[%s9351_s5 + $0xf0] sm:$0xff] }
  0x3b   : > { %5199 = vmatprep.subr.bf16.mxu0 %v5198_v49  ;;  %5167 = vmatpush1.bf16.msra.mxu1 %v5166_v54  ;;  %v4542_v49 = vld [vmem:[%s9349_s3 + $0x730] sm:$0xff]  ;;  %v953_v54 = vld [vmem:[%s9349_s3 + $0x18] sm:$0xff]  ;;  %v937_v30 = vrot.slane %v927_v20, %v6765_v8  ;;  %v970_v20 = vld [vmem:[%s9349_s3 + $0xa0] sm:$0xff] }
  0x3c   : > { %5169 = vmatprep.subr.bf16.mxu1 %v5168_v5  ;;  %v5225_v51 = vpack.c.bf16 %v4548_v50, %v4542_v49  ;;  %v5230_v50 = vpack.c.bf16 %v4442_v38, %v4436_v37  ;;  %v976_v38 = vld [vmem:[%s9349_s3 + $0xd0] sm:$0xff] }
  0x3d   : > { %4431 = vmatmul.mubr.msk.f32.gmra.mrb[6].mxu0 %vm552_vm3, %v775_v33  ;;  %v4528_v33 = vld [vmem:[%s9349_s3 + $0x6c0] sm:$0xff] }
  0x3e   : > { %5201 = vmatpush1.bf16.msra.mxu0 %v5200_v55  ;;  %v5178_v36 = vpack.c.bf16 %v4534_v34, %v4528_v33  ;;  %v5228_v55 = vpack.c.bf16 %v4443_v53, %v4437_v52  ;;  %v4455_v52 = vld [vmem:[%s9349_s3 + $0x478] sm:$0xff] }
  0x3f   : > { %5203 = vmatprep.subr.bf16.mxu0 %v5202_v56  ;;  %5171 = vmatpush1.bf16.msra.mxu1 %v5170_v12  ;;  %v959_v56 = vld [vmem:[%s9349_s3 + $0x48] sm:$0xff] }
  0x40   : > { %5173 = vmatprep.subr.bf16.mxu1 %v5172_v19  ;;  %v5312_v57 = vpack.c.bf16 %v959_v56, %v953_v54 }
  0x42   : > { %5205 = vmatpush1.bf16.msra.mxu0 %v5204_v61 }
  0x43   : > { %5207 = vmatprep.subr.bf16.mxu0 %v5206_v62  ;;  %5175 = vmatpush1.bf16.msra.mxu1 %v5174_v24  ;;  %v6751_v62 = vsub.s32 2, %v6748_v60 }
  0x44   : > { %5177 = vmatprep.subr.bf16.mxu1 %v5176_v31 }
  0x45   : > { %v905_v3 = vrot.slane %v888_v0, %v6751_v62 }
  0x46   : > { %5209 = vmatpush1.bf16.msra.mxu0 %v5208_v1  ;;  %v6757_v1 = vsub.s32 0, %v6748_v60 }
  0x47   : > { %5211 = vmatprep.subr.bf16.mxu0 %v5210_v11  ;;  %5179 = vmatpush1.bf16.msra.mxu1 %v5178_v36 }
  0x48   : > { %5182 = vmatprep.subr.msk.bf16.mxu1 %vm6360_vm2, %v5180_v43  ;;  %v901_v6 = vrot.slane %v888_v0, %v6757_v1  ;;  %v958_v43 = vld [vmem:[%s9349_s3 + $0x40] sm:$0xff] }
  0x4a   : > { %5213 = vmatpush1.bf16.msra.mxu0 %v5212_v15  ;;  %v6768_v15 = vrot.slane %v905_v3, %v6757_v1  ;;  %v911_v19 = vrot.slane %v901_v6, %v6757_v1 }
  0x4b   : > { %5215 = vmatprep.subr.bf16.mxu0 %v5214_v23  ;;  %5185 = vmatpush1.bf16.msk.msra.mxu1 %vm6360_vm2, %v5183_v48 }
  0x4c   : > { %5229 = vmatprep.subr.bf16.mxu1 %v5228_v55 }
  0x4e   : > { %5217 = vmatpush1.bf16.msra.mxu0 %v5216_v27  ;;  %v6775_v27 = vrot.slane %v931_v16, %v6765_v8 }
  0x4f   : > { %5219 = vmatprep.subr.bf16.mxu0 %v5218_v35 }
  0x52   : > { %5221 = vmatpush1.bf16.msra.mxu0 %v5220_v39 }
  0x53   : > { %5224 = vmatprep.subr.msk.bf16.mxu0 %vm6360_vm2, %v5222_v47 }
  0x56   : > { %5227 = vmatpush1.bf16.msk.msra.mxu0 %vm6360_vm2, %v5225_v51  ;;  %v4449_v51 = vld [vmem:[%s9349_s3 + $0x448] sm:$0xff] }
  0x57   : > { %5313 = vmatprep.subr.bf16.mxu0 %v5312_v57  ;;  %v5314_v57 = vpack.c.bf16 %v958_v43, %v952_v42  ;;  %v4473_v42 = vld [vmem:[%s9349_s3 + $0x508] sm:$0xff] }
  0xf7   : > { %v634_v59 = vpop.f32.mrb[0].mxu1 }
  0xf8   : > { %v636_v61 = vpop.f32.mrb[1].mxu1 }
  0xfb   : > { %v640_v63 = vpop.f32.mrb[2].mxu1 }
  0xfc   : > { %v642_v2 = vpop.f32.mrb[3].mxu1 }
  0xff   : > { %v646_v5 = vpop.f32.mrb[4].mxu1 }
 0x100   : > { %v648_v10 = vpop.f32.mrb[5].mxu1 }
 0x103   : > { %v652_v17 = vpop.f32.mrb[6].mxu1 }
 0x104   : > { %v857_v11 = vpop.f32.mrb[0].mxu0  ;;  %v654_v21 = vpop.f32.mrb[7].mxu1 }
 0x105   : > { %v6010_v12 = vadd.f32 %v857_v11, %v634_v59  ;;  %v859_v13 = vpop.f32.mrb[1].mxu0  ;;  %v971_v59 = vld [vmem:[%s9349_s3 + $0xa8] sm:$0xff]  ;;  %v4448_v11 = vld [vmem:[%s9349_s3 + $0x440] sm:$0xff] }
 0x106   : > { %v6011_v14 = vadd.f32 %v859_v13, %v636_v61  ;;  %v964_v13 = vld [vmem:[%s9349_s3 + $0x70] sm:$0xff] }
 0x107   : > { %v889_v18 = vmax.f32 %v6010_v12, 0.0  ;;  %v4454_v12 = vld [vmem:[%s9349_s3 + $0x470] sm:$0xff] }
 0x108   : > { %v890_v22 = vmax.f32 %v6011_v14, 0.0  ;;  %v863_v23 = vpop.f32.mrb[2].mxu0 }
 0x109   : > { %v6012_v24 = vadd.f32 %v863_v23, %v640_v63  ;;  %v865_v25 = vpop.f32.mrb[3].mxu0  ;;  %v916_v29 = vmul.f32 %v911_v19, %v889_v18  ;;  %v5316_v18 = vpack.c.bf16 %v971_v59, %v965_v58 }
 0x10a   : > { %v917_v26 = vmul.f32 %v6768_v15, %v890_v22  ;;  %v6013_v28 = vadd.f32 %v865_v25, %v642_v2  ;;  %v4467_v22 = vld [vmem:[%s9349_s3 + $0x4d8] sm:$0xff] }
 0x10b   : > { %v891_v31 = vmax.f32 %v6012_v24, 0.0  ;;  %v6794_v44 = vadd.f32 %v937_v30, %v916_v29 }
 0x10c   : > { %v892_v32 = vmax.f32 %v6013_v28, 0.0  ;;  %v869_v33 = vpop.f32.mrb[4].mxu0  ;;  %v6785_v39 = vadd.f32 %v6775_v27, %v917_v26  ;;  %v977_v26 = vld [vmem:[%s9349_s3 + $0xd8] sm:$0xff]  ;;  %v983_v28 = vld [vmem:[%s9349_s3 + $0x108] sm:$0xff] }
 0x10d   : > { %v918_v34 = vmul.f32 %v911_v19, %v891_v31  ;;  %v6014_v35 = vadd.f32 %v869_v33, %v646_v5  ;;  %v871_v36 = vpop.f32.mrb[5].mxu0  ;;  %v1199_v6 = vrot.slane %v6794_v44, 1  ;;  %v5234_v31 = vpack.c.bf16 %v4454_v12, %v4448_v11  ;;  %v4490_v11 = vld [vmem:[%s9349_s3 + $0x590] sm:$0xff] }
 0x10e   : > { %v919_v40 = vmul.f32 %v6768_v15, %v892_v32  ;;  %v6015_v41 = vadd.f32 %v871_v36, %v648_v10  ;;  %v1202_v0 = vrot.slane %v6785_v39, 1  ;;  %v5232_v10 = vpack.c.bf16 %v4455_v52, %v4449_v51  ;;  %v4472_v52 = vld [vmem:[%s9349_s3 + $0x500] sm:$0xff] }
 0x10f   : > { %v6796_v45 = vadd.f32 %v937_v30, %v918_v34  ;;  %v893_v46 = vmax.f32 %v6014_v35, 0.0  ;;  %v5318_v33 = vpack.c.bf16 %v970_v20, %v964_v13  ;;  %v4460_v35 = vld [vmem:[%s9349_s3 + $0x4a0] sm:$0xff]  ;;  %v5320_v37 = vpack.c.bf16 %v983_v28, %v977_v26  ;;  %v4497_v20 = vld [vmem:[%s9349_s3 + $0x5c8] sm:$0xff]  ;;  %v4502_v28 = vld [vmem:[%s9349_s3 + $0x5f0] sm:$0xff] }
 0x110   : > { %v6799_v47 = vadd.f32 %v6775_v27, %v919_v40  ;;  %v894_v48 = vmax.f32 %v6015_v41, 0.0  ;;  %v875_v49 = vpop.f32.mrb[6].mxu0  ;;  %v982_v40 = vld [vmem:[%s9349_s3 + $0x100] sm:$0xff] }
 0x111   : > { %v920_v53 = vmul.f32 %v911_v19, %v893_v46  ;;  %v6016_v54 = vadd.f32 %v875_v49, %v652_v17  ;;  %v877_v55 = vpop.f32.mrb[7].mxu0  ;;  %v1200_v56 = vrot.slane %v6796_v45, 1  ;;  %v4479_v46 = vld [vmem:[%s9349_s3 + $0x538] sm:$0xff]  ;;  %v995_v49 = vld [vmem:[%s9349_s3 + $0x168] sm:$0xff]  ;;  %v5322_v51 = vpack.c.bf16 %v982_v40, %v976_v38  ;;  %v4496_v26 = vld [vmem:[%s9349_s3 + $0x5c0] sm:$0xff] }
 0x112   : > { %v921_v61 = vmul.f32 %v6768_v15, %v894_v48  ;;  %v6017_v63 = vadd.f32 %v877_v55, %v654_v21  ;;  %v1203_v2 = vrot.slane %v6799_v47, 1  ;;  %v4461_v21 = vld [vmem:[%s9349_s3 + $0x4a8] sm:$0xff]  ;;  %v989_v48 = vld [vmem:[%s9349_s3 + $0x138] sm:$0xff]  ;;  %v988_v55 = vld [vmem:[%s9349_s3 + $0x130] sm:$0xff]  ;;  %v5240_v59 = vpack.c.bf16 %v4479_v46, %v4473_v42 }
 0x113   : > { %v6817_v3 = vadd.f32 %v937_v30, %v920_v53  ;;  %v895_v5 = vmax.f32 %v6016_v54, 0.0  ;;  %v6849_v24 = vsel %vm544_vm4, %v1199_v6, %v1200_v56  ;;  %v5236_v34 = vpack.c.bf16 %v4467_v22, %v4461_v21  ;;  %v4478_v53 = vld [vmem:[%s9349_s3 + $0x530] sm:$0xff]  ;;  %v1013_v21 = vld [vmem:[%s9349_s3 + $0x1f8] sm:$0xff]  ;;  %v1019_v22 = vld [vmem:[%s9349_s3 + $0x228] sm:$0xff] }
 0x114   : > { %v6830_v14 = vadd.f32 %v6775_v27, %v921_v61  ;;  %v896_v16 = vmax.f32 %v6017_v63, 0.0  ;;  %v6833_v17 = vsel %vm544_vm4, %v1202_v0, %v1203_v2  ;;  %v5324_v61 = vpack.c.bf16 %v995_v49, %v989_v48  ;;  %v4491_v63 = vld [vmem:[%s9349_s3 + $0x598] sm:$0xff]  ;;  %v4514_v42 = vld [vmem:[%s9349_s3 + $0x650] sm:$0xff]  ;;  %v1030_v49 = vld [vmem:[%s9349_s3 + $0x280] sm:$0xff] }
 0x115   : > { %v922_v23 = vmul.f32 %v911_v19, %v895_v5  ;;  %4554 = vmatprep.mubr.msk.f32.mxu1 %vm552_vm3, %v6833_v17  ;;  %4559 = vmatprep.mubr.msk.f32.mxu0 %vm552_vm3, %v6833_v17  ;;  %v1205_v25 = vrot.slane %v6817_v3, 1  ;;  %v1001_v0 = vld [vmem:[%s9349_s3 + $0x198] sm:$0xff]  ;;  %v5242_v5 = vpack.c.bf16 %v4478_v53, %v4472_v52  ;;  %v5250_v38 = vpack.c.bf16 %v4502_v28, %v4496_v26  ;;  %v1024_v48 = vld [vmem:[%s9349_s3 + $0x250] sm:$0xff]  ;;  %v1043_v53 = vld [vmem:[%s9349_s3 + $0x2e8] sm:$0xff] }
 0x116   : > { %v923_v19 = vmul.f32 %v6768_v15, %v896_v16  ;;  %1305 = vmatmul.mubr.f32.vlgmr.msra.gmra.mrb[8].mxu1 %v6849_v24  ;;  %1388 = vmatmul.mubr.f32.vlgmr.msra.gmra.mrb[8].mxu0 %v6849_v24  ;;  %v1207_v29 = vrot.slane %v6830_v14, 1  ;;  %v1000_v16 = vld [vmem:[%s9349_s3 + $0x190] sm:$0xff]  ;;  %v1037_v52 = vld [vmem:[%s9349_s3 + $0x2b8] sm:$0xff]  ;;  %v1067_v28 = vld [vmem:[%s9349_s3 + $0x3a8] sm:$0xf] }
 0x117   : > { %v6862_v32 = vadd.f32 %v937_v30, %v922_v23  ;;  %5231 = vmatpush1.bf16.msra.mxu1 %v5230_v50  ;;  %5315 = vmatpush1.bf16.msra.mxu0 %v5314_v57  ;;  %v4466_v30 = vld [vmem:[%s9349_s3 + $0x4d0] sm:$0xff]  ;;  %v4485_v57 = vld [vmem:[%s9349_s3 + $0x568] sm:$0xff]  ;;  %v1061_v26 = vld [vmem:[%s9349_s3 + $0x378] sm:$0xff] }
 0x118   : > { %v6868_v36 = vadd.f32 %v6775_v27, %v923_v19  ;;  %v6871_v15 = vsel %vm544_vm4, %v1203_v2, %v1207_v29  ;;  %5233 = vmatprep.subr.bf16.mxu1 %v5232_v10  ;;  %5317 = vmatprep.subr.bf16.mxu0 %v5316_v18  ;;  %v6887_v27 = vsel %vm544_vm4, %v1200_v56, %v1205_v25  ;;  %v994_v56 = vld [vmem:[%s9349_s3 + $0x160] sm:$0xff]  ;;  %v1007_v2 = vld [vmem:[%s9349_s3 + $0x1c8] sm:$0xff] }
 0x119   : > { %4555 = vmatprep.mubr.msk.f32.mxu1 %vm552_vm3, %v6871_v15  ;;  %4560 = vmatprep.mubr.msk.f32.mxu0 %vm552_vm3, %v6871_v15  ;;  %v1209_v41 = vrot.slane %v6862_v32, 1  ;;  %v5238_v50 = vpack.c.bf16 %v4466_v30, %v4460_v35  ;;  %v5326_v6 = vpack.c.bf16 %v994_v56, %v988_v55  ;;  %v4484_v10 = vld [vmem:[%s9349_s3 + $0x560] sm:$0xff]  ;;  %v5244_v12 = vpack.c.bf16 %v4491_v63, %v4485_v57  ;;  %v4515_v35 = vld [vmem:[%s9349_s3 + $0x658] sm:$0xff]  ;;  %v1031_v30 = vld [vmem:[%s9349_s3 + $0x288] sm:$0xff] }
 0x11a   : > { %v1211_v43 = vrot.slane %v6868_v36, 1  ;;  %1311 = vmatmul.mubr.f32.gmra.mrb[10].mxu1 %v6887_v27  ;;  %1394 = vmatmul.mubr.f32.gmra.mrb[10].mxu0 %v6887_v27  ;;  %v5328_v13 = vpack.c.bf16 %v1007_v2, %v1001_v0  ;;  %v1006_v18 = vld [vmem:[%s9349_s3 + $0x1c0] sm:$0xff]  ;;  %v5246_v23 = vpack.c.bf16 %v4490_v11, %v4484_v10  ;;  %v5338_v56 = vpack.c.bf16 %v1030_v49, %v1024_v48  ;;  %v1036_v0 = vld [vmem:[%s9349_s3 + $0x2b0] sm:$0xff]  ;;  %v1049_v10 = vld [vmem:[%s9349_s3 + $0x318] sm:$0xff] }
 0x11b   : > { %5235 = vmatpush1.bf16.msra.mxu1 %v5234_v31  ;;  %5319 = vmatpush1.bf16.msra.mxu0 %v5318_v33  ;;  %v6928_v58 = vsel %vm544_vm4, %v1205_v25, %v1209_v41  ;;  %v5330_v25 = vpack.c.bf16 %v1006_v18, %v1000_v16  ;;  %v1012_v31 = vld [vmem:[%s9349_s3 + $0x1f0] sm:$0xff]  ;;  %v1018_v33 = vld [vmem:[%s9349_s3 + $0x220] sm:$0xff]  ;;  %v5340_v63 = vpack.c.bf16 %v1043_v53, %v1037_v52  ;;  %v1055_v11 = vld [vmem:[%s9349_s3 + $0x348] sm:$0xff] }
 0x11c   : > { %v6912_v54 = vsel %vm544_vm4, %v1207_v29, %v1211_v43  ;;  %5237 = vmatprep.subr.bf16.mxu1 %v5236_v34  ;;  %5321 = vmatprep.subr.bf16.mxu0 %v5320_v37  ;;  %v5332_v29 = vpack.c.bf16 %v1019_v22, %v1013_v21  ;;  %v4509_v34 = vld [vmem:[%s9349_s3 + $0x628] sm:$0xff]  ;;  %v1025_v37 = vld [vmem:[%s9349_s3 + $0x258] sm:$0xff]  ;;  %v5334_v40 = vpack.c.bf16 %v1018_v33, %v1012_v31  ;;  %v4508_v41 = vld [vmem:[%s9349_s3 + $0x620] sm:$0xff] }
 0x11d   : > { %4556 = vmatprep.mubr.msk.f32.mxu1 %vm552_vm3, %v6912_v54  ;;  %4561 = vmatprep.mubr.msk.f32.mxu0 %vm552_vm3, %v6912_v54  ;;  %v5252_v43 = vpack.c.bf16 %v4515_v35, %v4509_v34  ;;  %v5336_v46 = vpack.c.bf16 %v1031_v30, %v1025_v37  ;;  %v5254_v55 = vpack.c.bf16 %v4514_v42, %v4508_v41  ;;  %v4520_v57 = vld [vmem:[%s9349_s3 + $0x680] sm:$0xff]  ;;  %v4538_v18 = vld [vmem:[%s9349_s3 + $0x710] sm:$0xff]  ;;  %v4585_v41 = vld [vmem:[%s9349_s3 + $0x798] sm:$0xff] }
 0x11e   : > { %1317 = vmatmul.mubr.f32.gmra.mrb[12].mxu1 %v6928_v58  ;;  %1400 = vmatmul.mubr.f32.gmra.mrb[12].mxu0 %v6928_v58  ;;  %v1042_v2 = vld [vmem:[%s9349_s3 + $0x2e0] sm:$0xff]  ;;  %v1048_v21 = vld [vmem:[%s9349_s3 + $0x310] sm:$0xff]  ;;  %v5348_v35 = vpack.c.bf16 %v1067_v28, %v1061_v26  ;;  %v4591_v42 = vld [vmem:[%s9349_s3 + $0x7c8] sm:$0xff] }
 0x11f   : > { %5239 = vmatpush1.bf16.msra.mxu1 %v5238_v50  ;;  %5323 = vmatpush1.bf16.msra.mxu0 %v5322_v51  ;;  %v4521_v50 = vld [vmem:[%s9349_s3 + $0x688] sm:$0xff]  ;;  %v4527_v51 = vld [vmem:[%s9349_s3 + $0x6b8] sm:$0xff]  ;;  %v4532_v16 = vld [vmem:[%s9349_s3 + $0x6e0] sm:$0xff]  ;;  %v5438_v49 = vpack.c.bf16 %v4591_v42, %v4585_v41 }
 0x120   : > { %4564 = vmatprep.mubr.msk.f32.mxu1 %vm552_vm3, %v6833_v17  ;;  %4574 = vmatprep.mubr.msk.f32.mxu0 %vm552_vm3, %v6785_v39  ;;  %v4503_v17 = vld [vmem:[%s9349_s3 + $0x5f8] sm:$0xff]  ;;  %v1054_v22 = vld [vmem:[%s9349_s3 + $0x340] sm:$0xff]  ;;  %v4550_v33 = vld [vmem:[%s9349_s3 + $0x770] sm:$0xf] }
 0x121   : > { %5241 = vmatprep.subr.bf16.mxu1 %v5240_v59  ;;  %5325 = vmatprep.subr.bf16.mxu0 %v5324_v61  ;;  %v5248_v19 = vpack.c.bf16 %v4503_v17, %v4497_v20  ;;  %v4526_v59 = vld [vmem:[%s9349_s3 + $0x6b0] sm:$0xff]  ;;  %v5256_v61 = vpack.c.bf16 %v4527_v51, %v4521_v50  ;;  %v5344_v17 = vpack.c.bf16 %v1055_v11, %v1049_v10  ;;  %v4544_v31 = vld [vmem:[%s9349_s3 + $0x740] sm:$0xff]  ;;  %v987_v26 = vld [vmem:[%s9349_s3 + $0x128] sm:$0xff] }
 0x122   : > { %v1060_v37 = vld [vmem:[%s9349_s3 + $0x370] sm:$0xff]  ;;  %v1066_v30 = vld [vmem:[%s9349_s3 + $0x3a0] sm:$0xf]  ;;  %v993_v28 = vld [vmem:[%s9349_s3 + $0x158] sm:$0xff] }
 0x123   : > { %5243 = vmatpush1.bf16.msra.mxu1 %v5242_v5  ;;  %5327 = vmatpush1.bf16.msra.mxu0 %v5326_v6  ;;  %v4533_v5 = vld [vmem:[%s9349_s3 + $0x6e8] sm:$0xff]  ;;  %v4539_v6 = vld [vmem:[%s9349_s3 + $0x718] sm:$0xff]  ;;  %v950_v50 = vld [vmem:[%s9349_s3] sm:$0xff] }
 0x124   : > { %5245 = vmatprep.subr.bf16.mxu1 %v5244_v12  ;;  %5329 = vmatprep.subr.bf16.mxu0 %v5328_v13  ;;  %v5258_v12 = vpack.c.bf16 %v4526_v59, %v4520_v57  ;;  %v5342_v13 = vpack.c.bf16 %v1042_v2, %v1036_v0  ;;  %v5260_v20 = vpack.c.bf16 %v4539_v6, %v4533_v5  ;;  %v956_v51 = vld [vmem:[%s9349_s3 + $0x30] sm:$0xff]  ;;  %v4590_v53 = vld [vmem:[%s9349_s3 + $0x7c0] sm:$0xff]  ;;  %v4597_v57 = vld [vmem:[%s9349_s3 + $0x7f8] sm:$0xff] }
 0x125   : > { %v4584_v52 = vld [vmem:[%s9349_s3 + $0x790] sm:$0xff]  ;;  %v4603_v59 = vld [vmem:[%s9349_s3 + $0x828] sm:$0xff]  ;;  %v962_v0 = vld [vmem:[%s9349_s3 + $0x60] sm:$0xff] }
 0x126   : > { %v968_v2 = vld [vmem:[%s9349_s3 + $0x90] sm:$0xff]  ;;  %v5442_v6 = vpack.c.bf16 %v4603_v59, %v4597_v57  ;;  %v4602_v11 = vld [vmem:[%s9349_s3 + $0x820] sm:$0xff]  ;;  %v999_v41 = vld [vmem:[%s9349_s3 + $0x188] sm:$0xff] }
 0x127   : > { %5247 = vmatpush1.bf16.msra.mxu1 %v5246_v23  ;;  %5331 = vmatpush1.bf16.msra.mxu0 %v5330_v25  ;;  %v4545_v23 = vld [vmem:[%s9349_s3 + $0x748] sm:$0xff]  ;;  %v4551_v25 = vld [vmem:[%s9349_s3 + $0x778] sm:$0xf]  ;;  %v4596_v10 = vld [vmem:[%s9349_s3 + $0x7f0] sm:$0xff] }
 0x128   : > { %5249 = vmatprep.subr.bf16.mxu1 %v5248_v19  ;;  %5333 = vmatprep.subr.bf16.mxu0 %v5332_v29  ;;  %v5262_v19 = vpack.c.bf16 %v4538_v18, %v4532_v16  ;;  %v5346_v29 = vpack.c.bf16 %v1054_v22, %v1048_v21  ;;  %v5264_v34 = vpack.c.bf16 %v4551_v25, %v4545_v23  ;;  %v4609_v16 = vld [vmem:[%s9349_s3 + $0x858] sm:$0xff]  ;;  %v4615_v18 = vld [vmem:[%s9349_s3 + $0x888] sm:$0xff]  ;;  %v980_v21 = vld [vmem:[%s9349_s3 + $0xf0] sm:$0xff] }
 0x129   : > { %v5446_v23 = vpack.c.bf16 %v4615_v18, %v4609_v16  ;;  %v4614_v25 = vld [vmem:[%s9349_s3 + $0x880] sm:$0xff]  ;;  %v1005_v42 = vld [vmem:[%s9349_s3 + $0x1b8] sm:$0xff]  ;;  %v1011_v57 = vld [vmem:[%s9349_s3 + $0x1e8] sm:$0xff] }
 0x12a   : > { %v1017_v59 = vld [vmem:[%s9349_s3 + $0x218] sm:$0xff]  ;;  %v1023_v16 = vld [vmem:[%s9349_s3 + $0x248] sm:$0xff] }
 0x12b   : > { %5251 = vmatpush1.bf16.msra.mxu1 %v5250_v38  ;;  %5335 = vmatpush1.bf16.msra.mxu0 %v5334_v40  ;;  %v951_v38 = vld [vmem:[%s9349_s3 + $0x8] sm:$0xff]  ;;  %v957_v40 = vld [vmem:[%s9349_s3 + $0x38] sm:$0xff] }
 0x12c   : > { %5253 = vmatprep.subr.bf16.mxu1 %v5252_v43  ;;  %5337 = vmatprep.subr.bf16.mxu0 %v5336_v46  ;;  %v5267_v43 = vpack.c.bf16 %v4550_v33, %v4544_v31  ;;  %v5351_v46 = vpack.c.bf16 %v1066_v30, %v1060_v37  ;;  %v5270_v48 = vpack.c.bf16 %v957_v40, %v951_v38  ;;  %v1886_v37 = vrot.slane %v6785_v39, 2  ;;  %v4626_v40 = vld [vmem:[%s9349_s3 + $0x8e0] sm:$0xff]  ;;  %v1029_v18 = vld [vmem:[%s9349_s3 + $0x278] sm:$0xff] }
 0x12d   : > { %v5282_v30 = vpack.c.bf16 %v993_v28, %v987_v26  ;;  %v4662_v28 = vld [vmem:[%s9349_s3 + $0xa00] sm:$0xff] }
 0x12f   : > { %5255 = vmatpush1.bf16.msra.mxu1 %v5254_v55  ;;  %5339 = vmatpush1.bf16.msra.mxu0 %v5338_v56  ;;  %v963_v55 = vld [vmem:[%s9349_s3 + $0x68] sm:$0xff]  ;;  %v969_v56 = vld [vmem:[%s9349_s3 + $0x98] sm:$0xff] }
 0x130   : > { %5257 = vmatprep.subr.bf16.mxu1 %v5256_v61  ;;  %5341 = vmatprep.subr.bf16.mxu0 %v5340_v63  ;;  %v5272_v61 = vpack.c.bf16 %v956_v51, %v950_v50  ;;  %v5440_v63 = vpack.c.bf16 %v4590_v53, %v4584_v52  ;;  %v5274_v5 = vpack.c.bf16 %v969_v56, %v963_v55  ;;  %v998_v51 = vld [vmem:[%s9349_s3 + $0x180] sm:$0xff]  ;;  %v1004_v52 = vld [vmem:[%s9349_s3 + $0x1b0] sm:$0xff] }
 0x131   : > { %v5286_v50 = vpack.c.bf16 %v1005_v42, %v999_v41  ;;  %v4632_v53 = vld [vmem:[%s9349_s3 + $0x910] sm:$0xff]  ;;  %v4638_v56 = vld [vmem:[%s9349_s3 + $0x940] sm:$0xff]  ;;  %v1047_v42 = vld [vmem:[%s9349_s3 + $0x308] sm:$0xff] }
 0x132   : > { %v4674_v41 = vld [vmem:[%s9349_s3 + $0xa60] sm:$0xff] }
 0x133   : > { %5259 = vmatpush1.bf16.msra.mxu1 %v5258_v12  ;;  %5343 = vmatpush1.bf16.msra.mxu0 %v5342_v13  ;;  %v975_v12 = vld [vmem:[%s9349_s3 + $0xc8] sm:$0xff]  ;;  %v981_v13 = vld [vmem:[%s9349_s3 + $0xf8] sm:$0xff] }
 0x134   : > { %5261 = vmatprep.subr.bf16.mxu1 %v5260_v20  ;;  %5345 = vmatprep.subr.bf16.mxu0 %v5344_v17  ;;  %v5276_v20 = vpack.c.bf16 %v968_v2, %v962_v0  ;;  %v974_v17 = vld [vmem:[%s9349_s3 + $0xc0] sm:$0xff]  ;;  %v5278_v22 = vpack.c.bf16 %v981_v13, %v975_v12  ;;  %v5288_v0 = vpack.c.bf16 %v1004_v52, %v998_v51 }
 0x135   : > { %v5280_v31 = vpack.c.bf16 %v980_v21, %v974_v17  ;;  %v5456_v2 = vpack.c.bf16 %v4638_v56, %v4632_v53  ;;  %v4650_v13 = vld [vmem:[%s9349_s3 + $0x9a0] sm:$0xff]  ;;  %v1052_v53 = vld [vmem:[%s9349_s3 + $0x330] sm:$0xff] }
 0x136   : > { %v1046_v52 = vld [vmem:[%s9349_s3 + $0x300] sm:$0xff] }
 0x137   : > { %5263 = vmatpush1.bf16.msra.mxu1 %v5262_v19  ;;  %5347 = vmatpush1.bf16.msra.mxu0 %v5346_v29  ;;  %v4621_v19 = vld [vmem:[%s9349_s3 + $0x8b8] sm:$0xff]  ;;  %v4627_v29 = vld [vmem:[%s9349_s3 + $0x8e8] sm:$0xff] }
 0x138   : > { %5266 = vmatprep.subr.msk.bf16.mxu1 %vm6360_vm2, %v5264_v34  ;;  %5350 = vmatprep.subr.msk.bf16.mxu0 %vm6360_vm2, %v5348_v35  ;;  %v986_v34 = vld [vmem:[%s9349_s3 + $0x120] sm:$0xff]  ;;  %v992_v35 = vld [vmem:[%s9349_s3 + $0x150] sm:$0xff]  ;;  %v5450_v38 = vpack.c.bf16 %v4627_v29, %v4621_v19  ;;  %v1035_v19 = vld [vmem:[%s9349_s3 + $0x2a8] sm:$0xff] }
 0x139   : > { %v1041_v29 = vld [vmem:[%s9349_s3 + $0x2d8] sm:$0xff] }
 0x13b   : > { %5269 = vmatpush1.bf16.msk.msra.mxu1 %vm6360_vm2, %v5267_v43  ;;  %5353 = vmatpush1.bf16.msk.msra.mxu0 %vm6360_vm2, %v5351_v46  ;;  %v4633_v43 = vld [vmem:[%s9349_s3 + $0x918] sm:$0xff]  ;;  %v4639_v46 = vld [vmem:[%s9349_s3 + $0x948] sm:$0xff] }
 0x13c   : > { %5271 = vmatprep.subr.bf16.mxu1 %v5270_v48  ;;  %5439 = vmatprep.subr.bf16.mxu0 %v5438_v49  ;;  %v5454_v55 = vpack.c.bf16 %v4639_v46, %v4633_v43  ;;  %v1053_v43 = vld [vmem:[%s9349_s3 + $0x338] sm:$0xff] }
 0x13d   : > { %v4681_v46 = vld [vmem:[%s9349_s3 + $0xa98] sm:$0xff]  ;;  %v5302_v51 = vpack.c.bf16 %v1053_v43, %v1047_v42  ;;  %v984_v43 = vld [vmem:[%s9349_s3 + $0x110] sm:$0xff] }
 0x13e   : > { %1471 = vmatmul.mubr.f32.vlgmr.msra.gmra.mrb[14].mxu1 %v6849_v24  ;;  %1661 = vmatmul.mubr.f32.vlgmr.msra.gmra.mrb[8].mxu0 %v6794_v44  ;;  %v5444_v24 = vpack.c.bf16 %v4602_v11, %v4596_v10  ;;  %v1016_v10 = vld [vmem:[%s9349_s3 + $0x210] sm:$0xff] }
 0x13f   : > { %4565 = vmatprep.mubr.msk.f32.mxu1 %vm552_vm3, %v6871_v15  ;;  %5273 = vmatpush1.bf16.msra.mxu1 %v5272_v61  ;;  %v4608_v15 = vld [vmem:[%s9349_s3 + $0x850] sm:$0xff]  ;;  %v4645_v61 = vld [vmem:[%s9349_s3 + $0x978] sm:$0xff] }
 0x140   : > { %4575 = vmatprep.mubr.msk.f32.mxu0 %vm552_vm3, %v6799_v47  ;;  %5441 = vmatpush1.bf16.msra.mxu0 %v5440_v63  ;;  %v5448_v33 = vpack.c.bf16 %v4614_v25, %v4608_v15  ;;  %v4651_v63 = vld [vmem:[%s9349_s3 + $0x9a8] sm:$0xff]  ;;  %v4644_v11 = vld [vmem:[%s9349_s3 + $0x970] sm:$0xff] }
 0x141   : > { %5275 = vmatprep.subr.bf16.mxu1 %v5274_v5  ;;  %5443 = vmatprep.subr.bf16.mxu0 %v5442_v6  ;;  %v5290_v5 = vpack.c.bf16 %v1017_v59, %v1011_v57  ;;  %v1010_v6 = vld [vmem:[%s9349_s3 + $0x1e0] sm:$0xff]  ;;  %v5458_v12 = vpack.c.bf16 %v4651_v63, %v4645_v61  ;;  %v5460_v21 = vpack.c.bf16 %v4650_v13, %v4644_v11  ;;  %v1028_v15 = vld [vmem:[%s9349_s3 + $0x270] sm:$0xff]  ;;  %v1059_v59 = vld [vmem:[%s9349_s3 + $0x368] sm:$0xff] }
 0x142   : > { %1477 = vmatmul.mubr.f32.gmra.mrb[16].mxu1 %v6887_v27  ;;  %1667 = vmatmul.mubr.f32.gmra.mrb[10].mxu0 %v6796_v45  ;;  %v1887_v27 = vrot.slane %v6799_v47, 2  ;;  %v5292_v17 = vpack.c.bf16 %v1016_v10, %v1010_v6  ;;  %v4656_v25 = vld [vmem:[%s9349_s3 + $0x9d0] sm:$0xff]  ;;  %v4686_v57 = vld [vmem:[%s9349_s3 + $0xac0] sm:$0xff]  ;;  %v1065_v61 = vld [vmem:[%s9349_s3 + $0x398] sm:$0xf] }
 0x143   : > { %4566 = vmatprep.mubr.msk.f32.mxu1 %vm552_vm3, %v6912_v54  ;;  %5277 = vmatpush1.bf16.msra.mxu1 %v5276_v20  ;;  %v4620_v54 = vld [vmem:[%s9349_s3 + $0x8b0] sm:$0xff]  ;;  %v4657_v20 = vld [vmem:[%s9349_s3 + $0x9d8] sm:$0xff]  ;;  %v5306_v6 = vpack.c.bf16 %v1065_v61, %v1059_v59  ;;  %v1058_v10 = vld [vmem:[%s9349_s3 + $0x360] sm:$0xff] }
 0x144   : > { %4576 = vmatprep.mubr.msk.f32.mxu0 %vm552_vm3, %v6830_v14  ;;  %5445 = vmatpush1.bf16.msra.mxu0 %v5444_v24  ;;  %v7214_v48 = vsel %vm769_vm5, %v1886_v37, %v1887_v27  ;;  %v5452_v49 = vpack.c.bf16 %v4626_v40, %v4620_v54  ;;  %v4663_v24 = vld [vmem:[%s9349_s3 + $0xa08] sm:$0xff]  ;;  %v5298_v54 = vpack.c.bf16 %v1041_v29, %v1035_v19  ;;  %v1034_v37 = vld [vmem:[%s9349_s3 + $0x2a0] sm:$0xff]  ;;  %v4693_v63 = vld [vmem:[%s9349_s3 + $0xaf8] sm:$0xff]  ;;  %v1883_v19 = vrot.slane %v6794_v44, 2 }
 0x145   : > { %5279 = vmatprep.subr.bf16.mxu1 %v5278_v22  ;;  %5447 = vmatprep.subr.bf16.mxu0 %v5446_v23  ;;  %v5294_v22 = vpack.c.bf16 %v1029_v18, %v1023_v16  ;;  %v1022_v23 = vld [vmem:[%s9349_s3 + $0x240] sm:$0xff]  ;;  %v5462_v26 = vpack.c.bf16 %v4663_v24, %v4657_v20  ;;  %v1064_v11 = vld [vmem:[%s9349_s3 + $0x390] sm:$0xf]  ;;  %v955_v18 = vld [vmem:[%s9349_s3 + $0x28] sm:$0xff] }
 0x146   : > { %1483 = vmatmul.mubr.f32.gmra.mrb[18].mxu1 %v6928_v58  ;;  %1673 = vmatmul.mubr.f32.gmra.mrb[12].mxu0 %v6817_v3  ;;  %v5284_v58 = vpack.c.bf16 %v992_v35, %v986_v34  ;;  %v5296_v34 = vpack.c.bf16 %v1028_v15, %v1022_v23  ;;  %v5464_v35 = vpack.c.bf16 %v4662_v28, %v4656_v25  ;;  %v4698_v16 = vld [vmem:[%s9349_s3 + $0xb20] sm:$0xf]  ;;  %v961_v20 = vld [vmem:[%s9349_s3 + $0x58] sm:$0xff]  ;;  %v960_v23 = vld [vmem:[%s9349_s3 + $0x50] sm:$0xff]  ;;  %v1884_v15 = vrot.slane %v6796_v45, 2 }
 0x147   : > { %5281 = vmatpush1.bf16.msra.mxu1 %v5280_v31  ;;  %4569 = vmatprep.mubr.msk.f32.mxu1 %vm552_vm3, %v6785_v39  ;;  %v4669_v31 = vld [vmem:[%s9349_s3 + $0xa38] sm:$0xff]  ;;  %v5309_v24 = vpack.c.bf16 %v1064_v11, %v1058_v10  ;;  %v967_v25 = vld [vmem:[%s9349_s3 + $0x88] sm:$0xff]  ;;  %v1891_v28 = vrot.slane %v6830_v14, 2  ;;  %v1014_v10 = vld [vmem:[%s9349_s3 + $0x200] sm:$0xff] }
 0x148   : > { %5449 = vmatpush1.bf16.msra.mxu0 %v5448_v33  ;;  %4709 = vmatprep.mubr.msk.f32.mxu0 %vm552_vm3, %v7214_v48  ;;  %v4675_v33 = vld [vmem:[%s9349_s3 + $0xa68] sm:$0xff]  ;;  %v1020_v11 = vld [vmem:[%s9349_s3 + $0x230] sm:$0xff] }
 0x149   : > { %5283 = vmatprep.subr.bf16.mxu1 %v5282_v30  ;;  %5451 = vmatprep.subr.bf16.mxu0 %v5450_v38  ;;  %v1040_v30 = vld [vmem:[%s9349_s3 + $0x2d0] sm:$0xff]  ;;  %v5466_v40 = vpack.c.bf16 %v4675_v33, %v4669_v31  ;;  %v966_v33 = vld [vmem:[%s9349_s3 + $0x80] sm:$0xff] }
 0x14a   : > { %v4668_v38 = vld [vmem:[%s9349_s3 + $0xa30] sm:$0xff] }
 0x14b   : > { %5285 = vmatpush1.bf16.msra.mxu1 %v5284_v58  ;;  %v4687_v58 = vld [vmem:[%s9349_s3 + $0xac8] sm:$0xff] }
 0x14c   : > { %5453 = vmatpush1.bf16.msra.mxu0 %v5452_v49  ;;  %5287 = vmatprep.subr.bf16.mxu1 %v5286_v50  ;;  %v5300_v49 = vpack.c.bf16 %v1040_v30, %v1034_v37  ;;  %v5468_v50 = vpack.c.bf16 %v4674_v41, %v4668_v38  ;;  %v5470_v56 = vpack.c.bf16 %v4687_v58, %v4681_v46  ;;  %v979_v37 = vld [vmem:[%s9349_s3 + $0xe8] sm:$0xff]  ;;  %v985_v30 = vld [vmem:[%s9349_s3 + $0x118] sm:$0xff]  ;;  %v1895_v38 = vrot.slane %v6868_v36, 2  ;;  %v978_v36 = vld [vmem:[%s9349_s3 + $0xe0] sm:$0xff] }
 0x14d   : > { %5455 = vmatprep.subr.bf16.mxu0 %v5454_v55  ;;  %v4680_v55 = vld [vmem:[%s9349_s3 + $0xa90] sm:$0xff]  ;;  %v5362_v42 = vpack.c.bf16 %v985_v30, %v979_v37  ;;  %v1893_v46 = vrot.slane %v6862_v32, 2  ;;  %v991_v58 = vld [vmem:[%s9349_s3 + $0x148] sm:$0xff]  ;;  %v5364_v32 = vpack.c.bf16 %v984_v43, %v978_v36  ;;  %v4589_v36 = vld [vmem:[%s9349_s3 + $0x7b8] sm:$0xff] }
 0x14f   : > { %5289 = vmatpush1.bf16.msra.mxu1 %v5288_v0  ;;  %v4699_v0 = vld [vmem:[%s9349_s3 + $0xb28] sm:$0xf] }
 0x150   : > { %5457 = vmatpush1.bf16.msra.mxu0 %v5456_v2  ;;  %5291 = vmatprep.subr.bf16.mxu1 %v5290_v5  ;;  %v5304_v2 = vpack.c.bf16 %v1052_v53, %v1046_v52  ;;  %v5472_v5 = vpack.c.bf16 %v4686_v57, %v4680_v55  ;;  %v5474_v13 = vpack.c.bf16 %v4699_v0, %v4693_v63  ;;  %v990_v52 = vld [vmem:[%s9349_s3 + $0x140] sm:$0xff]  ;;  %v996_v53 = vld [vmem:[%s9349_s3 + $0x170] sm:$0xff]  ;;  %v1009_v57 = vld [vmem:[%s9349_s3 + $0x1d8] sm:$0xff] }
 0x151   : > { %5459 = vmatprep.subr.bf16.mxu0 %v5458_v12  ;;  %v4692_v12 = vld [vmem:[%s9349_s3 + $0xaf0] sm:$0xff]  ;;  %v5368_v59 = vpack.c.bf16 %v996_v53, %v990_v52  ;;  %v1002_v63 = vld [vmem:[%s9349_s3 + $0x1a0] sm:$0xff] }
 0x152   : > { %v1008_v0 = vld [vmem:[%s9349_s3 + $0x1d0] sm:$0xff] }
 0x153   : > { %5293 = vmatpush1.bf16.msra.mxu1 %v5292_v17  ;;  %v5477_v17 = vpack.c.bf16 %v4698_v16, %v4692_v12  ;;  %v1027_v12 = vld [vmem:[%s9349_s3 + $0x268] sm:$0xff]  ;;  %v5376_v16 = vpack.c.bf16 %v1020_v11, %v1014_v10  ;;  %v4618_v10 = vld [vmem:[%s9349_s3 + $0x8a0] sm:$0xff]  ;;  %v4624_v11 = vld [vmem:[%s9349_s3 + $0x8d0] sm:$0xff] }
 0x154   : > { %5461 = vmatpush1.bf16.msra.mxu0 %v5460_v21  ;;  %5295 = vmatprep.subr.bf16.mxu1 %v5294_v22  ;;  %v5354_v21 = vpack.c.bf16 %v961_v20, %v955_v18  ;;  %v954_v22 = vld [vmem:[%s9349_s3 + $0x20] sm:$0xff] }
 0x155   : > { %5463 = vmatprep.subr.bf16.mxu0 %v5462_v26  ;;  %v973_v26 = vld [vmem:[%s9349_s3 + $0xb8] sm:$0xff]  ;;  %v5356_v29 = vpack.c.bf16 %v960_v23, %v954_v22  ;;  %v1026_v20 = vld [vmem:[%s9349_s3 + $0x260] sm:$0xff] }
 0x156   : > { %v5358_v31 = vpack.c.bf16 %v973_v26, %v967_v25  ;;  %v1044_v25 = vld [vmem:[%s9349_s3 + $0x2f0] sm:$0xff]  ;;  %v1051_v26 = vld [vmem:[%s9349_s3 + $0x328] sm:$0xff] }
 0x157   : > { %5297 = vmatpush1.bf16.msra.mxu1 %v5296_v34  ;;  %v972_v34 = vld [vmem:[%s9349_s3 + $0xb0] sm:$0xff] }
 0x158   : > { %5465 = vmatpush1.bf16.msra.mxu0 %v5464_v35  ;;  %5299 = vmatprep.subr.bf16.mxu1 %v5298_v54  ;;  %v7387_v35 = vsel %vm769_vm5, %v1883_v19, %v1884_v15  ;;  %v1889_v54 = vrot.slane %v6817_v3, 2  ;;  %v5360_v41 = vpack.c.bf16 %v972_v34, %v966_v33  ;;  %v1056_v33 = vld [vmem:[%s9349_s3 + $0x350] sm:$0xff]  ;;  %v1063_v34 = vld [vmem:[%s9349_s3 + $0x388] sm:$0xff] }
 0x159   : > { %5467 = vmatprep.subr.bf16.mxu0 %v5466_v40  ;;  %v7403_v40 = vsel %vm769_vm5, %v1887_v27, %v1891_v28 }
 0x15a   : > { %v7415_v27 = vsel %vm769_vm5, %v1884_v15, %v1889_v54  ;;  %v7440_v55 = vsel %vm769_vm5, %v1889_v54, %v1893_v46  ;;  %v1038_v15 = vld [vmem:[%s9349_s3 + $0x2c0] sm:$0xff]  ;;  %v1069_v54 = vld [vmem:[%s9349_s3 + $0x3b8] sm:$0xf] }
 0x15b   : > { %5301 = vmatpush1.bf16.msra.mxu1 %v5300_v49  ;;  %v997_v49 = vld [vmem:[%s9349_s3 + $0x178] sm:$0xff]  ;;  %v5384_v19 = vpack.c.bf16 %v1044_v25, %v1038_v15  ;;  %v5390_v30 = vpack.c.bf16 %v1069_v54, %v1063_v34  ;;  %v4666_v54 = vld [vmem:[%s9349_s3 + $0xa20] sm:$0xff] }
 0x15c   : > { %5469 = vmatpush1.bf16.msra.mxu0 %v5468_v50  ;;  %5303 = vmatprep.subr.bf16.mxu1 %v5302_v51  ;;  %v7428_v50 = vsel %vm769_vm5, %v1891_v28, %v1895_v38  ;;  %v5366_v51 = vpack.c.bf16 %v997_v49, %v991_v58  ;;  %v1057_v28 = vld [vmem:[%s9349_s3 + $0x358] sm:$0xff]  ;;  %v1062_v38 = vld [vmem:[%s9349_s3 + $0x380] sm:$0xff]  ;;  %v4588_v49 = vld [vmem:[%s9349_s3 + $0x7b0] sm:$0xff] }
 0x15d   : > { %5471 = vmatprep.subr.bf16.mxu0 %v5470_v56  ;;  %v1003_v56 = vld [vmem:[%s9349_s3 + $0x1a8] sm:$0xff]  ;;  %v4582_v58 = vld [vmem:[%s9349_s3 + $0x780] sm:$0xff]  ;;  %v4661_v15 = vld [vmem:[%s9349_s3 + $0x9f8] sm:$0xff] }
 0x15e   : > { %v5370_v61 = vpack.c.bf16 %v1009_v57, %v1003_v56  ;;  %v5398_v52 = vpack.c.bf16 %v4588_v49, %v4582_v58  ;;  %v4594_v56 = vld [vmem:[%s9349_s3 + $0x7e0] sm:$0xff]  ;;  %v4600_v57 = vld [vmem:[%s9349_s3 + $0x810] sm:$0xff]  ;;  %v4697_v58 = vld [vmem:[%s9349_s3 + $0xb18] sm:$0xf] }
 0x15f   : > { %5305 = vmatpush1.bf16.msra.mxu1 %v5304_v2  ;;  %v1015_v2 = vld [vmem:[%s9349_s3 + $0x208] sm:$0xff] }
 0x160   : > { %5473 = vmatpush1.bf16.msra.mxu0 %v5472_v5  ;;  %5308 = vmatprep.subr.msk.bf16.mxu1 %vm6360_vm2, %v5306_v6  ;;  %v5372_v5 = vpack.c.bf16 %v1008_v0, %v1002_v63  ;;  %v5402_v63 = vpack.c.bf16 %v4600_v57, %v4594_v56  ;;  %v4593_v56 = vld [vmem:[%s9349_s3 + $0x7d8] sm:$0xff] }
 0x161   : > { %5476 = vmatprep.subr.msk.bf16.mxu0 %vm6360_vm2, %v5474_v13  ;;  %v1033_v13 = vld [vmem:[%s9349_s3 + $0x298] sm:$0xff] }
 0x162   : > { %v5378_v18 = vpack.c.bf16 %v1033_v13, %v1027_v12  ;;  %v4631_v12 = vld [vmem:[%s9349_s3 + $0x908] sm:$0xff] }
 0x163   : > { %5311 = vmatpush1.bf16.msk.msra.mxu1 %vm6360_vm2, %v5309_v24  ;;  %v1032_v24 = vld [vmem:[%s9349_s3 + $0x290] sm:$0xff] }
 0x164   : > { %5479 = vmatpush1.bf16.msk.msra.mxu0 %vm6360_vm2, %v5477_v17  ;;  %5355 = vmatprep.subr.bf16.mxu1 %v5354_v21  ;;  %v1039_v17 = vld [vmem:[%s9349_s3 + $0x2c8] sm:$0xff]  ;;  %v1045_v21 = vld [vmem:[%s9349_s3 + $0x2f8] sm:$0xff]  ;;  %v5380_v22 = vpack.c.bf16 %v1032_v24, %v1026_v20 }
 0x165   : > { %v5382_v23 = vpack.c.bf16 %v1045_v21, %v1039_v17  ;;  %v4643_v20 = vld [vmem:[%s9349_s3 + $0x968] sm:$0xff]  ;;  %v4642_v21 = vld [vmem:[%s9349_s3 + $0x960] sm:$0xff] }
 0x166   : > { %1578 = vmatmul.mubr.f32.vlgmr.msra.gmra.mrb[8].mxu1 %v6794_v44 }
 0x167   : > { %2072 = vmatmul.mubr.f32.vlgmr.msra.gmra.mrb[8].mxu0 %v7387_v35  ;;  %4570 = vmatprep.mubr.msk.f32.mxu1 %vm552_vm3, %v6799_v47 }
 0x168   : > { %5357 = vmatpush1.bf16.msra.mxu1 %v5356_v29  ;;  %4710 = vmatprep.mubr.msk.f32.mxu0 %vm552_vm3, %v7403_v40  ;;  %v5386_v29 = vpack.c.bf16 %v1057_v28, %v1051_v26  ;;  %v4654_v28 = vld [vmem:[%s9349_s3 + $0x9c0] sm:$0xff] }
 0x169   : > { %5359 = vmatprep.subr.bf16.mxu1 %v5358_v31  ;;  %v1050_v31 = vld [vmem:[%s9349_s3 + $0x320] sm:$0xff] }
 0x16a   : > { %1584 = vmatmul.mubr.f32.gmra.mrb[10].mxu1 %v6796_v45  ;;  %v5388_v37 = vpack.c.bf16 %v1056_v33, %v1050_v31  ;;  %v4673_v31 = vld [vmem:[%s9349_s3 + $0xa58] sm:$0xff] }
 0x16b   : > { %2078 = vmatmul.mubr.f32.gmra.mrb[10].mxu0 %v7415_v27  ;;  %4571 = vmatprep.mubr.msk.f32.mxu1 %vm552_vm3, %v6830_v14 }
 0x16c   : > { %5361 = vmatpush1.bf16.msra.mxu1 %v5360_v41  ;;  %4711 = vmatprep.mubr.msk.f32.mxu0 %vm552_vm3, %v7428_v50  ;;  %v1068_v41 = vld [vmem:[%s9349_s3 + $0x3b0] sm:$0xf] }
 0x16d   : > { %5363 = vmatprep.subr.bf16.mxu1 %v5362_v42  ;;  %v4583_v42 = vld [vmem:[%s9349_s3 + $0x788] sm:$0xff]  ;;  %v5393_v43 = vpack.c.bf16 %v1068_v41, %v1062_v38  ;;  %v4685_v38 = vld [vmem:[%s9349_s3 + $0xab8] sm:$0xff] }
 0x16e   : > { %1590 = vmatmul.mubr.f32.gmra.mrb[12].mxu1 %v6817_v3  ;;  %v5396_v46 = vpack.c.bf16 %v4589_v36, %v4583_v42  ;;  %v4678_v36 = vld [vmem:[%s9349_s3 + $0xa80] sm:$0xff] }
 0x16f   : > { %2084 = vmatmul.mubr.f32.gmra.mrb[12].mxu0 %v7440_v55  ;;  %4579 = vmatprep.mubr.msk.f32.mxu1 %vm552_vm3, %v6785_v39  ;;  %v1021_v39 = vld [vmem:[%s9349_s3 + $0x238] sm:$0xff] }
 0x170   : > { %5365 = vmatpush1.bf16.msra.mxu1 %v5364_v32  ;;  %v5374_v6 = vpack.c.bf16 %v1021_v39, %v1015_v2  ;;  %v4595_v32 = vld [vmem:[%s9349_s3 + $0x7e8] sm:$0xff]  ;;  %v4606_v2 = vld [vmem:[%s9349_s3 + $0x840] sm:$0xff]  ;;  %v4612_v39 = vld [vmem:[%s9349_s3 + $0x870] sm:$0xff] }
 0x171   : > { %5367 = vmatprep.subr.bf16.mxu1 %v5366_v51  ;;  %v4601_v51 = vld [vmem:[%s9349_s3 + $0x818] sm:$0xff] }
 0x172   : > { %v5400_v53 = vpack.c.bf16 %v4601_v51, %v4595_v32  ;;  %v4690_v51 = vld [vmem:[%s9349_s3 + $0xae0] sm:$0xff] }
 0x174   : > { %5369 = vmatpush1.bf16.msra.mxu1 %v5368_v59  ;;  %v4607_v59 = vld [vmem:[%s9349_s3 + $0x848] sm:$0xff] }
 0x175   : > { %5371 = vmatprep.subr.bf16.mxu1 %v5370_v61  ;;  %v4613_v61 = vld [vmem:[%s9349_s3 + $0x878] sm:$0xff] }
 0x176   : > { %v5404_v0 = vpack.c.bf16 %v4613_v61, %v4607_v59  ;;  %v4586_v61 = vld [vmem:[%s9349_s3 + $0x7a0] sm:$0xff] }
 0x178   : > { %5373 = vmatpush1.bf16.msra.mxu1 %v5372_v5  ;;  %v4619_v5 = vld [vmem:[%s9349_s3 + $0x8a8] sm:$0xff] }
 0x179   : > { %5375 = vmatprep.subr.bf16.mxu1 %v5374_v6 }
 0x17c   : > { %5377 = vmatpush1.bf16.msra.mxu1 %v5376_v16  ;;  %v4630_v16 = vld [vmem:[%s9349_s3 + $0x900] sm:$0xff] }
 0x17d   : > { %5379 = vmatprep.subr.bf16.mxu1 %v5378_v18  ;;  %v4636_v18 = vld [vmem:[%s9349_s3 + $0x930] sm:$0xff] }
 0x17e   : > { %v5414_v24 = vpack.c.bf16 %v4636_v18, %v4630_v16  ;;  %v4629_v16 = vld [vmem:[%s9349_s3 + $0x8f8] sm:$0xff] }
 0x180   : > { %5381 = vmatpush1.bf16.msra.mxu1 %v5380_v22  ;;  %v4648_v22 = vld [vmem:[%s9349_s3 + $0x990] sm:$0xff] }
 0x181   : > { %5383 = vmatprep.subr.bf16.mxu1 %v5382_v23  ;;  %v4655_v23 = vld [vmem:[%s9349_s3 + $0x9c8] sm:$0xff]  ;;  %v5418_v25 = vpack.c.bf16 %v4648_v22, %v4642_v21  ;;  %v4641_v21 = vld [vmem:[%s9349_s3 + $0x958] sm:$0xff] }
 0x182   : > { %v5420_v26 = vpack.c.bf16 %v4661_v15, %v4655_v23  ;;  %v4634_v15 = vld [vmem:[%s9349_s3 + $0x920] sm:$0xff] }
 0x184   : > { %5385 = vmatpush1.bf16.msra.mxu1 %v5384_v19  ;;  %v4660_v19 = vld [vmem:[%s9349_s3 + $0x9f0] sm:$0xff] }
 0x185   : > { %5387 = vmatprep.subr.bf16.mxu1 %v5386_v29  ;;  %v4667_v29 = vld [vmem:[%s9349_s3 + $0xa28] sm:$0xff]  ;;  %v5422_v33 = vpack.c.bf16 %v4660_v19, %v4654_v28  ;;  %v4653_v28 = vld [vmem:[%s9349_s3 + $0x9b8] sm:$0xff]  ;;  %v4646_v19 = vld [vmem:[%s9349_s3 + $0x980] sm:$0xff] }
 0x186   : > { %v5424_v34 = vpack.c.bf16 %v4673_v31, %v4667_v29  ;;  %v4652_v31 = vld [vmem:[%s9349_s3 + $0x9b0] sm:$0xff] }
 0x188   : > { %5389 = vmatpush1.bf16.msra.mxu1 %v5388_v37  ;;  %v4672_v37 = vld [vmem:[%s9349_s3 + $0xa50] sm:$0xff] }
 0x189   : > { %5392 = vmatprep.subr.msk.bf16.mxu1 %vm6360_vm2, %v5390_v30  ;;  %v4679_v30 = vld [vmem:[%s9349_s3 + $0xa88] sm:$0xff]  ;;  %v5426_v41 = vpack.c.bf16 %v4672_v37, %v4666_v54  ;;  %v2360_v37 = vld [vmem:[%s9351_s5 + $0x18] sm:$0xff] }
 0x18a   : > { %v5428_v42 = vpack.c.bf16 %v4685_v38, %v4679_v30  ;;  %v2358_v54 = vld [vmem:[%s9351_s5 + $0x8] sm:$0xff]  ;;  %v2357_v30 = vld [vmem:[%s9351_s5] sm:$0xff] }
 0x18b   : > { %v5522_v38 = vpack.c.bf16 %v2360_v37, %v2358_v54  ;;  %v4700_v54 = vld [vmem:[%s9349_s3 + $0xb30] sm:$0xf] }
 0x18c   : > { %5395 = vmatpush1.bf16.msk.msra.mxu1 %vm6360_vm2, %v5393_v43  ;;  %v4684_v43 = vld [vmem:[%s9349_s3 + $0xab0] sm:$0xff] }
 0x18d   : > { %5397 = vmatprep.subr.bf16.mxu1 %v5396_v46  ;;  %v4691_v46 = vld [vmem:[%s9349_s3 + $0xae8] sm:$0xff]  ;;  %v5430_v49 = vpack.c.bf16 %v4684_v43, %v4678_v36  ;;  %v2364_v36 = vld [vmem:[%s9351_s5 + $0x38] sm:$0xff]  ;;  %v5502_v43 = vpack.c.bf16 %v4652_v31, %v4646_v19  ;;  %5523 = vmatprep.subr.bf16.mxu0 %v5522_v38  ;;  %v2377_v38 = vld [vmem:[%s9351_s5 + $0xa0] sm:$0xff] }
 0x18e   : > { %v5432_v32 = vpack.c.bf16 %v4697_v58, %v4691_v46  ;;  %v2380_v31 = vld [vmem:[%s9351_s5 + $0xb8] sm:$0xff] }
 0x18f   : > { %1744 = vmatmul.mubr.f32.vlgmr.msra.gmra.mrb[14].mxu1 %v6794_v44  ;;  %v4625_v44 = vld [vmem:[%s9349_s3 + $0x8d8] sm:$0xff] }
 0x190   : > { %4580 = vmatprep.mubr.msk.f32.mxu1 %vm552_vm3, %v6799_v47  ;;  %5399 = vmatpush1.bf16.msra.mxu1 %v5398_v52  ;;  %v5406_v47 = vpack.c.bf16 %v4612_v39, %v4606_v2  ;;  %v5408_v6 = vpack.c.bf16 %v4625_v44, %v4619_v5  ;;  %v4696_v52 = vld [vmem:[%s9349_s3 + $0xb10] sm:$0xf]  ;;  %v4605_v2 = vld [vmem:[%s9349_s3 + $0x838] sm:$0xff]  ;;  %v4598_v44 = vld [vmem:[%s9349_s3 + $0x800] sm:$0xff] }
 0x191   : > { %5401 = vmatprep.subr.bf16.mxu1 %v5400_v53  ;;  %v4587_v53 = vld [vmem:[%s9349_s3 + $0x7a8] sm:$0xff]  ;;  %v5435_v57 = vpack.c.bf16 %v4696_v52, %v4690_v51 }
 0x192   : > { %v5480_v59 = vpack.c.bf16 %v4593_v56, %v4587_v53  ;;  %v2366_v51 = vld [vmem:[%s9351_s5 + $0x48] sm:$0xff]  ;;  %v4658_v53 = vld [vmem:[%s9349_s3 + $0x9e0] sm:$0xff]  ;;  %v4664_v56 = vld [vmem:[%s9349_s3 + $0xa10] sm:$0xff] }
 0x193   : > { %1750 = vmatmul.mubr.f32.gmra.mrb[16].mxu1 %v6796_v45  ;;  %v4637_v45 = vld [vmem:[%s9349_s3 + $0x938] sm:$0xff] }
 0x194   : > { %4581 = vmatprep.mubr.msk.f32.mxu1 %vm552_vm3, %v6830_v14  ;;  %5403 = vmatpush1.bf16.msra.mxu1 %v5402_v63  ;;  %v5410_v14 = vpack.c.bf16 %v4624_v11, %v4618_v10  ;;  %v5412_v13 = vpack.c.bf16 %v4637_v45, %v4631_v12  ;;  %v4592_v63 = vld [vmem:[%s9349_s3 + $0x7d0] sm:$0xff]  ;;  %v4617_v10 = vld [vmem:[%s9349_s3 + $0x898] sm:$0xff]  ;;  %v4610_v45 = vld [vmem:[%s9349_s3 + $0x860] sm:$0xff] }
 0x195   : > { %5405 = vmatprep.subr.bf16.mxu1 %v5404_v0  ;;  %v4599_v0 = vld [vmem:[%s9349_s3 + $0x808] sm:$0xff]  ;;  %v5482_v39 = vpack.c.bf16 %v4592_v63, %v4586_v61  ;;  %v4677_v61 = vld [vmem:[%s9349_s3 + $0xa78] sm:$0xff] }
 0x196   : > { %v5484_v5 = vpack.c.bf16 %v4605_v2, %v4599_v0  ;;  %v2365_v2 = vld [vmem:[%s9351_s5 + $0x40] sm:$0xff] }
 0x197   : > { %1756 = vmatmul.mubr.f32.gmra.mrb[18].mxu1 %v6817_v3  ;;  %v4649_v3 = vld [vmem:[%s9349_s3 + $0x998] sm:$0xff] }
 0x198   : > { %5407 = vmatpush1.bf16.msra.mxu1 %v5406_v47  ;;  %4704 = vmatprep.mubr.msk.f32.mxu1 %vm552_vm3, %v7214_v48  ;;  %v5416_v17 = vpack.c.bf16 %v4649_v3, %v4643_v20  ;;  %v4604_v47 = vld [vmem:[%s9349_s3 + $0x830] sm:$0xff]  ;;  %v4622_v3 = vld [vmem:[%s9349_s3 + $0x8c0] sm:$0xff] }
 0x199   : > { %5409 = vmatprep.subr.bf16.mxu1 %v5408_v6  ;;  %v4611_v6 = vld [vmem:[%s9349_s3 + $0x868] sm:$0xff]  ;;  %v5486_v11 = vpack.c.bf16 %v4604_v47, %v4598_v44  ;;  %v2372_v47 = vld [vmem:[%s9351_s5 + $0x78] sm:$0xff] }
 0x19a   : > { %v5488_v12 = vpack.c.bf16 %v4617_v10, %v4611_v6  ;;  %v2370_v44 = vld [vmem:[%s9351_s5 + $0x68] sm:$0xff]  ;;  %v4670_v10 = vld [vmem:[%s9349_s3 + $0xa40] sm:$0xff] }
 0x19c   : > { %5411 = vmatpush1.bf16.msra.mxu1 %v5410_v14  ;;  %v4616_v14 = vld [vmem:[%s9349_s3 + $0x890] sm:$0xff] }
 0x19d   : > { %5413 = vmatprep.subr.bf16.mxu1 %v5412_v13  ;;  %v4623_v13 = vld [vmem:[%s9349_s3 + $0x8c8] sm:$0xff]  ;;  %v5490_v18 = vpack.c.bf16 %v4616_v14, %v4610_v45  ;;  %v4689_v45 = vld [vmem:[%s9349_s3 + $0xad8] sm:$0xff] }
 0x19e   : > { %v5492_v20 = vpack.c.bf16 %v4629_v16, %v4623_v13  ;;  %v5534_v13 = vpack.c.bf16 %v2372_v47, %v2370_v44  ;;  %v2369_v16 = vld [vmem:[%s9351_s5 + $0x60] sm:$0xff]  ;;  %v2398_v47 = vld [vmem:[%s9351_s5 + $0x148] sm:$0xff] }
 0x19f   : > { %v2393_v44 = vld [vmem:[%s9351_s5 + $0x120] sm:$0xff] }
 0x1a0   : > { %5415 = vmatpush1.bf16.msra.mxu1 %v5414_v24  ;;  %v4628_v24 = vld [vmem:[%s9349_s3 + $0x8f0] sm:$0xff] }
 0x1a1   : > { %5417 = vmatprep.subr.bf16.mxu1 %v5416_v17  ;;  %v4635_v17 = vld [vmem:[%s9349_s3 + $0x928] sm:$0xff]  ;;  %v5494_v22 = vpack.c.bf16 %v4628_v24, %v4622_v3  ;;  %v2376_v24 = vld [vmem:[%s9351_s5 + $0x98] sm:$0xff] }
 0x1a2   : > { %v5496_v23 = vpack.c.bf16 %v4641_v21, %v4635_v17  ;;  %v2374_v3 = vld [vmem:[%s9351_s5 + $0x88] sm:$0xff]  ;;  %v4682_v21 = vld [vmem:[%s9349_s3 + $0xaa0] sm:$0xff] }
 0x1a4   : > { %5419 = vmatpush1.bf16.msra.mxu1 %v5418_v25  ;;  %v4640_v25 = vld [vmem:[%s9349_s3 + $0x950] sm:$0xff] }
 0x1a5   : > { %5421 = vmatprep.subr.bf16.mxu1 %v5420_v26  ;;  %v4647_v26 = vld [vmem:[%s9349_s3 + $0x988] sm:$0xff] }
 0x1a6   : > { %v5500_v29 = vpack.c.bf16 %v4653_v28, %v4647_v26  ;;  %v5538_v26 = vpack.c.bf16 %v2376_v24, %v2374_v3  ;;  %v2373_v28 = vld [vmem:[%s9351_s5 + $0x80] sm:$0xff]  ;;  %v2406_v3 = vld [vmem:[%s9351_s5 + $0x188] sm:$0xff]  ;;  %v2408_v24 = vld [vmem:[%s9351_s5 + $0x198] sm:$0xff] }
 0x1a8   : > { %5423 = vmatpush1.bf16.msra.mxu1 %v5422_v33  ;;  %v4659_v33 = vld [vmem:[%s9349_s3 + $0x9e8] sm:$0xff] }
 0x1a9   : > { %5425 = vmatprep.subr.bf16.mxu1 %v5424_v34  ;;  %v4665_v34 = vld [vmem:[%s9349_s3 + $0xa18] sm:$0xff] }
 0x1aa   : > { %v5504_v52 = vpack.c.bf16 %v4665_v34, %v4659_v33  ;;  %v4694_v34 = vld [vmem:[%s9349_s3 + $0xb00] sm:$0xff] }
 0x1ac   : > { %5427 = vmatpush1.bf16.msra.mxu1 %v5426_v41  ;;  %v2359_v41 = vld [vmem:[%s9351_s5 + $0x10] sm:$0xff] }
 0x1ad   : > { %5429 = vmatprep.subr.bf16.mxu1 %v5428_v42  ;;  %v2362_v42 = vld [vmem:[%s9351_s5 + $0x28] sm:$0xff]  ;;  %v5524_v46 = vpack.c.bf16 %v2359_v41, %v2357_v30  ;;  %v2379_v41 = vld [vmem:[%s9351_s5 + $0xb0] sm:$0xff] }
 0x1ae   : > { %v5526_v58 = vpack.c.bf16 %v2364_v36, %v2362_v42  ;;  %v5519_v42 = vpack.c.bf16 %v4700_v54, %v4694_v34  ;;  %v2382_v36 = vld [vmem:[%s9351_s5 + $0xc8] sm:$0xff]  ;;  %v2413_v54 = vld [vmem:[%s9351_s5 + $0x1c0] sm:$0xff] }
 0x1af   : > { %5525 = vmatpush1.bf16.msra.mxu0 %v5524_v46  ;;  %v5544_v46 = vpack.c.bf16 %v2379_v41, %v2377_v38  ;;  %v2418_v38 = vld [vmem:[%s9351_s5 + $0x1e8] sm:$0xff]  ;;  %v2420_v41 = vld [vmem:[%s9351_s5 + $0x1f8] sm:$0xff] }
 0x1b0   : > { %5431 = vmatpush1.bf16.msra.mxu1 %v5430_v49  ;;  %v2361_v49 = vld [vmem:[%s9351_s5 + $0x20] sm:$0xff]  ;;  %5527 = vmatprep.subr.bf16.mxu0 %v5526_v58 }
 0x1b1   : > { %5434 = vmatprep.subr.msk.bf16.mxu1 %vm6360_vm2, %v5432_v32  ;;  %v2363_v32 = vld [vmem:[%s9351_s5 + $0x30] sm:$0xff] }
 0x1b2   : > { %v5528_v63 = vpack.c.bf16 %v2363_v32, %v2361_v49  ;;  %v2381_v49 = vld [vmem:[%s9351_s5 + $0xc0] sm:$0xff]  ;;  %v2383_v32 = vld [vmem:[%s9351_s5 + $0xd0] sm:$0xff] }
 0x1b4   : > { %5437 = vmatpush1.bf16.msk.msra.mxu1 %vm6360_vm2, %v5435_v57  ;;  %v2368_v57 = vld [vmem:[%s9351_s5 + $0x58] sm:$0xff]  ;;  %5529 = vmatpush1.bf16.msra.mxu0 %v5528_v63 }
 0x1b5   : > { %5481 = vmatprep.subr.bf16.mxu1 %v5480_v59  ;;  %v4671_v59 = vld [vmem:[%s9349_s3 + $0xa48] sm:$0xff]  ;;  %v5530_v0 = vpack.c.bf16 %v2368_v57, %v2366_v51  ;;  %v2385_v57 = vld [vmem:[%s9351_s5 + $0xe0] sm:$0xff] }
 0x1b6   : > { %v5508_v6 = vpack.c.bf16 %v4677_v61, %v4671_v59  ;;  %v2386_v51 = vld [vmem:[%s9351_s5 + $0xe8] sm:$0xff]  ;;  %v5552_v61 = vpack.c.bf16 %v2387_v9, %v2385_v57 }
 0x1b7   : > { %1989 = vmatmul.mubr.f32.vlgmr.msra.gmra.mrb[8].mxu1 %v7387_v35  ;;  %5531 = vmatprep.subr.bf16.mxu0 %v5530_v0  ;;  %v2390_v59 = vld [vmem:[%s9351_s5 + $0x108] sm:$0xff]  ;;  %v2389_v0 = vld [vmem:[%s9351_s5 + $0x100] sm:$0xff] }
 0x1b8   : > { %4705 = vmatprep.mubr.msk.f32.mxu1 %vm552_vm3, %v7403_v40  ;;  %5483 = vmatpush1.bf16.msra.mxu1 %v5482_v39  ;;  %v2367_v39 = vld [vmem:[%s9351_s5 + $0x50] sm:$0xff] }
 0x1b9   : > { %5485 = vmatprep.subr.bf16.mxu1 %v5484_v5  ;;  %v5506_v5 = vpack.c.bf16 %v4664_v56, %v4658_v53  ;;  %v5532_v14 = vpack.c.bf16 %v2367_v39, %v2365_v2  ;;  %v5548_v53 = vpack.c.bf16 %v2383_v32, %v2381_v49  ;;  %v2394_v2 = vld [vmem:[%s9351_s5 + $0x128] sm:$0xff]  ;;  %v2424_v49 = vld [vmem:[%s9351_s5 + $0x218] sm:$0xff] }
 0x1bb   : > { %1995 = vmatmul.mubr.f32.gmra.mrb[10].mxu1 %v7415_v27  ;;  %5533 = vmatpush1.bf16.msra.mxu0 %v5532_v14  ;;  %v2404_v14 = vld [vmem:[%s9351_s5 + $0x178] sm:$0xff] }
 0x1bc   : > { %4706 = vmatprep.mubr.msk.f32.mxu1 %vm552_vm3, %v7428_v50  ;;  %5487 = vmatpush1.bf16.msra.mxu1 %v5486_v11  ;;  %v4676_v11 = vld [vmem:[%s9349_s3 + $0xa70] sm:$0xff] }
 0x1bd   : > { %5489 = vmatprep.subr.bf16.mxu1 %v5488_v12  ;;  %v4683_v12 = vld [vmem:[%s9349_s3 + $0xaa8] sm:$0xff]  ;;  %5535 = vmatprep.subr.bf16.mxu0 %v5534_v13 }
 0x1be   : > { %v5512_v17 = vpack.c.bf16 %v4689_v45, %v4683_v12  ;;  %v2399_v12 = vld [vmem:[%s9351_s5 + $0x150] sm:$0xff]  ;;  %v2402_v45 = vld [vmem:[%s9351_s5 + $0x168] sm:$0xff] }
 0x1bf   : > { %2001 = vmatmul.mubr.f32.gmra.mrb[12].mxu1 %v7440_v55 }
 0x1c0   : > { %5491 = vmatpush1.bf16.msra.mxu1 %v5490_v18  ;;  %4714 = vmatprep.mubr.msk.f32.mxu1 %vm552_vm3, %v7214_v48  ;;  %v5498_v48 = vpack.c.bf16 %v4640_v25, %v4634_v15  ;;  %v2371_v18 = vld [vmem:[%s9351_s5 + $0x70] sm:$0xff]  ;;  %v4701_v15 = vld [vmem:[%s9349_s3 + $0xb38] sm:$0xf] }
 0x1c1   : > { %5493 = vmatprep.subr.bf16.mxu1 %v5492_v20  ;;  %v5510_v20 = vpack.c.bf16 %v4676_v11, %v4670_v10  ;;  %v5536_v25 = vpack.c.bf16 %v2371_v18, %v2369_v16  ;;  %v2397_v11 = vld [vmem:[%s9351_s5 + $0x140] sm:$0xff]  ;;  %v5566_v16 = vpack.c.bf16 %v2404_v14, %v2402_v45 }
 0x1c2   : > { %v5564_v13 = vpack.c.bf16 %v2399_v12, %v2397_v11  ;;  %v2401_v18 = vld [vmem:[%s9351_s5 + $0x160] sm:$0xff]  ;;  %v2423_v11 = vld [vmem:[%s9351_s5 + $0x210] sm:$0xff] }
 0x1c3   : > { %5537 = vmatpush1.bf16.msra.mxu0 %v5536_v25  ;;  %v2412_v25 = vld [vmem:[%s9351_s5 + $0x1b8] sm:$0xff] }
 0x1c4   : > { %5495 = vmatpush1.bf16.msra.mxu1 %v5494_v22  ;;  %v4688_v22 = vld [vmem:[%s9349_s3 + $0xad0] sm:$0xff]  ;;  %5539 = vmatprep.subr.bf16.mxu0 %v5538_v26 }
 0x1c5   : > { %5497 = vmatprep.subr.bf16.mxu1 %v5496_v23  ;;  %v4695_v23 = vld [vmem:[%s9349_s3 + $0xb08] sm:$0xff]  ;;  %v5514_v19 = vpack.c.bf16 %v4688_v22, %v4682_v21  ;;  %v5570_v21 = vpack.c.bf16 %v2408_v24, %v2406_v3  ;;  %v2405_v22 = vld [vmem:[%s9351_s5 + $0x180] sm:$0xff] }
 0x1c6   : > { %v5516_v33 = vpack.c.bf16 %v4701_v15, %v4695_v23  ;;  %v2407_v23 = vld [vmem:[%s9351_s5 + $0x190] sm:$0xff]  ;;  %v2410_v15 = vld [vmem:[%s9351_s5 + $0x1a8] sm:$0xff] }
 0x1c7   : > { %v5572_v26 = vpack.c.bf16 %v2407_v23, %v2405_v22 }
 0x1c8   : > { %5499 = vmatpush1.bf16.msra.mxu1 %v5498_v48  ;;  %v2375_v48 = vld [vmem:[%s9351_s5 + $0x90] sm:$0xff] }
 0x1c9   : > { %5501 = vmatprep.subr.bf16.mxu1 %v5500_v29  ;;  %v2378_v29 = vld [vmem:[%s9351_s5 + $0xa8] sm:$0xff]  ;;  %v5540_v37 = vpack.c.bf16 %v2375_v48, %v2373_v28  ;;  %v5574_v28 = vpack.c.bf16 %v2412_v25, %v2410_v15  ;;  %v2409_v48 = vld [vmem:[%s9351_s5 + $0x1a0] sm:$0xff] }
 0x1ca   : > { %v5542_v30 = vpack.c.bf16 %v2380_v31, %v2378_v29  ;;  %v2414_v31 = vld [vmem:[%s9351_s5 + $0x1c8] sm:$0xff]  ;;  %v2425_v25 = vld [vmem:[%s9351_s5 + $0x220] sm:$0xff] }
 0x1cb   : > { %5541 = vmatpush1.bf16.msra.mxu0 %v5540_v37  ;;  %v2415_v37 = vld [vmem:[%s9351_s5 + $0x1d0] sm:$0xff] }
 0x1cc   : > { %5503 = vmatpush1.bf16.msra.mxu1 %v5502_v43  ;;  %v2384_v43 = vld [vmem:[%s9351_s5 + $0xd8] sm:$0xff]  ;;  %5543 = vmatprep.subr.bf16.mxu0 %v5542_v30  ;;  %v5580_v30 = vpack.c.bf16 %v2415_v37, %v2413_v54 }
 0x1cd   : > { %5505 = vmatprep.subr.bf16.mxu1 %v5504_v52  ;;  %v5546_v58 = vpack.c.bf16 %v2384_v43, %v2382_v36  ;;  %v2388_v52 = vld [vmem:[%s9351_s5 + $0xf8] sm:$0xff]  ;;  %v2417_v36 = vld [vmem:[%s9351_s5 + $0x1e0] sm:$0xff]  ;;  %v2419_v43 = vld [vmem:[%s9351_s5 + $0x1f0] sm:$0xff] }
 0x1ce   : > { %v5550_v56 = vpack.c.bf16 %v2388_v52, %v2386_v51 }
 0x1cf   : > { %5545 = vmatpush1.bf16.msra.mxu0 %v5544_v46  ;;  %v5584_v46 = vpack.c.bf16 %v2419_v43, %v2417_v36 }
 0x1d0   : > { %5507 = vmatpush1.bf16.msra.mxu1 %v5506_v5  ;;  %5547 = vmatprep.subr.bf16.mxu0 %v5546_v58  ;;  %v2422_v58 = vld [vmem:[%s9351_s5 + $0x208] sm:$0xff] }
 0x1d1   : > { %5509 = vmatprep.subr.bf16.mxu1 %v5508_v6  ;;  %v2400_v6 = vld [vmem:[%s9351_s5 + $0x158] sm:$0xff]  ;;  %v5586_v32 = vpack.c.bf16 %v2424_v49, %v2422_v58  ;;  %v2431_v58 = vld [vmem:[%s9351_s5 + $0x250] sm:$0xff] }
 0x1d2   : > { %v5562_v10 = vpack.c.bf16 %v2400_v6, %v2398_v47 }
 0x1d3   : > { %5549 = vmatpush1.bf16.msra.mxu0 %v5548_v53 }
 0x1d4   : > { %5511 = vmatpush1.bf16.msra.mxu1 %v5510_v20  ;;  %5551 = vmatprep.subr.bf16.mxu0 %v5550_v56  ;;  %v2403_v20 = vld [vmem:[%s9351_s5 + $0x170] sm:$0xff] }
 0x1d5   : > { %5513 = vmatprep.subr.bf16.mxu1 %v5512_v17  ;;  %v5568_v17 = vpack.c.bf16 %v2403_v20, %v2401_v18  ;;  %v2299_v18 = vsub.s32 7, %v6748_v60 }
 0x1d7   : > { %5553 = vmatpush1.bf16.msra.mxu0 %v5552_v61 }
 0x1d8   : > { %5515 = vmatpush1.bf16.msra.mxu1 %v5514_v19  ;;  %v2411_v19 = vld [vmem:[%s9351_s5 + $0x1b0] sm:$0xff] }
 0x1d9   : > { %5518 = vmatprep.subr.msk.bf16.mxu1 %vm6360_vm2, %v5516_v33  ;;  %v5576_v29 = vpack.c.bf16 %v2411_v19, %v2409_v48  ;;  %v2416_v33 = vld [vmem:[%s9351_s5 + $0x1d8] sm:$0xff] }
 0x1da   : > { %v5578_v34 = vpack.c.bf16 %v2416_v33, %v2414_v31  ;;  %v2430_v31 = vld [vmem:[%s9351_s5 + $0x248] sm:$0xff]  ;;  %v2432_v33 = vld [vmem:[%s9351_s5 + $0x258] sm:$0xff] }
 0x1db   : > { %v5594_v43 = vpack.c.bf16 %v2432_v33, %v2430_v31 }
 0x1dc   : > { %5521 = vmatpush1.bf16.msk.msra.mxu1 %vm6360_vm2, %v5519_v42  ;;  %v5582_v42 = vpack.c.bf16 %v2420_v41, %v2418_v38 }
 0x1df   : > { %2155 = vmatmul.mubr.f32.vlgmr.msra.gmra.mrb[14].mxu1 %v7387_v35  ;;  %v2392_v35 = vld [vmem:[%s9351_s5 + $0x118] sm:$0xff] }
 0x1e0   : > { %4715 = vmatprep.mubr.msk.f32.mxu1 %vm552_vm3, %v7403_v40  ;;  %v5554_v63 = vpack.c.bf16 %v2392_v35, %v2390_v59  ;;  %v2391_v40 = vld [vmem:[%s9351_s5 + $0x110] sm:$0xff]  ;;  %v8005_v59 = vld [vmem:[%s9350_s4] sm:$0xff] }
 0x1e1   : > { %v5556_v39 = vpack.c.bf16 %v2391_v40, %v2389_v0  ;;  %v2216_v35 = vrot.slane %v8005_v59, %v6757_v1  ;;  %v2220_v61 = vrot.slane %v8005_v59, %v6751_v62  ;;  %v2288_v40 = vrot.slane %v8005_v59, %v6765_v8 }
 0x1e2   : > { %5555 = vmatprep.subr.bf16.mxu0 %v5554_v63  ;;  %v2292_v63 = vrot.slane %v8005_v59, %v6761_v4 }
 0x1e3   : > { %2161 = vmatmul.mubr.f32.gmra.mrb[16].mxu1 %v7415_v27  ;;  %v2396_v27 = vld [vmem:[%s9351_s5 + $0x138] sm:$0xff]  ;;  %5557 = vmatpush1.bf16.msra.mxu0 %v5556_v39  ;;  %v2246_v0 = vrot.slane %v2216_v35, %v6757_v1  ;;  %v2250_v39 = vrot.slane %v2220_v61, %v6757_v1  ;;  %v2434_v35 = vld [vmem:[%s9351_s5 + $0x268] sm:$0xff] }
 0x1e4   : > { %4716 = vmatprep.mubr.msk.f32.mxu1 %vm552_vm3, %v7428_v50  ;;  %v5558_v5 = vpack.c.bf16 %v2396_v27, %v2394_v2  ;;  %v2395_v50 = vld [vmem:[%s9351_s5 + $0x130] sm:$0xff]  ;;  %v2227_v2 = vsub.s32 6, %v6748_v60  ;;  %v2322_v47 = vrot.slane %v2292_v63, %v6765_v8  ;;  %v2436_v61 = vld [vmem:[%s9351_s5 + $0x278] sm:$0xff] }
 0x1e6   : > { %5559 = vmatprep.subr.bf16.mxu0 %v5558_v5  ;;  %v2228_v12 = vrot.slane %v8005_v59, %v2227_v2  ;;  %v5598_v2 = vpack.c.bf16 %v2436_v61, %v2434_v35  ;;  %v2808_v61 = vld [vmem:[%s9352_s6 + $0x50] sm:$0xff] }
 0x1e7   : > { %2167 = vmatmul.mubr.f32.gmra.mrb[18].mxu1 %v7440_v55  ;;  %v5560_v55 = vpack.c.bf16 %v2395_v50, %v2393_v44 }
 0x1e8   : > { %v8041_v48 = vrot.slane %v2228_v12, %v6757_v1  ;;  %v2801_v12 = vld [vmem:[%s9352_s6 + $0x18] sm:$0xff] }
 0x1e9   : > { %5561 = vmatpush1.bf16.msra.mxu0 %v5560_v55  ;;  %v2318_v55 = vrot.slane %v2288_v40, %v6765_v8 }
 0x1ea   : > { %5563 = vmatprep.subr.bf16.mxu0 %v5562_v10  ;;  %v2421_v10 = vld [vmem:[%s9351_s5 + $0x200] sm:$0xff] }
 0x1ed   : > { %5565 = vmatpush1.bf16.msra.mxu0 %v5564_v13  ;;  %v2426_v13 = vld [vmem:[%s9351_s5 + $0x228] sm:$0xff] }
 0x1ee   : > { %5567 = vmatprep.subr.bf16.mxu0 %v5566_v16  ;;  %v2428_v16 = vld [vmem:[%s9351_s5 + $0x238] sm:$0xff] }
 0x1ef   : > { %v5590_v15 = vpack.c.bf16 %v2428_v16, %v2426_v13  ;;  %v2439_v13 = vld [vmem:[%s9351_s5 + $0x290] sm:$0xff]  ;;  %v6203_v16 = vmov 0.0|0.0  }
 0x1f0   : > { %5714 = vmatprep.subr.bf16.mxu1 %v6203_v16 }
 0x1f1   : > { %5569 = vmatpush1.bf16.msra.mxu0 %v5568_v17 }
 0x1f2   : > { %5571 = vmatprep.subr.bf16.mxu0 %v5570_v21  ;;  %v5588_v21 = vpack.c.bf16 %v2423_v11, %v2421_v10 }
 0x1f5   : > { %5573 = vmatpush1.bf16.msra.mxu0 %v5572_v26  ;;  %v2427_v26 = vld [vmem:[%s9351_s5 + $0x230] sm:$0xff] }
 0x1f6   : > { %5575 = vmatprep.subr.bf16.mxu0 %v5574_v28  ;;  %v5592_v41 = vpack.c.bf16 %v2427_v26, %v2425_v25  ;;  %v2446_v25 = vld [vmem:[%s9351_s5 + $0x2c8] sm:$0xff]  ;;  %v2448_v26 = vld [vmem:[%s9351_s5 + $0x2d8] sm:$0xff] }
 0x1f7   : > { %v5610_v33 = vpack.c.bf16 %v2448_v26, %v2446_v25  ;;  %v2468_v25 = vld [vmem:[%s9351_s5 + $0x378] sm:$0xff] }
 0x1f9   : > { %5577 = vmatpush1.bf16.msra.mxu0 %v5576_v29 }
 0x1fa   : > { %5579 = vmatprep.subr.bf16.mxu0 %v5578_v34  ;;  %v2300_v34 = vrot.slane %v8005_v59, %v2299_v18  ;;  %v2442_v18 = vld [vmem:[%s9351_s5 + $0x2a8] sm:$0xff] }
 0x1fd   : > { %5581 = vmatpush1.bf16.msra.mxu0 %v5580_v30 }
 0x1fe   : > { %5583 = vmatprep.subr.bf16.mxu0 %v5582_v42 }
 0x201   : > { %5585 = vmatpush1.bf16.msra.mxu0 %v5584_v46  ;;  %v2429_v46 = vld [vmem:[%s9351_s5 + $0x240] sm:$0xff] }
 0x202   : > { %5587 = vmatprep.subr.bf16.mxu0 %v5586_v32 }
 0x23a   : > { %v7992_v51 = vpop.f32.mrb[8].mxu0 }
 0x23b   : > { %v2075_v52 = vpop.f32.mrb[9].mxu0 }
 0x23c   : > { %v2196_v28 = vmax.f32 %v2075_v52, 0.0  ;;  %v8058_v52 = vrot.slane %v2300_v34, %v6765_v8  ;;  %v2445_v34 = vld [vmem:[%s9351_s5 + $0x2c0] sm:$0xff] }
 0x23e   : > { %v7994_v53 = vpop.f32.mrb[10].mxu0  ;;  %v2270_v49 = vmul.f32 %v8041_v48, %v2196_v28 }
 0x23f   : > { %v7996_v56 = vpop.f32.mrb[11].mxu0 }
 0x242   : > { %v7998_v57 = vpop.f32.mrb[12].mxu0 }
 0x243   : > { %v8000_v9 = vpop.f32.mrb[13].mxu0 }
 0x28a   : > { %v1990_v27 = vpop.f32.mrb[8].mxu1 }
 0x28b   : > { %v2193_v5 = vmax.f32 %v1990_v27, 0.0  ;;  %v1992_v44 = vpop.f32.mrb[9].mxu1  ;;  %v2433_v27 = vld [vmem:[%s9351_s5 + $0x260] sm:$0xff] }
 0x28c   : > { %v2194_v50 = vmax.f32 %v1992_v44, 0.0  ;;  %v2438_v44 = vld [vmem:[%s9351_s5 + $0x288] sm:$0xff] }
 0x28d   : > { %v2267_v6 = vmul.f32 %v2246_v0, %v2193_v5  ;;  %v2342_v5 = vadd.f32 %v8058_v52, %v2270_v49  ;;  %v2454_v49 = vld [vmem:[%s9351_s5 + $0x308] sm:$0xff] }
 0x28e   : > { %v2268_v45 = vmul.f32 %v2250_v39, %v2194_v50  ;;  %v1996_v14 = vpop.f32.mrb[10].mxu1  ;;  %v2440_v50 = vld [vmem:[%s9351_s5 + $0x298] sm:$0xff] }
 0x28f   : > { %v2199_v20 = vmax.f32 %v1996_v14, 0.0  ;;  %v1998_v3 = vpop.f32.mrb[11].mxu1  ;;  %v2339_v22 = vadd.f32 %v2318_v55, %v2267_v6  ;;  %v2799_v6 = vld [vmem:[%s9352_s6 + $0x8] sm:$0xff]  ;;  %v2437_v14 = vld [vmem:[%s9351_s5 + $0x280] sm:$0xff] }
 0x290   : > { %v2200_v24 = vmax.f32 %v1998_v3, 0.0  ;;  %v2340_v17 = vadd.f32 %v2322_v47, %v2268_v45  ;;  %v5602_v45 = vpack.c.bf16 %v2440_v50, %v2438_v44  ;;  %v2810_v50 = vld [vmem:[%s9352_s6 + $0x60] sm:$0xff] }
 0x291   : > { %v2273_v23 = vmul.f32 %v2246_v0, %v2199_v20  ;;  %v2444_v20 = vld [vmem:[%s9351_s5 + $0x2b8] sm:$0xff] }
 0x292   : > { %v2274_v19 = vmul.f32 %v2250_v39, %v2200_v24  ;;  %v2002_v29 = vpop.f32.mrb[12].mxu1  ;;  %2613 = vmatprep.mubr.f32.mxu0 %v2340_v17  ;;  %v2802_v24 = vld [vmem:[%s9352_s6 + $0x20] sm:$0xff]  ;;  %v2803_v17 = vld [vmem:[%s9352_s6 + $0x28] sm:$0xff] }
 0x293   : > { %v2205_v54 = vmax.f32 %v2002_v29, 0.0  ;;  %v2004_v37 = vpop.f32.mrb[13].mxu1  ;;  %2614 = vmatmul.mubr.f32.vlgmr.msra.gmra.mrb[14].mxu0 %v2339_v22  ;;  %v2345_v36 = vadd.f32 %v2318_v55, %v2273_v23  ;;  %v5606_v22 = vpack.c.bf16 %v2444_v20, %v2442_v18  ;;  %v2441_v23 = vld [vmem:[%s9351_s5 + $0x2a0] sm:$0xff]  ;;  %v5721_v28 = vpack.c.bf16 %v2803_v17, %v2802_v24  ;;  %v2805_v29 = vld [vmem:[%s9352_s6 + $0x38] sm:$0xff]  ;;  %v2812_v20 = vld [vmem:[%s9352_s6 + $0x70] sm:$0xff] }
 0x294   : > { %v2206_v30 = vmax.f32 %v2004_v37, 0.0  ;;  %5589 = vmatpush1.bf16.msra.mxu0 %v5588_v21  ;;  %v2346_v38 = vadd.f32 %v2322_v47, %v2274_v19  ;;  %v5604_v21 = vpack.c.bf16 %v2439_v13, %v2437_v14  ;;  %v2804_v19 = vld [vmem:[%s9352_s6 + $0x30] sm:$0xff]  ;;  %v2450_v37 = vld [vmem:[%s9351_s5 + $0x2e8] sm:$0xff]  ;;  %v2464_v14 = vld [vmem:[%s9351_s5 + $0x358] sm:$0xff] }
 0x295   : > { %v2279_v42 = vmul.f32 %v2246_v0, %v2205_v54  ;;  %5591 = vmatprep.subr.bf16.mxu0 %v5590_v15  ;;  %v5596_v0 = vpack.c.bf16 %v2431_v58, %v2429_v46  ;;  %v2443_v15 = vld [vmem:[%s9351_s5 + $0x2b0] sm:$0xff]  ;;  %v2449_v46 = vld [vmem:[%s9351_s5 + $0x2e0] sm:$0xff] }
 0x296   : > { %v2280_v32 = vmul.f32 %v2250_v39, %v2206_v30  ;;  %2619 = vmatprep.mubr.f32.mxu0 %v2346_v38  ;;  %v2435_v39 = vld [vmem:[%s9351_s5 + $0x270] sm:$0xff]  ;;  %v5608_v31 = vpack.c.bf16 %v2443_v15, %v2441_v23  ;;  %v2452_v30 = vld [vmem:[%s9351_s5 + $0x2f8] sm:$0xff]  ;;  %v5724_v38 = vpack.c.bf16 %v2805_v29, %v2804_v19  ;;  %v2466_v15 = vld [vmem:[%s9351_s5 + $0x368] sm:$0xff] }
 0x297   : > { %2620 = vmatmul.mubr.f32.gmra.mrb[16].mxu0 %v2345_v36  ;;  %v2351_v40 = vadd.f32 %v2318_v55, %v2279_v42  ;;  %v2800_v55 = vld [vmem:[%s9352_s6 + $0x10] sm:$0xff]  ;;  %v5600_v10 = vpack.c.bf16 %v2435_v39, %v2433_v27  ;;  %v2807_v42 = vld [vmem:[%s9352_s6 + $0x48] sm:$0xff]  ;;  %v2814_v19 = vld [vmem:[%s9352_s6 + $0x80] sm:$0xff] }
 0x298   : > { %5593 = vmatpush1.bf16.msra.mxu0 %v5592_v41  ;;  %v2352_v63 = vadd.f32 %v2322_v47, %v2280_v32  ;;  %v2798_v47 = vld [vmem:[%s9352_s6] sm:$0xff]  ;;  %v5718_v3 = vpack.c.bf16 %v2801_v12, %v2800_v55  ;;  %v2447_v54 = vld [vmem:[%s9351_s5 + $0x2d0] sm:$0xff]  ;;  %v2456_v32 = vld [vmem:[%s9351_s5 + $0x318] sm:$0xff] }
 0x299   : > { %5595 = vmatprep.subr.bf16.mxu0 %v5594_v43  ;;  %v5715_v11 = vpack.c.bf16 %v2799_v6, %v2798_v47  ;;  %v2806_v41 = vld [vmem:[%s9352_s6 + $0x40] sm:$0xff]  ;;  %v5612_v36 = vpack.c.bf16 %v2447_v54, %v2445_v34  ;;  %v5614_v43 = vpack.c.bf16 %v2452_v30, %v2450_v37  ;;  %v2451_v58 = vld [vmem:[%s9351_s5 + $0x2f0] sm:$0xff]  ;;  %v2458_v39 = vld [vmem:[%s9351_s5 + $0x328] sm:$0xff] }
 0x29a   : > { %2625 = vmatprep.mubr.f32.mxu0 %v2352_v63  ;;  %v5727_v35 = vpack.c.bf16 %v2807_v42, %v2806_v41  ;;  %v2809_v63 = vld [vmem:[%s9352_s6 + $0x58] sm:$0xff]  ;;  %v2455_v27 = vld [vmem:[%s9351_s5 + $0x310] sm:$0xff]  ;;  %v2811_v47 = vld [vmem:[%s9352_s6 + $0x68] sm:$0xff] }
 0x29b   : > { %2626 = vmatmul.mubr.f32.gmra.mrb[18].mxu0 %v2351_v40  ;;  %5716 = vmatpush1.bf16.msra.mxu1 %v5715_v11  ;;  %v5618_v40 = vpack.c.bf16 %v2456_v32, %v2454_v49  ;;  %v5730_v44 = vpack.c.bf16 %v2809_v63, %v2808_v61  ;;  %v2459_v11 = vld [vmem:[%s9351_s5 + $0x330] sm:$0xff]  ;;  %v5733_v13 = vpack.c.bf16 %v2811_v47, %v2810_v50  ;;  %v2815_v29 = vld [vmem:[%s9352_s6 + $0x88] sm:$0xff]  ;;  %v2465_v34 = vld [vmem:[%s9351_s5 + $0x360] sm:$0xff]  ;;  %v2223_v61 = vsub.s32 4, %v6748_v60 }
 0x29c   : > { %5597 = vmatpush1.bf16.msra.mxu0 %v5596_v0  ;;  %2696 = vmatprep.mubr.f32.mxu0 %v2342_v5  ;;  %v5616_v0 = vpack.c.bf16 %v2451_v58, %v2449_v46  ;;  %v2460_v5 = vld [vmem:[%s9351_s5 + $0x338] sm:$0xff]  ;;  %v2467_v54 = vld [vmem:[%s9351_s5 + $0x370] sm:$0xff]  ;;  %v2470_v30 = vld [vmem:[%s9351_s5 + $0x388] sm:$0xff]  ;;  %v5739_v41 = vpack.c.bf16 %v2815_v29, %v2814_v19 }
 0x29d   : > { %5599 = vmatprep.subr.bf16.mxu0 %v5598_v2  ;;  %5717 = vmatprep.subr.bf16.mxu1 %v6203_v16  ;;  %v2453_v2 = vld [vmem:[%s9351_s5 + $0x300] sm:$0xff]  ;;  %v5622_v55 = vpack.c.bf16 %v2460_v5, %v2458_v39  ;;  %v2471_v58 = vld [vmem:[%s9351_s5 + $0x390] sm:$0xff]  ;;  %v2474_v49 = vld [vmem:[%s9351_s5 + $0x3a8] sm:$0xff]  ;;  %v2224_v5 = vrot.slane %v8005_v59, %v2223_v61 }
 0x29e   : > { %v5620_v6 = vpack.c.bf16 %v2455_v27, %v2453_v2  ;;  %v2469_v46 = vld [vmem:[%s9351_s5 + $0x380] sm:$0xff]  ;;  %v2476_v32 = vld [vmem:[%s9351_s5 + $0x3b8] sm:$0xff]  ;;  %v2478_v2 = vld [vmem:[%s9351_s5 + $0x3c8] sm:$0xff] }
 0x29f   : > { %5719 = vmatpush1.bf16.msra.mxu1 %v5718_v3  ;;  %v2813_v3 = vld [vmem:[%s9352_s6 + $0x78] sm:$0xff]  ;;  %v5638_v63 = vpack.c.bf16 %v2476_v32, %v2474_v49  ;;  %v2477_v47 = vld [vmem:[%s9351_s5 + $0x3c0] sm:$0xff]  ;;  %v2487_v29 = vld [vmem:[%s9351_s5 + $0x410] sm:$0xff] }
 0x2a0   : > { %5601 = vmatpush1.bf16.msra.mxu0 %v5600_v10  ;;  %5720 = vmatprep.subr.bf16.mxu1 %v6203_v16  ;;  %v2457_v10 = vld [vmem:[%s9351_s5 + $0x320] sm:$0xff]  ;;  %v5736_v26 = vpack.c.bf16 %v2813_v3, %v2812_v20  ;;  %v2480_v27 = vld [vmem:[%s9351_s5 + $0x3d8] sm:$0xff] }
 0x2a1   : > { %5603 = vmatprep.subr.bf16.mxu0 %v5602_v45  ;;  %v2462_v45 = vld [vmem:[%s9351_s5 + $0x348] sm:$0xff]  ;;  %v5624_v24 = vpack.c.bf16 %v2459_v11, %v2457_v10  ;;  %v5642_v50 = vpack.c.bf16 %v2480_v27, %v2478_v2  ;;  %v2484_v10 = vld [vmem:[%s9351_s5 + $0x3f8] sm:$0xff]  ;;  %v2195_v11 = vmax.f32 %v7992_v51, 0.0  ;;  %v2481_v3 = vld [vmem:[%s9351_s5 + $0x3e0] sm:$0xff]  ;;  %v2202_v51 = vmax.f32 %v7996_v56, 0.0 }
 0x2a2   : > { %v5626_v17 = vpack.c.bf16 %v2464_v14, %v2462_v45  ;;  %v2254_v45 = vrot.slane %v2224_v5, %v6757_v1  ;;  %v2485_v19 = vld [vmem:[%s9351_s5 + $0x400] sm:$0xff]  ;;  %v2495_v2 = vld [vmem:[%s9351_s5 + $0x450] sm:$0xff] }
 0x2a3   : > { %5722 = vmatpush1.bf16.msra.mxu1 %v5721_v28 }
 0x2a4   : > { %5605 = vmatpush1.bf16.msra.mxu0 %v5604_v21  ;;  %5723 = vmatprep.subr.bf16.mxu1 %v6203_v16  ;;  %v2461_v21 = vld [vmem:[%s9351_s5 + $0x340] sm:$0xff] }
 0x2a5   : > { %5607 = vmatprep.subr.bf16.mxu0 %v5606_v22  ;;  %v2463_v22 = vld [vmem:[%s9351_s5 + $0x350] sm:$0xff] }
 0x2a7   : > { %5725 = vmatpush1.bf16.msra.mxu1 %v5724_v38  ;;  %v2472_v38 = vld [vmem:[%s9351_s5 + $0x398] sm:$0xff] }
 0x2a8   : > { %5609 = vmatpush1.bf16.msra.mxu0 %v5608_v31  ;;  %5726 = vmatprep.subr.bf16.mxu1 %v6203_v16  ;;  %v5628_v31 = vpack.c.bf16 %v2463_v22, %v2461_v21 }
 0x2a9   : > { %5611 = vmatprep.subr.bf16.mxu0 %v5610_v33  ;;  %v5630_v33 = vpack.c.bf16 %v2468_v25, %v2466_v15  ;;  %v2269_v15 = vmul.f32 %v2254_v45, %v2195_v11  ;;  %v2502_v11 = vld [vmem:[%s9351_s5 + $0x488] sm:$0xff] }
 0x2ab   : > { %5728 = vmatpush1.bf16.msra.mxu1 %v5727_v35  ;;  %v5636_v35 = vpack.c.bf16 %v2471_v58, %v2469_v46  ;;  %v2491_v46 = vld [vmem:[%s9351_s5 + $0x430] sm:$0xff] }
 0x2ac   : > { %5613 = vmatpush1.bf16.msra.mxu0 %v5612_v36  ;;  %5729 = vmatprep.subr.bf16.mxu1 %v6203_v16  ;;  %v5632_v36 = vpack.c.bf16 %v2467_v54, %v2465_v34  ;;  %v2490_v34 = vld [vmem:[%s9351_s5 + $0x428] sm:$0xff] }
 0x2ad   : > { %5615 = vmatprep.subr.bf16.mxu0 %v5614_v43  ;;  %v5634_v43 = vpack.c.bf16 %v2472_v38, %v2470_v30  ;;  %v5652_v30 = vpack.c.bf16 %v2487_v29, %v2485_v19  ;;  %v2509_v29 = vld [vmem:[%s9351_s5 + $0x4c0] sm:$0xff] }
 0x2af   : > { %5731 = vmatpush1.bf16.msra.mxu1 %v5730_v44  ;;  %v2295_v44 = vsub.s32 5, %v6748_v60 }
 0x2b0   : > { %5617 = vmatpush1.bf16.msra.mxu0 %v5616_v0  ;;  %5732 = vmatprep.subr.bf16.mxu1 %v6203_v16  ;;  %v2473_v0 = vld [vmem:[%s9351_s5 + $0x3a0] sm:$0xff] }
 0x2b1   : > { %5619 = vmatprep.subr.bf16.mxu0 %v5618_v40  ;;  %v2475_v40 = vld [vmem:[%s9351_s5 + $0x3b0] sm:$0xff]  ;;  %v2296_v14 = vrot.slane %v8005_v59, %v2295_v44  ;;  %v2486_v59 = vld [vmem:[%s9351_s5 + $0x408] sm:$0xff] }
 0x2b2   : > { %v8193_v12 = vpop.f32.mrb[14].mxu1  ;;  %v5640_v39 = vpack.c.bf16 %v2475_v40, %v2473_v0  ;;  %v2493_v40 = vld [vmem:[%s9351_s5 + $0x440] sm:$0xff]  ;;  %v2498_v44 = vld [vmem:[%s9351_s5 + $0x468] sm:$0xff] }
 0x2b3   : > { %v8201_v18 = vpop.f32.mrb[15].mxu1  ;;  %5734 = vmatpush1.bf16.msra.mxu1 %v5733_v13  ;;  %v8296_v13 = vld [vmem:[%s9350_s4 + $0x8] sm:$0xf]  ;;  %v2326_v25 = vrot.slane %v2296_v14, %v6765_v8 }
 0x2b4   : > { %5621 = vmatpush1.bf16.msra.mxu0 %v5620_v6  ;;  %5735 = vmatprep.subr.bf16.mxu1 %v6203_v16  ;;  %v2479_v6 = vld [vmem:[%s9351_s5 + $0x3d0] sm:$0xff]  ;;  %v2236_v21 = vrot.slane %v8296_v13, %v6751_v62  ;;  %v2198_v49 = vmax.f32 %v8201_v18, 0.0  ;;  %v2308_v61 = vrot.slane %v8296_v13, %v6761_v4 }
 0x2b5   : > { %5623 = vmatprep.subr.bf16.mxu0 %v5622_v55  ;;  %v2482_v55 = vld [vmem:[%s9351_s5 + $0x3e8] sm:$0xff]  ;;  %v5644_v60 = vpack.c.bf16 %v2479_v6, %v2477_v47  ;;  %v2341_v38 = vadd.f32 %v2326_v25, %v2269_v15  ;;  %v5660_v47 = vpack.c.bf16 %v2495_v2, %v2493_v40  ;;  %v2507_v15 = vld [vmem:[%s9351_s5 + $0x4b0] sm:$0xff] }
 0x2b6   : > { %v8216_v23 = vpop.f32.mrb[16].mxu1  ;;  %v5646_v20 = vpack.c.bf16 %v2484_v10, %v2482_v55  ;;  %v8330_v54 = vrot.slane %v2236_v21, %v6757_v1  ;;  %v8359_v5 = vrot.slane %v2308_v61, %v6765_v8  ;;  %v2499_v10 = vld [vmem:[%s9351_s5 + $0x470] sm:$0xff] }
 0x2b7   : > { %v8224_v28 = vpop.f32.mrb[17].mxu1  ;;  %5737 = vmatpush1.bf16.msra.mxu1 %v5736_v26  ;;  %v2201_v26 = vmax.f32 %v7994_v53, 0.0  ;;  %v2492_v53 = vld [vmem:[%s9351_s5 + $0x438] sm:$0xff] }
 0x2b8   : > { %5625 = vmatpush1.bf16.msra.mxu0 %v5624_v24  ;;  %5738 = vmatprep.subr.bf16.mxu1 %v6203_v16  ;;  %v2483_v24 = vld [vmem:[%s9351_s5 + $0x3f0] sm:$0xff]  ;;  %v2272_v27 = vmul.f32 %v8330_v54, %v2198_v49 }
 0x2b9   : > { %5627 = vmatprep.subr.bf16.mxu0 %v5626_v17  ;;  %v2488_v17 = vld [vmem:[%s9351_s5 + $0x418] sm:$0xff]  ;;  %v5648_v22 = vpack.c.bf16 %v2483_v24, %v2481_v3  ;;  %v2501_v3 = vld [vmem:[%s9351_s5 + $0x480] sm:$0xff]  ;;  %v2503_v24 = vld [vmem:[%s9351_s5 + $0x490] sm:$0xff] }
 0x2ba   : > { %v8239_v37 = vpop.f32.mrb[18].mxu1  ;;  %v5650_v56 = vpack.c.bf16 %v2488_v17, %v2486_v59  ;;  %v2508_v59 = vld [vmem:[%s9351_s5 + $0x4b8] sm:$0xff]  ;;  %v5668_v17 = vpack.c.bf16 %v2503_v24, %v2501_v3  ;;  %v2519_v49 = vld [vmem:[%s9351_s5 + $0x510] sm:$0xff]  ;;  %v2538_v3 = vld [vmem:[%s9351_s5 + $0x5a8] sm:$0xff] }
 0x2bb   : > { %v8247_v42 = vpop.f32.mrb[19].mxu1  ;;  %5740 = vmatpush1.bf16.msra.mxu1 %v5739_v41  ;;  %v2275_v41 = vmul.f32 %v2254_v45, %v2201_v26  ;;  %v2512_v26 = vld [vmem:[%s9351_s5 + $0x4d8] sm:$0xff] }
 0x2bc   : > { %5629 = vmatpush1.bf16.msra.mxu0 %v5628_v31  ;;  %5741 = vmatprep.subr.bf16.mxu1 %v6203_v16  ;;  %v2276_v31 = vmul.f32 %v8041_v48, %v2202_v51  ;;  %v2506_v51 = vld [vmem:[%s9351_s5 + $0x4a8] sm:$0xff]  ;;  %v2540_v24 = vld [vmem:[%s9351_s5 + $0x5b8] sm:$0xff] }
 0x2bd   : > { %5631 = vmatprep.subr.bf16.mxu0 %v5630_v33  ;;  %v2208_v33 = vmax.f32 %v8000_v9, 0.0  ;;  %v2489_v9 = vld [vmem:[%s9351_s5 + $0x420] sm:$0xff]  ;;  %v2347_v0 = vadd.f32 %v2326_v25, %v2275_v41  ;;  %v5670_v21 = vpack.c.bf16 %v2508_v59, %v2506_v51  ;;  %v2515_v41 = vld [vmem:[%s9351_s5 + $0x4f0] sm:$0xff]  ;;  %v5702_v59 = vpack.c.bf16 %v2540_v24, %v2538_v3 }
 0x2be   : > { %v2348_v32 = vadd.f32 %v8058_v52, %v2276_v31  ;;  %v2511_v31 = vld [vmem:[%s9351_s5 + $0x4d0] sm:$0xff]  ;;  %v4730_v24 = vld [vmem:[%s9352_s6 + $0xe0] sm:$0xff] }
 0x2bf   : > { %v2282_v58 = vmul.f32 %v8041_v48, %v2208_v33  ;;  %v2514_v33 = vld [vmem:[%s9351_s5 + $0x4e8] sm:$0xff] }
 0x2c0   : > { %5633 = vmatpush1.bf16.msra.mxu0 %v5632_v36  ;;  %v2207_v36 = vmax.f32 %v7998_v57, 0.0  ;;  %v2494_v57 = vld [vmem:[%s9351_s5 + $0x448] sm:$0xff] }
 0x2c1   : > { %5635 = vmatprep.subr.bf16.mxu0 %v5634_v43  ;;  %v5654_v43 = vpack.c.bf16 %v2492_v53, %v2490_v34  ;;  %v2516_v34 = vld [vmem:[%s9351_s5 + $0x4f8] sm:$0xff]  ;;  %v5676_v53 = vpack.c.bf16 %v2511_v31, %v2509_v29  ;;  %v2543_v29 = vld [vmem:[%s9351_s5 + $0x5d0] sm:$0xff]  ;;  %v2546_v31 = vld [vmem:[%s9351_s5 + $0x5e8] sm:$0xff] }
 0x2c2   : > { %v2281_v48 = vmul.f32 %v2254_v45, %v2207_v36  ;;  %v2504_v45 = vld [vmem:[%s9351_s5 + $0x498] sm:$0xff]  ;;  %v2518_v36 = vld [vmem:[%s9351_s5 + $0x508] sm:$0xff] }
 0x2c4   : > { %5637 = vmatpush1.bf16.msra.mxu0 %v5636_v35  ;;  %v2496_v35 = vld [vmem:[%s9351_s5 + $0x458] sm:$0xff]  ;;  %v2353_v6 = vadd.f32 %v2326_v25, %v2281_v48  ;;  %v2510_v25 = vld [vmem:[%s9351_s5 + $0x4c8] sm:$0xff]  ;;  %v2523_v48 = vld [vmem:[%s9351_s5 + $0x530] sm:$0xff] }
 0x2c5   : > { %5639 = vmatprep.subr.bf16.mxu0 %v5638_v63  ;;  %v5656_v63 = vpack.c.bf16 %v2491_v46, %v2489_v9  ;;  %v5658_v18 = vpack.c.bf16 %v2496_v35, %v2494_v57  ;;  %v5674_v19 = vpack.c.bf16 %v2512_v26, %v2510_v25  ;;  %v2524_v57 = vld [vmem:[%s9351_s5 + $0x538] sm:$0xff]  ;;  %v2232_v26 = vrot.slane %v8296_v13, %v6757_v1 }
 0x2c8   : > { %5641 = vmatpush1.bf16.msra.mxu0 %v5640_v39  ;;  %v2354_v39 = vadd.f32 %v8058_v52, %v2282_v58  ;;  %v2497_v52 = vld [vmem:[%s9351_s5 + $0x460] sm:$0xff] }
 0x2c9   : > { %5643 = vmatprep.subr.bf16.mxu0 %v5642_v50  ;;  %v2500_v50 = vld [vmem:[%s9351_s5 + $0x478] sm:$0xff]  ;;  %v5664_v14 = vpack.c.bf16 %v2499_v10, %v2497_v52  ;;  %v2517_v58 = vld [vmem:[%s9351_s5 + $0x500] sm:$0xff]  ;;  %v2531_v52 = vld [vmem:[%s9351_s5 + $0x570] sm:$0xff] }
 0x2ca   : > { %v5662_v55 = vpack.c.bf16 %v2500_v50, %v2498_v44  ;;  %v5684_v35 = vpack.c.bf16 %v2519_v49, %v2517_v58  ;;  %v2530_v44 = vld [vmem:[%s9351_s5 + $0x568] sm:$0xff]  ;;  %v2532_v50 = vld [vmem:[%s9351_s5 + $0x578] sm:$0xff]  ;;  %v2203_v49 = vmax.f32 %v8216_v23, 0.0 }
 0x2cb   : > { %v2534_v10 = vld [vmem:[%s9351_s5 + $0x588] sm:$0xff] }
 0x2cc   : > { %5645 = vmatpush1.bf16.msra.mxu0 %v5644_v60  ;;  %v2344_v60 = vadd.f32 %v8359_v5, %v2272_v27  ;;  %v2525_v27 = vld [vmem:[%s9351_s5 + $0x540] sm:$0xff] }
 0x2cd   : > { %5647 = vmatprep.subr.bf16.mxu0 %v5646_v20  ;;  %v5666_v20 = vpack.c.bf16 %v2504_v45, %v2502_v11 }
 0x2d0   : > { %5649 = vmatpush1.bf16.msra.mxu0 %v5648_v22  ;;  %v2505_v22 = vld [vmem:[%s9351_s5 + $0x4a0] sm:$0xff] }
 0x2d1   : > { %5651 = vmatprep.subr.bf16.mxu0 %v5650_v56  ;;  %v5672_v56 = vpack.c.bf16 %v2507_v15, %v2505_v22  ;;  %v2542_v22 = vld [vmem:[%s9351_s5 + $0x5c8] sm:$0xff]  ;;  %v2544_v15 = vld [vmem:[%s9351_s5 + $0x5d8] sm:$0xff] }
 0x2d3   : > { %2697 = vmatmul.mubr.f32.vlgmr.msra.gmra.mrb[14].mxu0 %v2341_v38  ;;  %v2513_v38 = vld [vmem:[%s9351_s5 + $0x4e0] sm:$0xff] }
 0x2d4   : > { %2702 = vmatprep.mubr.f32.mxu0 %v2348_v32  ;;  %5653 = vmatpush1.bf16.msra.mxu0 %v5652_v30  ;;  %v5678_v30 = vpack.c.bf16 %v2516_v34, %v2514_v33  ;;  %v5680_v9 = vpack.c.bf16 %v2515_v41, %v2513_v38  ;;  %v2522_v32 = vld [vmem:[%s9351_s5 + $0x528] sm:$0xff]  ;;  %v2548_v33 = vld [vmem:[%s9351_s5 + $0x5f8] sm:$0xff]  ;;  %v2304_v38 = vrot.slane %v8296_v13, %v6765_v8 }
 0x2d5   : > { %5655 = vmatprep.subr.bf16.mxu0 %v5654_v43  ;;  %v2520_v43 = vld [vmem:[%s9351_s5 + $0x518] sm:$0xff]  ;;  %v5686_v61 = vpack.c.bf16 %v2524_v57, %v2522_v32  ;;  %v5710_v41 = vpack.c.bf16 %v2548_v33, %v2546_v31  ;;  %v2210_v32 = vmax.f32 %v8247_v42, 0.0  ;;  %v3008_v31 = vld [vmem:[%s9353_s7] sm:$0xff] }
 0x2d6   : > { %v5682_v46 = vpack.c.bf16 %v2520_v43, %v2518_v36  ;;  %v2545_v36 = vld [vmem:[%s9351_s5 + $0x5e0] sm:$0xff]  ;;  %v2547_v43 = vld [vmem:[%s9351_s5 + $0x5f0] sm:$0xff]  ;;  %v2334_v58 = vrot.slane %v2304_v38, %v6765_v8 }
 0x2d7   : > { %2703 = vmatmul.mubr.f32.gmra.mrb[16].mxu0 %v2347_v0  ;;  %v2526_v0 = vld [vmem:[%s9351_s5 + $0x548] sm:$0xff] }
 0x2d8   : > { %2708 = vmatprep.mubr.f32.mxu0 %v2354_v39  ;;  %5657 = vmatpush1.bf16.msra.mxu0 %v5656_v63  ;;  %v2521_v63 = vld [vmem:[%s9351_s5 + $0x520] sm:$0xff]  ;;  %v2527_v39 = vld [vmem:[%s9351_s5 + $0x550] sm:$0xff] }
 0x2d9   : > { %5659 = vmatprep.subr.bf16.mxu0 %v5658_v18  ;;  %v2528_v18 = vld [vmem:[%s9351_s5 + $0x558] sm:$0xff]  ;;  %v5688_v40 = vpack.c.bf16 %v2523_v48, %v2521_v63 }
 0x2da   : > { %v5690_v2 = vpack.c.bf16 %v2528_v18, %v2526_v0 }
 0x2db   : > { %2709 = vmatmul.mubr.f32.gmra.mrb[18].mxu0 %v2353_v6  ;;  %v5694_v6 = vpack.c.bf16 %v2532_v50, %v2530_v44 }
 0x2dc   : > { %5661 = vmatpush1.bf16.msra.mxu0 %v5660_v47  ;;  %2779 = vmatprep.mubr.f32.mxu0 %v2344_v60  ;;  %v5692_v47 = vpack.c.bf16 %v2527_v39, %v2525_v27  ;;  %v2536_v60 = vld [vmem:[%s9351_s5 + $0x598] sm:$0xff]  ;;  %v4723_v27 = vld [vmem:[%s9352_s6 + $0xa8] sm:$0xff] }
 0x2dd   : > { %5663 = vmatprep.subr.bf16.mxu0 %v5662_v55  ;;  %v2529_v55 = vld [vmem:[%s9351_s5 + $0x560] sm:$0xff]  ;;  %v5698_v45 = vpack.c.bf16 %v2536_v60, %v2534_v10 }
 0x2de   : > { %v5696_v11 = vpack.c.bf16 %v2531_v52, %v2529_v55  ;;  %v4726_v60 = vld [vmem:[%s9352_s6 + $0xc0] sm:$0xff] }
 0x2e0   : > { %5665 = vmatpush1.bf16.msra.mxu0 %v5664_v14  ;;  %v2533_v14 = vld [vmem:[%s9351_s5 + $0x580] sm:$0xff] }
 0x2e1   : > { %5667 = vmatprep.subr.bf16.mxu0 %v5666_v20  ;;  %v2535_v20 = vld [vmem:[%s9351_s5 + $0x590] sm:$0xff] }
 0x2e2   : > { %v5700_v51 = vpack.c.bf16 %v2535_v20, %v2533_v14  ;;  %v4728_v14 = vld [vmem:[%s9352_s6 + $0xd0] sm:$0xff]  ;;  %v4729_v20 = vld [vmem:[%s9352_s6 + $0xd8] sm:$0xff] }
 0x2e3   : > { %v5754_v3 = vpack.c.bf16 %v4729_v20, %v4728_v14  ;;  %v4764_v20 = vld [vmem:[%s9354_s8 + $0x118] sm:$0xff] }
 0x2e4   : > { %5669 = vmatpush1.bf16.msra.mxu0 %v5668_v17  ;;  %v2537_v17 = vld [vmem:[%s9351_s5 + $0x5a0] sm:$0xff] }
 0x2e5   : > { %5671 = vmatprep.subr.bf16.mxu0 %v5670_v21  ;;  %v2539_v21 = vld [vmem:[%s9351_s5 + $0x5b0] sm:$0xff] }
 0x2e6   : > { %v5704_v25 = vpack.c.bf16 %v2539_v21, %v2537_v17  ;;  %v4732_v17 = vld [vmem:[%s9352_s6 + $0xf0] sm:$0xff]  ;;  %v4733_v21 = vld [vmem:[%s9352_s6 + $0xf8] sm:$0xff] }
 0x2e8   : > { %5673 = vmatpush1.bf16.msra.mxu0 %v5672_v56  ;;  %v5706_v56 = vpack.c.bf16 %v2544_v15, %v2542_v22  ;;  %v5760_v22 = vpack.c.bf16 %v4733_v21, %v4732_v17  ;;  %v4734_v15 = vld [vmem:[%s9352_s6 + $0x100] sm:$0xff]  ;;  %v4790_v21 = vld [vmem:[%s9356_s10 + $0xa8] sm:$0xff] }
 0x2e9   : > { %5675 = vmatprep.subr.bf16.mxu0 %v5674_v19  ;;  %v2541_v19 = vld [vmem:[%s9351_s5 + $0x5c0] sm:$0xff] }
 0x2ea   : > { %v5708_v34 = vpack.c.bf16 %v2543_v29, %v2541_v19  ;;  %v4737_v19 = vld [vmem:[%s9352_s6 + $0x118] sm:$0xff]  ;;  %v4789_v17 = vld [vmem:[%s9356_s10 + $0xa0] sm:$0xff] }
 0x2ec   : > { %5677 = vmatpush1.bf16.msra.mxu0 %v5676_v53  ;;  %v2197_v53 = vmax.f32 %v8193_v12, 0.0 }
 0x2ed   : > { %5679 = vmatprep.subr.bf16.mxu0 %v5678_v30  ;;  %v2262_v30 = vrot.slane %v2232_v26, %v6757_v1 }
 0x2ef   : > { %v2271_v12 = vmul.f32 %v2262_v30, %v2197_v53 }
 0x2f0   : > { %5681 = vmatpush1.bf16.msra.mxu0 %v5680_v9  ;;  %v2204_v9 = vmax.f32 %v8224_v28, 0.0  ;;  %v2284_v28 = vmul.f32 %v8330_v54, %v2210_v32 }
 0x2f1   : > { %5683 = vmatprep.subr.bf16.mxu0 %v5682_v46  ;;  %v5712_v46 = vpack.c.bf16 %v2547_v43, %v2545_v36  ;;  %v2343_v57 = vadd.f32 %v2334_v58, %v2271_v12 }
 0x2f2   : > { %v2278_v13 = vmul.f32 %v8330_v54, %v2204_v9  ;;  %v2356_v0 = vadd.f32 %v8359_v5, %v2284_v28  ;;  %v4721_v54 = vld [vmem:[%s9352_s6 + $0x98] sm:$0xff] }
 0x2f3   : > { %v4748_v28 = vld [vmem:[%s9354_s8 + $0x98] sm:$0xff] }
 0x2f4   : > { %5685 = vmatpush1.bf16.msra.mxu0 %v5684_v35  ;;  %v2277_v35 = vmul.f32 %v2262_v30, %v2203_v49  ;;  %v2350_v63 = vadd.f32 %v8359_v5, %v2278_v13  ;;  %v4722_v5 = vld [vmem:[%s9352_s6 + $0xa0] sm:$0xff] }
 0x2f5   : > { %5687 = vmatprep.subr.bf16.mxu0 %v5686_v61  ;;  %v2209_v61 = vmax.f32 %v8239_v37, 0.0  ;;  %v4720_v37 = vld [vmem:[%s9352_s6 + $0x90] sm:$0xff]  ;;  %v5745_v44 = vpack.c.bf16 %v4723_v27, %v4722_v5  ;;  %v4753_v5 = vld [vmem:[%s9354_s8 + $0xc0] sm:$0xff]  ;;  %v4756_v27 = vld [vmem:[%s9354_s8 + $0xd8] sm:$0xff] }
 0x2f6   : > { %v2349_v23 = vadd.f32 %v2334_v58, %v2277_v35  ;;  %v3009_v35 = vld [vmem:[%s9353_s7 + $0x8] sm:$0xf] }
 0x2f7   : > { %v2283_v48 = vmul.f32 %v2262_v30, %v2209_v61  ;;  %v4743_v61 = vld [vmem:[%s9353_s7 + $0x10] sm:$0xff] }
 0x2f8   : > { %5689 = vmatpush1.bf16.msra.mxu0 %v5688_v40  ;;  %v5742_v40 = vpack.c.bf16 %v4721_v54, %v4720_v37  ;;  %v4744_v54 = vld [vmem:[%s9353_s7 + $0x18] sm:$0xf] }
 0x2f9   : > { %5691 = vmatprep.subr.bf16.mxu0 %v5690_v2  ;;  %v2355_v42 = vadd.f32 %v2334_v58, %v2283_v48  ;;  %v4747_v48 = vld [vmem:[%s9354_s8 + $0x90] sm:$0xff] }
 0x2fc   : > { %5693 = vmatpush1.bf16.msra.mxu0 %v5692_v47  ;;  %v4724_v47 = vld [vmem:[%s9352_s6 + $0xb0] sm:$0xff] }
 0x2fd   : > { %5695 = vmatprep.subr.bf16.mxu0 %v5694_v6  ;;  %v4725_v6 = vld [vmem:[%s9352_s6 + $0xb8] sm:$0xff] }
 0x2fe   : > { %v5748_v52 = vpack.c.bf16 %v4725_v6, %v4724_v47  ;;  %v4755_v47 = vld [vmem:[%s9354_s8 + $0xd0] sm:$0xff]  ;;  %v4757_v6 = vld [vmem:[%s9354_s8 + $0xe0] sm:$0xff] }
 0x300   : > { %5697 = vmatpush1.bf16.msra.mxu0 %v5696_v11  ;;  %v4727_v11 = vld [vmem:[%s9352_s6 + $0xc8] sm:$0xff] }
 0x301   : > { %5699 = vmatprep.subr.bf16.mxu0 %v5698_v45  ;;  %v5751_v45 = vpack.c.bf16 %v4727_v11, %v4726_v60  ;;  %v4759_v11 = vld [vmem:[%s9354_s8 + $0xf0] sm:$0xff] }
 0x304   : > { %5701 = vmatpush1.bf16.msra.mxu0 %v5700_v51  ;;  %v4731_v51 = vld [vmem:[%s9352_s6 + $0xe8] sm:$0xff] }
 0x305   : > { %5703 = vmatprep.subr.bf16.mxu0 %v5702_v59  ;;  %v5757_v59 = vpack.c.bf16 %v4731_v51, %v4730_v24  ;;  %v3181_v24 = vld [vmem:[%s9354_s8 + $0x18] sm:$0xff]  ;;  %v4763_v51 = vld [vmem:[%s9354_s8 + $0x110] sm:$0xff] }
 0x308   : > { %5705 = vmatpush1.bf16.msra.mxu0 %v5704_v25  ;;  %v4735_v25 = vld [vmem:[%s9352_s6 + $0x108] sm:$0xff] }
 0x309   : > { %5707 = vmatprep.subr.bf16.mxu0 %v5706_v56  ;;  %v5763_v26 = vpack.c.bf16 %v4735_v25, %v4734_v15  ;;  %v4736_v56 = vld [vmem:[%s9352_s6 + $0x110] sm:$0xff]  ;;  %v5825_v15 = vpack.c.bf16 %v4790_v21, %v4789_v17  ;;  %v4792_v25 = vld [vmem:[%s9356_s10 + $0xb8] sm:$0xff]  ;;  %v3194_v17 = vld [vmem:[%s9354_s8 + $0x80] sm:$0xff] }
 0x30a   : > { %v5766_v29 = vpack.c.bf16 %v4737_v19, %v4736_v56  ;;  %v4793_v56 = vld [vmem:[%s9356_s10 + $0xc0] sm:$0xff]  ;;  %v4794_v19 = vld [vmem:[%s9356_s10 + $0xc8] sm:$0xff] }
 0x30c   : > { %5709 = vmatpush1.bf16.msra.mxu0 %v5708_v34 }
 0x30d   : > { %5711 = vmatprep.subr.bf16.mxu0 %v5710_v41 }
 0x310   : > { %5713 = vmatpush1.bf16.msra.mxu0 %v5712_v46 }
 0x311   : > { %5824 = vmatprep.subr.bf16.mxu0 %v6203_v16 }
 0x313   : > { %2780 = vmatmul.mubr.f32.vlgmr.msra.gmra.mrb[14].mxu0 %v2343_v57 }
 0x314   : > { %2785 = vmatprep.mubr.f32.mxu0 %v2350_v63  ;;  %v4750_v63 = vld [vmem:[%s9354_s8 + $0xa8] sm:$0xff]  ;;  %5826 = vmatpush1.bf16.msra.mxu0 %v5825_v15 }
 0x315   : > { %v5776_v37 = vpack.c.bf16 %v4750_v63, %v4748_v28  ;;  %5827 = vmatprep.subr.bf16.mxu0 %v6203_v16 }
 0x317   : > { %2786 = vmatmul.mubr.f32.gmra.mrb[16].mxu0 %v2349_v23  ;;  %v4749_v23 = vld [vmem:[%s9354_s8 + $0xa0] sm:$0xff] }
 0x318   : > { %2791 = vmatprep.mubr.f32.mxu0 %v2356_v0  ;;  %v4752_v0 = vld [vmem:[%s9354_s8 + $0xb8] sm:$0xff] }
 0x31b   : > { %2792 = vmatmul.mubr.f32.gmra.mrb[18].mxu0 %v2355_v42  ;;  %v4754_v42 = vld [vmem:[%s9354_s8 + $0xc8] sm:$0xff] }
 0x3e6   : > { %v2781_v18 = vpop.f32.mrb[14].mxu0 }
 0x3e7   : > { %v2783_v2 = vpop.f32.mrb[15].mxu0 }
 0x3e8   : > { %4717 = vmatprep.mubr.msk.f32.mxu1 %vm2816_vm6, %v2783_v2 }
 0x3e9   : > { %2891 = vmatmul.mubr.f32.vlgmr.msra.gmra.mrb[20].mxu1 %v2781_v18 }
 0x3ea   : > { %5743 = vmatpush1.bf16.msra.mxu1 %v5742_v40  ;;  %v2787_v39 = vpop.f32.mrb[16].mxu0  ;;  %v5780_v40 = vpack.c.bf16 %v4754_v42, %v4752_v0 }
 0x3eb   : > { %v2789_v50 = vpop.f32.mrb[17].mxu0  ;;  %5744 = vmatprep.subr.bf16.mxu1 %v6203_v16 }
 0x3ec   : > { %4718 = vmatprep.mubr.msk.f32.mxu1 %vm2816_vm6, %v2789_v50 }
 0x3ed   : > { %2896 = vmatmul.mubr.f32.gmra.mrb[22].mxu1 %v2787_v39 }
 0x3ee   : > { %5746 = vmatpush1.bf16.msra.mxu1 %v5745_v44  ;;  %v2793_v55 = vpop.f32.mrb[18].mxu0 }
 0x3ef   : > { %v2795_v10 = vpop.f32.mrb[19].mxu0  ;;  %5747 = vmatprep.subr.bf16.mxu1 %v6203_v16 }
 0x3f0   : > { %4719 = vmatprep.mubr.msk.f32.mxu1 %vm2816_vm6, %v2795_v10 }
 0x3f1   : > { %2901 = vmatmul.mubr.f32.gmra.mrb[24].mxu1 %v2793_v55 }
 0x3f2   : > { %5749 = vmatpush1.bf16.msra.mxu1 %v5748_v52  ;;  %4738 = vmatprep.mubr.msk.f32.mxu1 %vm2816_vm6, %v2783_v2  ;;  %v4751_v2 = vld [vmem:[%s9354_s8 + $0xb0] sm:$0xff]  ;;  %v4760_v52 = vld [vmem:[%s9354_s8 + $0xf8] sm:$0xff] }
 0x3f3   : > { %5750 = vmatprep.subr.bf16.mxu1 %v6203_v16  ;;  %v5782_v44 = vpack.c.bf16 %v4753_v5, %v4751_v2  ;;  %v3189_v2 = vld [vmem:[%s9354_s8 + $0x58] sm:$0xff] }
 0x3f6   : > { %5752 = vmatpush1.bf16.msra.mxu1 %v5751_v45  ;;  %v4761_v45 = vld [vmem:[%s9354_s8 + $0x100] sm:$0xff] }
 0x3f7   : > { %5753 = vmatprep.subr.bf16.mxu1 %v6203_v16  ;;  %v5790_v14 = vpack.c.bf16 %v4761_v45, %v4759_v11  ;;  %v3195_v45 = vld [vmem:[%s9354_s8 + $0x88] sm:$0xff] }
 0x3fa   : > { %5755 = vmatpush1.bf16.msra.mxu1 %v5754_v3  ;;  %v3179_v3 = vld [vmem:[%s9354_s8 + $0x8] sm:$0xff] }
 0x3fb   : > { %5756 = vmatprep.subr.bf16.mxu1 %v6203_v16 }
 0x3fe   : > { %5758 = vmatpush1.bf16.msra.mxu1 %v5757_v59  ;;  %v5792_v59 = vpack.c.bf16 %v3181_v24, %v3179_v3  ;;  %v4769_v3 = vld [vmem:[%s9354_s8 + $0x120] sm:$0xff]  ;;  %v4771_v24 = vld [vmem:[%s9354_s8 + $0x130] sm:$0xff] }
 0x3ff   : > { %5759 = vmatprep.subr.bf16.mxu1 %v6203_v16 }
 0x402   : > { %5761 = vmatpush1.bf16.msra.mxu1 %v5760_v22  ;;  %v4791_v22 = vld [vmem:[%s9356_s10 + $0xb0] sm:$0xff] }
 0x403   : > { %5762 = vmatprep.subr.bf16.mxu1 %v6203_v16 }
 0x406   : > { %5764 = vmatpush1.bf16.msra.mxu1 %v5763_v26  ;;  %v5828_v26 = vpack.c.bf16 %v4792_v25, %v4791_v22  ;;  %v5810_v22 = vpack.c.bf16 %v4771_v24, %v4769_v3  ;;  %v4773_v25 = vld [vmem:[%s9354_s8 + $0x140] sm:$0xff] }
 0x407   : > { %5765 = vmatprep.subr.bf16.mxu1 %v6203_v16 }
 0x408   : > { %5829 = vmatpush1.bf16.msra.mxu0 %v5828_v26  ;;  %v4775_v26 = vld [vmem:[%s9354_s8 + $0x150] sm:$0xff] }
 0x409   : > { %5830 = vmatprep.subr.bf16.mxu0 %v6203_v16 }
 0x40a   : > { %5767 = vmatpush1.bf16.msra.mxu1 %v5766_v29  ;;  %v5831_v29 = vpack.c.bf16 %v4794_v19, %v4793_v56  ;;  %v4778_v56 = vld [vmem:[%s9354_s8 + $0x168] sm:$0xff]  ;;  %v4780_v19 = vld [vmem:[%s9354_s8 + $0x178] sm:$0xff] }
 0x40c   : > { %5832 = vmatpush1.bf16.msra.mxu0 %v5831_v29  ;;  %v5814_v29 = vpack.c.bf16 %v4775_v26, %v4773_v25 }
 0x40d   : > { %2990 = vmatmul.mubr.f32.vlgmr.msra.gmra.mrb[26].mxu1 %v2781_v18  ;;  %v5778_v18 = vpack.c.bf16 %v4749_v23, %v4747_v48  ;;  %5833 = vmatprep.subr.bf16.mxu0 %v6203_v16 }
 0x40e   : > { %4739 = vmatprep.mubr.msk.f32.mxu1 %vm2816_vm6, %v2789_v50 }
 0x411   : > { %2995 = vmatmul.mubr.f32.gmra.mrb[28].mxu1 %v2787_v39  ;;  %v4758_v39 = vld [vmem:[%s9354_s8 + $0xe8] sm:$0xff] }
 0x412   : > { %4740 = vmatprep.mubr.msk.f32.mxu1 %vm2816_vm6, %v2795_v10  ;;  %v5784_v50 = vpack.c.bf16 %v4758_v39, %v4756_v27  ;;  %v4762_v10 = vld [vmem:[%s9354_s8 + $0x108] sm:$0xff] }
 0x413   : > { %v5788_v60 = vpack.c.bf16 %v4762_v10, %v4760_v52  ;;  %v3190_v10 = vld [vmem:[%s9354_s8 + $0x60] sm:$0xff] }
 0x415   : > { %3000 = vmatmul.mubr.f32.gmra.mrb[30].mxu1 %v2793_v55  ;;  %v5786_v55 = vpack.c.bf16 %v4757_v6, %v4755_v47  ;;  %v3191_v47 = vld [vmem:[%s9354_s8 + $0x68] sm:$0xff]  ;;  %v3193_v6 = vld [vmem:[%s9354_s8 + $0x78] sm:$0xff] }
 0x416   : > { %4957 = vmatprep.mubr.msk.f32.mxu1 %vm3010_vm7, %v3008_v31  ;;  %v4795_v31 = vld [vmem:[%s9356_s10 + $0xd0] sm:$0xff]  ;;  %v5804_v52 = vpack.c.bf16 %v3193_v6, %v3191_v47 }
 0x4bc   : > { %v2892_v33 = vpop.f32.mrb[20].mxu1 }
 0x4bd   : > { %v2894_v34 = vpop.f32.mrb[21].mxu1 }
 0x4c0   : > { %v2897_v53 = vpop.f32.mrb[22].mxu1 }
 0x4c1   : > { %v2899_v30 = vpop.f32.mrb[23].mxu1 }
 0x4c2   : > { %v4798_v30 = vld [vmem:[%s9356_s10 + $0xe8] sm:$0xff] }
 0x4c4   : > { %v2902_v38 = vpop.f32.mrb[24].mxu1 }
 0x4c5   : > { %v2904_v41 = vpop.f32.mrb[25].mxu1 }
 0x4c6   : > { %v4799_v41 = vld [vmem:[%s9356_s10 + $0xf0] sm:$0xff] }
 0x4e0   : > { %v2991_v36 = vpop.f32.mrb[26].mxu1 }
 0x4e1   : > { %v3005_v43 = vmax.f32 %v2892_v33, %v2991_v36  ;;  %v2993_v9 = vpop.f32.mrb[27].mxu1  ;;  %v4796_v33 = vld [vmem:[%s9356_s10 + $0xd8] sm:$0xff] }
 0x4e2   : > { %v5834_v34 = vpack.c.bf16 %v4796_v33, %v4795_v31  ;;  %v4800_v36 = vld [vmem:[%s9356_s10 + $0xf8] sm:$0xff]  ;;  %v5816_v31 = vpack.c.bf16 %v4780_v19, %v4778_v56  ;;  %v4777_v33 = vld [vmem:[%s9354_s8 + $0x160] sm:$0xff] }
 0x4e4   : > { %v2996_v46 = vpop.f32.mrb[28].mxu1  ;;  %5835 = vmatpush1.bf16.msra.mxu0 %v5834_v34  ;;  %v4779_v34 = vld [vmem:[%s9354_s8 + $0x170] sm:$0xff] }
 0x4e5   : > { %v3006_v12 = vmax.f32 %v2897_v53, %v2996_v46  ;;  %v2998_v58 = vpop.f32.mrb[29].mxu1  ;;  %v4797_v53 = vld [vmem:[%s9356_s10 + $0xe0] sm:$0xff]  ;;  %5836 = vmatprep.subr.bf16.mxu0 %v6203_v16 }
 0x4e7   : > { %v5768_v49 = vpack.c.bf16 %v3006_v12, %v3005_v43  ;;  %v5840_v43 = vpack.c.bf16 %v4800_v36, %v4799_v41  ;;  %v4781_v36 = vld [vmem:[%s9354_s8 + $0x180] sm:$0xff] }
 0x4e8   : > { %v3001_v13 = vpop.f32.mrb[30].mxu1 }
 0x4e9   : > { %v3007_v32 = vmax.f32 %v2902_v38, %v3001_v13  ;;  %v3003_v57 = vpop.f32.mrb[31].mxu1  ;;  %5769 = vmatprep.subr.bf16.mxu1 %v5768_v49  ;;  %v5837_v38 = vpack.c.bf16 %v4798_v30, %v4797_v53  ;;  %v3178_v13 = vld [vmem:[%s9354_s8] sm:$0xff]  ;;  %v4782_v53 = vld [vmem:[%s9354_s8 + $0x188] sm:$0xff]  ;;  %v4784_v30 = vld [vmem:[%s9354_s8 + $0x198] sm:$0xff] }
 0x4ea   : > { %5771 = vmatpush3.bf16.msra.mxu1 %v5768_v49  ;;  %v5820_v41 = vpack.c.bf16 %v4784_v30, %v4782_v53  ;;  %v3542_v53 = vld [vmem:[%s9356_s10 + $0x10] sm:$0xff]  ;;  %v3543_v30 = vld [vmem:[%s9356_s10 + $0x18] sm:$0xff] }
 0x4eb   : > { %4955 = vmatprep.subr.mxu1 %v3007_v32  ;;  %5838 = vmatpush1.bf16.msra.mxu0 %v5837_v38  ;;  %v5818_v38 = vpack.c.bf16 %v4779_v34, %v4777_v33 }
 0x4ec   : > { %5839 = vmatprep.subr.bf16.mxu0 %v6203_v16 }
 0x4ee   : > { %4956 = vmatpush3.msra.mxu1 %v3007_v32 }
 0x4ef   : > { %5773 = vmatprep.subr.bf16.mxu1 %v5768_v49  ;;  %4958 = vmatmul.mubr.msk.f32.vlgmr.msra.gmra.mrb[32].mxu1 %vm3010_vm7, %v3009_v35  ;;  %v3183_v35 = vld [vmem:[%s9354_s8 + $0x28] sm:$0xff] }
 0x4f0   : > { %5775 = vmatpush3.bf16.msra.mxu1 %v5768_v49  ;;  %4966 = vmatprep.mubr.msk.f32.mxu1 %vm3010_vm7, %v4743_v61  ;;  %v3185_v61 = vld [vmem:[%s9354_s8 + $0x38] sm:$0xff] }
 0x4f1   : > { %4964 = vmatprep.subr.mxu1 %v3007_v32  ;;  %5841 = vmatpush1.bf16.msra.mxu0 %v5840_v43  ;;  %v5796_v42 = vpack.c.bf16 %v3185_v61, %v3183_v35  ;;  %v4783_v43 = vld [vmem:[%s9354_s8 + $0x190] sm:$0xff]  ;;  %v4805_v61 = vld [vmem:[%s9356_s10 + $0x120] sm:$0xff] }
 0x4f2   : > { %5842 = vmatprep.subr.bf16.mxu0 %v6203_v16 }
 0x4f4   : > { %4965 = vmatpush3.msra.mxu1 %v3007_v32  ;;  %v3180_v32 = vld [vmem:[%s9354_s8 + $0x10] sm:$0xff] }
 0x4f5   : > { %4967 = vmatmul.mubr.msk.f32.vlgmr.msra.gmra.mrb[34].mxu1 %vm3010_vm7, %v4744_v54  ;;  %5777 = vmatprep.subr.bf16.mxu1 %v5776_v37  ;;  %v5794_v0 = vpack.c.bf16 %v3180_v32, %v3178_v13  ;;  %v3182_v37 = vld [vmem:[%s9354_s8 + $0x20] sm:$0xff]  ;;  %v3184_v54 = vld [vmem:[%s9354_s8 + $0x30] sm:$0xff]  ;;  %v4802_v13 = vld [vmem:[%s9356_s10 + $0x108] sm:$0xff] }
 0x4f6   : > { %5779 = vmatpush1.bf16.msra.mxu1 %v5778_v18  ;;  %3289 = vmatprep.mubr.f32.mxu1 %v6201_v7  ;;  %v5798_v27 = vpack.c.bf16 %v3184_v54, %v3182_v37 }
 0x4f7   : > { %5781 = vmatprep.subr.bf16.mxu1 %v5780_v40  ;;  %v3187_v40 = vld [vmem:[%s9354_s8 + $0x48] sm:$0xff] }
 0x4f8   : > { %v5800_v39 = vpack.c.bf16 %v3189_v2, %v3187_v40 }
 0x4fa   : > { %5783 = vmatpush1.bf16.msra.mxu1 %v5782_v44  ;;  %v3186_v44 = vld [vmem:[%s9354_s8 + $0x40] sm:$0xff] }
 0x4fb   : > { %5785 = vmatprep.subr.bf16.mxu1 %v5784_v50  ;;  %v3188_v50 = vld [vmem:[%s9354_s8 + $0x50] sm:$0xff] }
 0x4fe   : > { %5787 = vmatpush1.bf16.msra.mxu1 %v5786_v55  ;;  %v5802_v55 = vpack.c.bf16 %v3188_v50, %v3186_v44 }
 0x4ff   : > { %5789 = vmatprep.subr.bf16.mxu1 %v5788_v60  ;;  %v3192_v60 = vld [vmem:[%s9354_s8 + $0x70] sm:$0xff] }
 0x500   : > { %v5806_v11 = vpack.c.bf16 %v3192_v60, %v3190_v10 }
 0x502   : > { %5791 = vmatpush1.bf16.msra.mxu1 %v5790_v14  ;;  %v4770_v14 = vld [vmem:[%s9354_s8 + $0x128] sm:$0xff] }
 0x503   : > { %3241 = vmatprep.subr.mxu1 %v4764_v20  ;;  %v4772_v20 = vld [vmem:[%s9354_s8 + $0x138] sm:$0xff] }
 0x504   : > { %v5808_v21 = vpack.c.bf16 %v4772_v20, %v4770_v14 }
 0x506   : > { %3242 = vmatpush1.msra.mxu1 %v4763_v51  ;;  %v4774_v51 = vld [vmem:[%s9354_s8 + $0x148] sm:$0xff] }
 0x507   : > { %5793 = vmatprep.subr.bf16.mxu1 %v5792_v59  ;;  %v4776_v59 = vld [vmem:[%s9354_s8 + $0x158] sm:$0xff] }
 0x508   : > { %v5812_v15 = vpack.c.bf16 %v4776_v59, %v4774_v51  ;;  %v3540_v51 = vld [vmem:[%s9356_s10] sm:$0xff]  ;;  %v3541_v59 = vld [vmem:[%s9356_s10 + $0x8] sm:$0xff] }
 0x5c2   : > { %v4959_v9 = vpop.f32.mrb[32].mxu1 }
 0x5c3   : > { %v3083_v46 = vpop.f32.mrb[33].mxu1 }
 0x5c8   : > { %v4968_v12 = vpop.f32.mrb[34].mxu1 }
 0x5c9   : > { %v8721_v58 = vmax.f32 %v4959_v9, %v4968_v12  ;;  %v3167_v49 = vpop.f32.mrb[35].mxu1  ;;  %v5822_v9 = vpack.c.bf16 %v4783_v43, %v4781_v36  ;;  %v4785_v12 = vld [vmem:[%s9354_s8 + $0x1a0] sm:$0xff]  ;;  %v3545_v43 = vld [vmem:[%s9356_s10 + $0x28] sm:$0xff] }
 0x5ca   : > { %v3176_v57 = vmax.f32 %v3083_v46, %v3167_v49  ;;  %v4786_v46 = vld [vmem:[%s9354_s8 + $0x1a8] sm:$0xff]  ;;  %v4801_v49 = vld [vmem:[%s9356_s10 + $0x100] sm:$0xff] }
 0x5cb   : > { %v3218_v28 = vrot.slane %v8721_v58, 1  ;;  %v3403_v63 = vrot.slane %v8721_v58, 2  ;;  %v5843_v32 = vpack.c.bf16 %v4802_v13, %v4801_v49  ;;  %v3544_v36 = vld [vmem:[%s9356_s10 + $0x20] sm:$0xff] }
 0x5cc   : > { %v3217_v48 = vrot.slane %v3176_v57, 1  ;;  %v3402_v23 = vrot.slane %v3176_v57, 2  ;;  %v3548_v13 = vld [vmem:[%s9356_s10 + $0x40] sm:$0xff] }
 0x5cd   : > { %5844 = vmatpush1.bf16.msra.mxu0 %v5843_v32  ;;  %v3549_v32 = vld [vmem:[%s9356_s10 + $0x48] sm:$0xff] }
 0x5ce   : > { %v3219_v18 = vsel %vm544_vm4, %v3217_v48, %v3218_v28  ;;  %v8753_v5 = vsel %vm769_vm5, %v3402_v23, %v3403_v63  ;;  %5845 = vmatprep.subr.bf16.mxu0 %v6203_v16  ;;  %v4807_v48 = vld [vmem:[%s9356_s10 + $0x130] sm:$0xff]  ;;  %v4808_v23 = vld [vmem:[%s9356_s10 + $0x138] sm:$0xff] }
 0x5cf   : > { %4765 = vmatmul.mubr.msk.f32.vlgmr.msra.gmra.mrb[36].mxu1 %vm3220_vm8, %v3219_v18 }
 0x5d0   : > { %5795 = vmatpush1.bf16.msra.mxu1 %v5794_v0  ;;  %3295 = vmatprep.mubr.f32.mxu1 %v6201_v7  ;;  %v5852_v0 = vpack.c.bf16 %v4808_v23, %v4807_v48  ;;  %v3554_v23 = vld [vmem:[%s9356_s10 + $0x70] sm:$0xff] }
 0x5d1   : > { %5797 = vmatprep.subr.bf16.mxu1 %v5796_v42  ;;  %v3490_v42 = vld [vmem:[%s9355_s9] sm:$0xf] }
 0x5d2   : > { %v3499_v37 = vrot.slane %v3490_v42, %v6757_v1  ;;  %v3503_v54 = vrot.slane %v3490_v42, %v6751_v62  ;;  %v3521_v40 = vrot.slane %v3490_v42, %v6765_v8 }
 0x5d3   : > { %4766 = vmatmul.mubr.msk.f32.gmra.mrb[38].mxu1 %vm3220_vm8, %v3218_v28  ;;  %v4806_v28 = vld [vmem:[%s9356_s10 + $0x128] sm:$0xff] }
 0x5d4   : > { %5799 = vmatpush1.bf16.msra.mxu1 %v5798_v27  ;;  %3370 = vmatprep.mubr.f32.mxu1 %v6201_v7  ;;  %v3509_v18 = vrot.slane %v3499_v37, %v6757_v1  ;;  %v3525_v27 = vrot.slane %v3490_v42, %v6761_v4  ;;  %v3531_v6 = vrot.slane %v3521_v40, %v6765_v8  ;;  %v3556_v37 = vld [vmem:[%s9356_s10 + $0x80] sm:$0xff]  ;;  %v3558_v40 = vld [vmem:[%s9356_s10 + $0x90] sm:$0xff] }
 0x5d5   : > { %5801 = vmatprep.subr.bf16.mxu1 %v5800_v39 }
 0x5d8   : > { %5803 = vmatpush1.bf16.msra.mxu1 %v5802_v55 }
 0x5d9   : > { %5805 = vmatprep.subr.bf16.mxu1 %v5804_v52  ;;  %v3535_v52 = vrot.slane %v3525_v27, %v6765_v8  ;;  %v4811_v27 = vld [vmem:[%s9356_s10 + $0x140] sm:$0xff] }
 0x5dc   : > { %5807 = vmatpush1.bf16.msra.mxu1 %v5806_v11 }
 0x5dd   : > { %3322 = vmatprep.subr.mxu1 %v3195_v45 }
 0x5e0   : > { %3323 = vmatpush1.msra.mxu1 %v3194_v17 }
 0x5e1   : > { %4767 = vmatmul.mubr.msk.f32.vlgmr.msra.gmra.mrb[36].mxu1 %vm3220_vm8, %v3176_v57  ;;  %5809 = vmatprep.subr.bf16.mxu1 %v5808_v21  ;;  %v4803_v57 = vld [vmem:[%s9356_s10 + $0x110] sm:$0xff] }
 0x5e2   : > { %5811 = vmatpush1.bf16.msra.mxu1 %v5810_v22  ;;  %3376 = vmatprep.mubr.f32.mxu1 %v6201_v7 }
 0x5e3   : > { %5813 = vmatprep.subr.bf16.mxu1 %v5812_v15 }
 0x5e5   : > { %4768 = vmatmul.mubr.msk.f32.gmra.mrb[38].mxu1 %vm3220_vm8, %v8721_v58  ;;  %v4804_v58 = vld [vmem:[%s9356_s10 + $0x118] sm:$0xff] }
 0x5e6   : > { %5815 = vmatpush1.bf16.msra.mxu1 %v5814_v29  ;;  %3473 = vmatprep.mubr.f32.mxu1 %v6201_v7  ;;  %v5846_v35 = vpack.c.bf16 %v4804_v58, %v4803_v57  ;;  %v5867_v57 = vpack.c.bf16 %v3549_v32, %v3548_v13  ;;  %v3550_v58 = vld [vmem:[%s9356_s10 + $0x50] sm:$0xff]  ;;  %v4842_v32 = vld [vmem:[%s9359_s13 + $0xc0] sm:$0xff] }
 0x5e7   : > { %5817 = vmatprep.subr.bf16.mxu1 %v5816_v31  ;;  %v5855_v31 = vpack.c.bf16 %v3541_v59, %v3540_v51  ;;  %v4823_v51 = vld [vmem:[%s9356_s10 + $0x1a0] sm:$0xff]  ;;  %v4824_v59 = vld [vmem:[%s9356_s10 + $0x1a8] sm:$0xff] }
 0x5e8   : > { %5847 = vmatpush1.bf16.msra.mxu0 %v5846_v35  ;;  %v3551_v35 = vld [vmem:[%s9356_s10 + $0x58] sm:$0xff] }
 0x5e9   : > { %5848 = vmatprep.subr.bf16.mxu0 %v6203_v16 }
 0x5ea   : > { %5819 = vmatpush1.bf16.msra.mxu1 %v5818_v38 }
 0x5eb   : > { %5821 = vmatprep.subr.bf16.mxu1 %v5820_v41  ;;  %v5858_v41 = vpack.c.bf16 %v3543_v30, %v3542_v53  ;;  %v4834_v53 = vld [vmem:[%s9359_s13 + $0x80] sm:$0xff]  ;;  %v4835_v30 = vld [vmem:[%s9359_s13 + $0x88] sm:$0xff] }
 0x5ee   : > { %5823 = vmatpush1.bf16.msra.mxu1 %v5822_v9  ;;  %v5861_v9 = vpack.c.bf16 %v3545_v43, %v3544_v36  ;;  %v4838_v43 = vld [vmem:[%s9359_s13 + $0xa0] sm:$0xff] }
 0x5ef   : > { %3425 = vmatprep.subr.mxu1 %v4786_v46  ;;  %v3546_v46 = vld [vmem:[%s9356_s10 + $0x30] sm:$0xff] }
 0x5f2   : > { %3426 = vmatpush1.msra.mxu1 %v4785_v12  ;;  %v3547_v12 = vld [vmem:[%s9356_s10 + $0x38] sm:$0xff] }
 0x5f3   : > { %4787 = vmatmul.mubr.msk.f32.vlgmr.msra.gmra.mrb[36].mxu1 %vm3220_vm8, %v8753_v5  ;;  %5914 = vmatprep.subr.bf16.mxu1 %v6203_v16  ;;  %v3513_v5 = vrot.slane %v3503_v54, %v6757_v1  ;;  %v5864_v49 = vpack.c.bf16 %v3547_v12, %v3546_v46  ;;  %v3557_v54 = vld [vmem:[%s9356_s10 + $0x88] sm:$0xff]  ;;  %v4840_v12 = vld [vmem:[%s9359_s13 + $0xb0] sm:$0xff] }
 0x5f4   : > { %3479 = vmatprep.mubr.f32.mxu1 %v6201_v7 }
 0x5f7   : > { %4788 = vmatmul.mubr.msk.f32.gmra.mrb[38].mxu1 %vm3220_vm8, %v3403_v63  ;;  %v5849_v63 = vpack.c.bf16 %v4806_v28, %v4805_v61  ;;  %v5870_v61 = vpack.c.bf16 %v3551_v35, %v3550_v58  ;;  %v3552_v28 = vld [vmem:[%s9356_s10 + $0x60] sm:$0xff]  ;;  %v4844_v35 = vld [vmem:[%s9359_s13 + $0xd0] sm:$0xff] }
 0x5f8   : > { %5006 = vmatprep.mubr.msk.f32.mxu1 %vm6204_vm11, %v6201_v7 }
 0x5f9   : > { %5850 = vmatpush1.bf16.msra.mxu0 %v5849_v63  ;;  %v3553_v63 = vld [vmem:[%s9356_s10 + $0x68] sm:$0xff] }
 0x5fa   : > { %5851 = vmatprep.subr.bf16.mxu0 %v6203_v16  ;;  %v5873_v48 = vpack.c.bf16 %v3553_v63, %v3552_v28  ;;  %v4846_v63 = vld [vmem:[%s9359_s13 + $0xe0] sm:$0xff] }
 0x5fd   : > { %5853 = vmatpush1.bf16.msra.mxu0 %v5852_v0  ;;  %v3555_v0 = vld [vmem:[%s9356_s10 + $0x78] sm:$0xff] }
 0x5fe   : > { %5854 = vmatprep.subr.bf16.mxu0 %v6203_v16  ;;  %v5876_v42 = vpack.c.bf16 %v3555_v0, %v3554_v23  ;;  %v3838_v0 = vld [vmem:[%s9357_s11] sm:$0x3] }
 0x6c6   : > { %v3475_v2 = vpop.f32.mrb[36].mxu1 }
 0x6c7   : > { %v3491_v39 = vmax.f32 %v3475_v2, 0.0  ;;  %v3477_v44 = vpop.f32.mrb[37].mxu1  ;;  %v3559_v2 = vld [vmem:[%s9356_s10 + $0x98] sm:$0xff] }
 0x6c8   : > { %v3492_v50 = vmax.f32 %v3477_v44, 0.0 }
 0x6c9   : > { %v3514_v47 = vmul.f32 %v3509_v18, %v3491_v39  ;;  %v4812_v39 = vld [vmem:[%s9356_s10 + $0x148] sm:$0xff] }
 0x6ca   : > { %v3515_v55 = vmul.f32 %v3513_v5, %v3492_v50  ;;  %v3481_v10 = vpop.f32.mrb[38].mxu1  ;;  %v5885_v44 = vpack.c.bf16 %v4812_v39, %v4811_v27  ;;  %v4813_v50 = vld [vmem:[%s9356_s10 + $0x150] sm:$0xff]  ;;  %v3851_v27 = vld [vmem:[%s9358_s12 + $0x8] sm:$0x3] }
 0x6cb   : > { %v3493_v62 = vmax.f32 %v3481_v10, 0.0  ;;  %v3483_v60 = vpop.f32.mrb[39].mxu1  ;;  %v8888_v45 = vadd.f32 %v3531_v6, %v3514_v47  ;;  %v4814_v47 = vld [vmem:[%s9356_s10 + $0x158] sm:$0xff]  ;;  %v4848_v39 = vld [vmem:[%s9359_s13 + $0xf0] sm:$0xff] }
 0x6cc   : > { %v3494_v11 = vmax.f32 %v3483_v60, 0.0  ;;  %v3537_v20 = vadd.f32 %v3535_v52, %v3515_v55  ;;  %v4815_v55 = vld [vmem:[%s9356_s10 + $0x160] sm:$0xff]  ;;  %v4818_v60 = vld [vmem:[%s9356_s10 + $0x178] sm:$0xff] }
 0x6cd   : > { %v3516_v14 = vmul.f32 %v3509_v18, %v3493_v62  ;;  %v3585_v17 = vrot.slane %v8888_v45, 1  ;;  %v3758_v15 = vrot.slane %v8888_v45, 2  ;;  %v5879_v18 = vpack.c.bf16 %v3557_v54, %v3556_v37  ;;  %v4817_v62 = vld [vmem:[%s9356_s10 + $0x170] sm:$0xff] }
 0x6ce   : > { %v3517_v3 = vmul.f32 %v3513_v5, %v3494_v11  ;;  %v3588_v56 = vrot.slane %v3537_v20, 1  ;;  %v3761_v19 = vrot.slane %v3537_v20, 2  ;;  %v5882_v5 = vpack.c.bf16 %v3559_v2, %v3558_v40 }
 0x6cf   : > { %v3538_v24 = vadd.f32 %v3531_v6, %v3516_v14  ;;  %v5888_v6 = vpack.c.bf16 %v4814_v47, %v4813_v50  ;;  %v5894_v11 = vpack.c.bf16 %v4818_v60, %v4817_v62  ;;  %v4820_v14 = vld [vmem:[%s9356_s10 + $0x188] sm:$0xff]  ;;  %v3848_v40 = vrot.slane %v3838_v0, %v6765_v8  ;;  %v4223_v47 = vld [vmem:[%s9361_s15] sm:$0xff] }
 0x6d0   : > { %v3539_v4 = vadd.f32 %v3535_v52, %v3517_v3  ;;  %v4816_v52 = vld [vmem:[%s9356_s10 + $0x168] sm:$0xff]  ;;  %v4821_v3 = vld [vmem:[%s9356_s10 + $0x190] sm:$0xff]  ;;  %v4227_v60 = vld [vmem:[%s9361_s15 + $0x20] sm:$0xff] }
 0x6d1   : > { %v3586_v21 = vrot.slane %v3538_v24, 1  ;;  %v3759_v22 = vrot.slane %v3538_v24, 2  ;;  %v5891_v10 = vpack.c.bf16 %v4816_v52, %v4815_v55  ;;  %v4822_v24 = vld [vmem:[%s9356_s10 + $0x198] sm:$0xff]  ;;  %v4225_v55 = vld [vmem:[%s9361_s15 + $0x10] sm:$0xff] }
 0x6d2   : > { %v3589_v25 = vrot.slane %v3539_v4, 1  ;;  %v3762_v26 = vrot.slane %v3539_v4, 2  ;;  %v5900_v4 = vpack.c.bf16 %v4822_v24, %v4821_v3 }
 0x6d3   : > { %v3587_v29 = vsel %vm544_vm4, %v3585_v17, %v3586_v21  ;;  %v8900_v33 = vsel %vm769_vm5, %v3758_v15, %v3759_v22  ;;  %v5903_v17 = vpack.c.bf16 %v4824_v59, %v4823_v51  ;;  %v4825_v21 = vld [vmem:[%s9356_s10 + $0x1b0] sm:$0xff]  ;;  %v4826_v22 = vld [vmem:[%s9356_s10 + $0x1b8] sm:$0xff] }
 0x6d4   : > { %v3590_v34 = vsel %vm544_vm4, %v3588_v56, %v3589_v25  ;;  %v3763_v38 = vsel %vm769_vm5, %v3761_v19, %v3762_v26  ;;  %v5906_v15 = vpack.c.bf16 %v4826_v22, %v4825_v21  ;;  %v4827_v25 = vld [vmem:[%s9356_s10 + $0x1c0] sm:$0xff]  ;;  %v4828_v26 = vld [vmem:[%s9356_s10 + $0x1c8] sm:$0xff]  ;;  %v4829_v19 = vld [vmem:[%s9356_s10 + $0x1d0] sm:$0xff] }
 0x6d5   : > { %4809 = vmatprep.mubr.msk.f32.mxu0 %vm3592_vm9, %v3590_v34  ;;  %v5909_v56 = vpack.c.bf16 %v4828_v26, %v4827_v25  ;;  %v3850_v34 = vld [vmem:[%s9358_s12] sm:$0xff]  ;;  %v3936_v22 = vld [vmem:[%s9359_s13 + $0x10] sm:$0xff] }
 0x6d6   : > { %3660 = vmatmul.mubr.f32.vlgmr.msra.gmra.mrb[20].mxu0 %v3587_v29  ;;  %v4830_v29 = vld [vmem:[%s9356_s10 + $0x1d8] sm:$0xff] }
 0x6d7   : > { %5856 = vmatpush1.bf16.msra.mxu0 %v5855_v31  ;;  %4810 = vmatprep.mubr.msk.f32.mxu0 %vm3592_vm9, %v3537_v20  ;;  %v5912_v31 = vpack.c.bf16 %v4830_v29, %v4829_v19  ;;  %v3938_v19 = vld [vmem:[%s9359_s13 + $0x20] sm:$0xff]  ;;  %v3939_v29 = vld [vmem:[%s9359_s13 + $0x28] sm:$0xff] }
 0x6d8   : > { %5857 = vmatprep.subr.bf16.mxu0 %v6203_v16 }
 0x6db   : > { %5859 = vmatpush1.bf16.msra.mxu0 %v5858_v41  ;;  %v4837_v41 = vld [vmem:[%s9359_s13 + $0x98] sm:$0xff] }
 0x6dc   : > { %5860 = vmatprep.subr.bf16.mxu0 %v6203_v16 }
 0x6df   : > { %5862 = vmatpush1.bf16.msra.mxu0 %v5861_v9  ;;  %v4839_v9 = vld [vmem:[%s9359_s13 + $0xa8] sm:$0xff] }
 0x6e0   : > { %5863 = vmatprep.subr.bf16.mxu0 %v6203_v16  ;;  %v5921_v46 = vpack.c.bf16 %v4839_v9, %v4838_v43  ;;  %v3945_v43 = vld [vmem:[%s9359_s13 + $0x58] sm:$0xff] }
 0x6e3   : > { %5865 = vmatpush1.bf16.msra.mxu0 %v5864_v49  ;;  %v4841_v49 = vld [vmem:[%s9359_s13 + $0xb8] sm:$0xff] }
 0x6e4   : > { %5866 = vmatprep.subr.bf16.mxu0 %v6203_v16  ;;  %v5924_v13 = vpack.c.bf16 %v4841_v49, %v4840_v12  ;;  %v3947_v12 = vld [vmem:[%s9359_s13 + $0x68] sm:$0xff] }
 0x6e7   : > { %5868 = vmatpush1.bf16.msra.mxu0 %v5867_v57  ;;  %v4843_v57 = vld [vmem:[%s9359_s13 + $0xc8] sm:$0xff] }
 0x6e8   : > { %5869 = vmatprep.subr.bf16.mxu0 %v6203_v16  ;;  %v5927_v58 = vpack.c.bf16 %v4843_v57, %v4842_v32  ;;  %v3949_v32 = vld [vmem:[%s9359_s13 + $0x78] sm:$0xff] }
 0x6eb   : > { %5871 = vmatpush1.bf16.msra.mxu0 %v5870_v61  ;;  %v4845_v61 = vld [vmem:[%s9359_s13 + $0xd8] sm:$0xff] }
 0x6ec   : > { %5872 = vmatprep.subr.bf16.mxu0 %v6203_v16  ;;  %v5930_v28 = vpack.c.bf16 %v4845_v61, %v4844_v35  ;;  %v4851_v35 = vld [vmem:[%s9359_s13 + $0x108] sm:$0xff] }
 0x6ef   : > { %5874 = vmatpush1.bf16.msra.mxu0 %v5873_v48  ;;  %v4847_v48 = vld [vmem:[%s9359_s13 + $0xe8] sm:$0xff] }
 0x6f0   : > { %5875 = vmatprep.subr.bf16.mxu0 %v6203_v16  ;;  %v5933_v23 = vpack.c.bf16 %v4847_v48, %v4846_v63  ;;  %v4853_v63 = vld [vmem:[%s9359_s13 + $0x118] sm:$0xff] }
 0x6f3   : > { %5877 = vmatpush1.bf16.msra.mxu0 %v5876_v42  ;;  %v3843_v42 = vrot.slane %v3838_v0, %v6757_v1  ;;  %v4855_v0 = vld [vmem:[%s9359_s13 + $0x128] sm:$0xff] }
 0x6f4   : > { %5878 = vmatprep.subr.bf16.mxu0 %v6203_v16 }
 0x6f7   : > { %5880 = vmatpush1.bf16.msra.mxu0 %v5879_v18 }
 0x6f8   : > { %5881 = vmatprep.subr.bf16.mxu0 %v6203_v16 }
 0x6fb   : > { %5883 = vmatpush1.bf16.msra.mxu0 %v5882_v5 }
 0x6fc   : > { %5884 = vmatprep.subr.bf16.mxu0 %v6203_v16 }
 0x6fe   : > { %3732 = vmatmul.mubr.f32.vlgmr.msra.gmra.mrb[20].mxu0 %v8888_v45  ;;  %v4819_v45 = vld [vmem:[%s9356_s10 + $0x180] sm:$0xff] }
 0x6ff   : > { %5886 = vmatpush1.bf16.msra.mxu0 %v5885_v44  ;;  %4831 = vmatprep.mubr.msk.f32.mxu0 %vm3592_vm9, %v3763_v38  ;;  %v5897_v20 = vpack.c.bf16 %v4820_v14, %v4819_v45  ;;  %v4836_v38 = vld [vmem:[%s9359_s13 + $0x90] sm:$0xff]  ;;  %v4849_v44 = vld [vmem:[%s9359_s13 + $0xf8] sm:$0xff]  ;;  %v3934_v14 = vld [vmem:[%s9359_s13] sm:$0xff] }
 0x700   : > { %5887 = vmatprep.subr.bf16.mxu0 %v6203_v16  ;;  %v5918_v36 = vpack.c.bf16 %v4837_v41, %v4836_v38  ;;  %v5936_v50 = vpack.c.bf16 %v4849_v44, %v4848_v39  ;;  %v3942_v38 = vld [vmem:[%s9359_s13 + $0x40] sm:$0xff] }
 0x701   : > { %v4862_v44 = vld [vmem:[%s9359_s13 + $0x160] sm:$0xff] }
 0x703   : > { %5889 = vmatpush1.bf16.msra.mxu0 %v5888_v6  ;;  %v4224_v6 = vld [vmem:[%s9361_s15 + $0x8] sm:$0xff] }
 0x704   : > { %5890 = vmatprep.subr.bf16.mxu0 %v6203_v16  ;;  %v5987_v52 = vpack.c.bf16 %v4224_v6, %v4223_v47  ;;  %v4864_v6 = vld [vmem:[%s9359_s13 + $0x170] sm:$0xff] }
 0x707   : > { %5892 = vmatpush1.bf16.msra.mxu0 %v5891_v10  ;;  %v4226_v10 = vld [vmem:[%s9361_s15 + $0x18] sm:$0xff] }
 0x708   : > { %5893 = vmatprep.subr.bf16.mxu0 %v6203_v16  ;;  %v5990_v62 = vpack.c.bf16 %v4226_v10, %v4225_v55  ;;  %v4865_v55 = vld [vmem:[%s9359_s13 + $0x178] sm:$0xff]  ;;  %v4229_v10 = vld [vmem:[%s9361_s15 + $0x30] sm:$0xff] }
 0x70b   : > { %5895 = vmatpush1.bf16.msra.mxu0 %v5894_v11  ;;  %v4228_v11 = vld [vmem:[%s9361_s15 + $0x28] sm:$0xff] }
 0x70c   : > { %5896 = vmatprep.subr.bf16.mxu0 %v6203_v16  ;;  %v5993_v45 = vpack.c.bf16 %v4228_v11, %v4227_v60  ;;  %v4231_v11 = vld [vmem:[%s9361_s15 + $0x40] sm:$0xff] }
 0x70f   : > { %5898 = vmatpush1.bf16.msra.mxu0 %v5897_v20  ;;  %v3935_v20 = vld [vmem:[%s9359_s13 + $0x8] sm:$0xff] }
 0x710   : > { %5899 = vmatprep.subr.bf16.mxu0 %v6203_v16  ;;  %v5939_v21 = vpack.c.bf16 %v3935_v20, %v3934_v14  ;;  %v4233_v20 = vld [vmem:[%s9361_s15 + $0x50] sm:$0xff] }
 0x713   : > { %5901 = vmatpush1.bf16.msra.mxu0 %v5900_v4 }
 0x714   : > { %5902 = vmatprep.subr.bf16.mxu0 %v6203_v16 }
 0x717   : > { %5904 = vmatpush1.bf16.msra.mxu0 %v5903_v17 }
 0x718   : > { %5905 = vmatprep.subr.bf16.mxu0 %v6203_v16 }
 0x71b   : > { %5907 = vmatpush1.bf16.msra.mxu0 %v5906_v15  ;;  %v3937_v15 = vld [vmem:[%s9359_s13 + $0x18] sm:$0xff] }
 0x71c   : > { %5908 = vmatprep.subr.bf16.mxu0 %v6203_v16 }
 0x71f   : > { %5910 = vmatpush1.bf16.msra.mxu0 %v5909_v56  ;;  %v5942_v56 = vpack.c.bf16 %v3937_v15, %v3936_v22  ;;  %v4205_v15 = vld [vmem:[%s9360_s14] sm:$0x3] }
 0x720   : > { %5911 = vmatprep.subr.bf16.mxu0 %v6203_v16 }
 0x723   : > { %5913 = vmatpush1.bf16.msra.mxu0 %v5912_v31  ;;  %v5945_v31 = vpack.c.bf16 %v3939_v29, %v3938_v19 }
 0x726   : > { %3832 = vmatmul.mubr.f32.vlgmr.msra.gmra.mrb[20].mxu0 %v8900_v33  ;;  %v5915_v33 = vpack.c.bf16 %v4835_v30, %v4834_v53  ;;  %v3941_v53 = vld [vmem:[%s9359_s13 + $0x38] sm:$0xff] }
 0x727   : > { %4971 = vmatprep.mubr.msk.f32.mxu0 %vm3852_vm10, %v3850_v34  ;;  %v3940_v34 = vld [vmem:[%s9359_s13 + $0x30] sm:$0xff] }
 0x728   : > { %5916 = vmatpush3.bf16.msra.mxu1 %v5915_v33  ;;  %v5948_v30 = vpack.c.bf16 %v3941_v53, %v3940_v34  ;;  %v3943_v33 = vld [vmem:[%s9359_s13 + $0x48] sm:$0xff] }
 0x729   : > { %5917 = vmatprep.subr.bf16.mxu1 %v6203_v16  ;;  %v5951_v41 = vpack.c.bf16 %v3943_v33, %v3942_v38 }
 0x72c   : > { %5919 = vmatpush3.bf16.msra.mxu1 %v5918_v36  ;;  %v3944_v36 = vld [vmem:[%s9359_s13 + $0x50] sm:$0xff] }
 0x72d   : > { %5920 = vmatprep.subr.bf16.mxu1 %v6203_v16  ;;  %v5954_v9 = vpack.c.bf16 %v3945_v43, %v3944_v36 }
 0x730   : > { %5922 = vmatpush3.bf16.msra.mxu1 %v5921_v46  ;;  %v3946_v46 = vld [vmem:[%s9359_s13 + $0x60] sm:$0xff] }
 0x731   : > { %5923 = vmatprep.subr.bf16.mxu1 %v6203_v16  ;;  %v5957_v49 = vpack.c.bf16 %v3947_v12, %v3946_v46 }
 0x734   : > { %5925 = vmatpush3.bf16.msra.mxu1 %v5924_v13  ;;  %v3948_v13 = vld [vmem:[%s9359_s13 + $0x70] sm:$0xff] }
 0x735   : > { %5926 = vmatprep.subr.bf16.mxu1 %v6203_v16  ;;  %v5960_v57 = vpack.c.bf16 %v3949_v32, %v3948_v13 }
 0x738   : > { %5928 = vmatpush3.bf16.msra.mxu1 %v5927_v58  ;;  %v4850_v58 = vld [vmem:[%s9359_s13 + $0x100] sm:$0xff] }
 0x739   : > { %5929 = vmatprep.subr.bf16.mxu1 %v6203_v16  ;;  %v5963_v61 = vpack.c.bf16 %v4851_v35, %v4850_v58 }
 0x73c   : > { %5931 = vmatpush3.bf16.msra.mxu1 %v5930_v28  ;;  %v4852_v28 = vld [vmem:[%s9359_s13 + $0x110] sm:$0xff] }
 0x73d   : > { %5932 = vmatprep.subr.bf16.mxu1 %v6203_v16  ;;  %v5966_v48 = vpack.c.bf16 %v4853_v63, %v4852_v28 }
 0x740   : > { %5934 = vmatpush3.bf16.msra.mxu1 %v5933_v23  ;;  %v4854_v23 = vld [vmem:[%s9359_s13 + $0x120] sm:$0xff] }
 0x741   : > { %5935 = vmatprep.subr.bf16.mxu1 %v6203_v16 }
 0x744   : > { %5937 = vmatpush3.bf16.msra.mxu1 %v5936_v50  ;;  %v4863_v50 = vld [vmem:[%s9359_s13 + $0x168] sm:$0xff] }
 0x745   : > { %5938 = vmatprep.subr.bf16.mxu1 %v6203_v16  ;;  %v5981_v47 = vpack.c.bf16 %v4863_v50, %v4862_v44 }
 0x7f9   : > { %v3833_v37 = vpop.f32.mrb[20].mxu0 }
 0x7fa   : > { %v3839_v54 = vmax.f32 %v3833_v37, 0.0  ;;  %v3835_v18 = vpop.f32.mrb[21].mxu0  ;;  %v4856_v37 = vld [vmem:[%s9359_s13 + $0x130] sm:$0xff] }
 0x7fb   : > { %v4858_v18 = vld [vmem:[%s9359_s13 + $0x140] sm:$0xff] }
 0x7fc   : > { %v3844_v2 = vmul.f32 %v3843_v42, %v3839_v54  ;;  %v5969_v42 = vpack.c.bf16 %v4855_v0, %v4854_v23 }
 0x7fe   : > { %v3849_v5 = vadd.f32 %v3848_v40, %v3844_v2  ;;  %v4859_v40 = vld [vmem:[%s9359_s13 + $0x148] sm:$0xff] }
 0x7ff   : > { %v5975_v2 = vpack.c.bf16 %v4859_v40, %v4858_v18 }
 0x800   : > { %4969 = vmatprep.subr.mxu0 %v3849_v5 }
 0x801   : > { %4970 = vmatpush3.msra.mxu0 %v3849_v5  ;;  %v4860_v5 = vld [vmem:[%s9359_s13 + $0x150] sm:$0xff] }
 0x802   : > { %4972 = vmatmul.mubr.msk.f32.vlgmr.msra.gmra.mrb[22].mxu0 %vm3852_vm10, %v3851_v27  ;;  %5986 = vmatprep.subr.bf16.mxu0 %v6203_v16  ;;  %v4861_v27 = vld [vmem:[%s9359_s13 + $0x158] sm:$0xff] }
 0x803   : > { %5111 = vmatprep.mubr.msk.f32.mxu0 %vm6204_vm11, %v6201_v7  ;;  %5988 = vmatpush3.bf16.msra.mxu0 %v5987_v52  ;;  %v5978_v39 = vpack.c.bf16 %v4861_v27, %v4860_v5  ;;  %v5984_v52 = vpack.c.bf16 %v4865_v55, %v4864_v6 }
 0x804   : > { %5989 = vmatprep.subr.bf16.mxu0 %v6203_v16 }
 0x807   : > { %5991 = vmatpush3.bf16.msra.mxu0 %v5990_v62  ;;  %v4230_v62 = vld [vmem:[%s9361_s15 + $0x38] sm:$0xff] }
 0x808   : > { %5992 = vmatprep.subr.bf16.mxu0 %v6203_v16  ;;  %v5996_v60 = vpack.c.bf16 %v4230_v62, %v4229_v10 }
 0x80b   : > { %5994 = vmatpush3.bf16.msra.mxu0 %v5993_v45  ;;  %v4232_v45 = vld [vmem:[%s9361_s15 + $0x48] sm:$0xff] }
 0x80c   : > { %5995 = vmatprep.subr.bf16.mxu0 %v6203_v16  ;;  %v5999_v14 = vpack.c.bf16 %v4232_v45, %v4231_v11 }
 0x80f   : > { %5997 = vmatpush3.bf16.msra.mxu0 %v5996_v60 }
 0x810   : > { %5998 = vmatprep.subr.bf16.mxu0 %v6203_v16 }
 0x813   : > { %6000 = vmatpush3.bf16.msra.mxu0 %v5999_v14 }
 0x814   : > { %6001 = vmatprep.subr.bf16.mxu0 %v6203_v16 }
 0x8d5   : > { %v4973_v3 = vpop.f32.mrb[22].mxu0 }
 0x8d6   : > { %v3970_v24 = vrot.slane %v4973_v3, 1  ;;  %v4131_v4 = vrot.slane %v4973_v3, 2  ;;  %v3925_v51 = vpop.f32.mrb[23].mxu0  ;;  %v4234_v3 = vld [vmem:[%s9361_s15 + $0x58] sm:$0xff] }
 0x8d7   : > { %v3969_v59 = vrot.slane %v3925_v51, 1  ;;  %v4130_v17 = vrot.slane %v3925_v51, 2 }
 0x8d9   : > { %v3971_v25 = vsel %vm544_vm4, %v3969_v59, %v3970_v24  ;;  %v9151_v26 = vsel %vm769_vm5, %v4130_v17, %v4131_v4  ;;  %v6002_v24 = vpack.c.bf16 %v4234_v3, %v4233_v20  ;;  %v4235_v4 = vld [vmem:[%s9361_s15 + $0x60] sm:$0xff]  ;;  %v4237_v17 = vld [vmem:[%s9361_s15 + $0x70] sm:$0xff] }
 0x8da   : > { %5007 = vmatmul.mubr.f32.vlgmr.msra.gmra.mrb[40].mxu1 %v3971_v25  ;;  %v4210_v25 = vrot.slane %v4205_v15, %v6757_v1 }
 0x8db   : > { %5940 = vmatpush3.bf16.msra.mxu1 %v5939_v21  ;;  %5041 = vmatprep.mubr.msk.f32.mxu1 %vm6204_vm11, %v6201_v7  ;;  %v4238_v21 = vld [vmem:[%s9361_s15 + $0x78] sm:$0xff] }
 0x8dc   : > { %5941 = vmatprep.subr.bf16.mxu1 %v6203_v16  ;;  %6003 = vmatpush3.bf16.msra.mxu0 %v6002_v24  ;;  %v6008_v22 = vpack.c.bf16 %v4238_v21, %v4237_v17 }
 0x8dd   : > { %6004 = vmatprep.subr.bf16.mxu0 %v6203_v16 }
 0x8df   : > { %5943 = vmatpush3.bf16.msra.mxu1 %v5942_v56 }
 0x8e0   : > { %5944 = vmatprep.subr.bf16.mxu1 %v6203_v16 }
 0x8e3   : > { %5946 = vmatpush3.bf16.msra.mxu1 %v5945_v31 }
 0x8e4   : > { %5947 = vmatprep.subr.bf16.mxu1 %v6203_v16 }
 0x8e7   : > { %5949 = vmatpush3.bf16.msra.mxu1 %v5948_v30 }
 0x8e8   : > { %5950 = vmatprep.subr.bf16.mxu1 %v6203_v16 }
 0x8eb   : > { %5952 = vmatpush3.bf16.msra.mxu1 %v5951_v41 }
 0x8ec   : > { %5953 = vmatprep.subr.bf16.mxu1 %v6203_v16 }
 0x8ef   : > { %5955 = vmatpush3.bf16.msra.mxu1 %v5954_v9 }
 0x8f0   : > { %5956 = vmatprep.subr.bf16.mxu1 %v6203_v16 }
 0x8f3   : > { %5958 = vmatpush3.bf16.msra.mxu1 %v5957_v49 }
 0x8f4   : > { %5959 = vmatprep.subr.bf16.mxu1 %v6203_v16 }
 0x8f7   : > { %5961 = vmatpush3.bf16.msra.mxu1 %v5960_v57 }
 0x8f8   : > { %5962 = vmatprep.subr.bf16.mxu1 %v6203_v16 }
 0x8fa   : > { %5042 = vmatmul.mubr.f32.vlgmr.msra.gmra.mrb[40].mxu1 %v3925_v51  ;;  %v4236_v51 = vld [vmem:[%s9361_s15 + $0x68] sm:$0xff] }
 0x8fb   : > { %5964 = vmatpush3.bf16.msra.mxu1 %v5963_v61  ;;  %5076 = vmatprep.mubr.msk.f32.mxu1 %vm6204_vm11, %v6201_v7  ;;  %v4857_v7 = vld [vmem:[%s9359_s13 + $0x138] sm:$0xff]  ;;  %v6005_v59 = vpack.c.bf16 %v4236_v51, %v4235_v4 }
 0x8fc   : > { %5965 = vmatprep.subr.bf16.mxu1 %v6203_v16  ;;  %v5972_v54 = vpack.c.bf16 %v4857_v7, %v4856_v37 }
 0x8fd   : > { %6006 = vmatpush3.bf16.msra.mxu0 %v6005_v59 }
 0x8fe   : > { %6007 = vmatprep.subr.bf16.mxu0 %v6203_v16 }
 0x8ff   : > { %5967 = vmatpush3.bf16.msra.mxu1 %v5966_v48 }
 0x900   : > { %5968 = vmatprep.subr.bf16.mxu1 %v6203_v16 }
 0x901   : > { %6009 = vmatpush3.bf16.msra.mxu0 %v6008_v22 }
 0x903   : > { %5970 = vmatpush3.bf16.msra.mxu1 %v5969_v42 }
 0x904   : > { %5971 = vmatprep.subr.bf16.mxu1 %v6203_v16 }
 0x907   : > { %5973 = vmatpush3.bf16.msra.mxu1 %v5972_v54 }
 0x908   : > { %5974 = vmatprep.subr.bf16.mxu1 %v6203_v16 }
 0x90b   : > { %5976 = vmatpush3.bf16.msra.mxu1 %v5975_v2 }
 0x90c   : > { %5977 = vmatprep.subr.bf16.mxu1 %v6203_v16 }
 0x90f   : > { %5979 = vmatpush3.bf16.msra.mxu1 %v5978_v39 }
 0x910   : > { %5980 = vmatprep.subr.bf16.mxu1 %v6203_v16 }
 0x913   : > { %5982 = vmatpush3.bf16.msra.mxu1 %v5981_v47 }
 0x914   : > { %5983 = vmatprep.subr.bf16.mxu1 %v6203_v16  ;;  %v4215_v16 = vrot.slane %v4205_v15, %v6765_v8 }
 0x917   : > { %5985 = vmatpush3.bf16.msra.mxu1 %v5984_v52 }
 0x91a   : > { %5077 = vmatmul.mubr.f32.vlgmr.msra.gmra.mrb[40].mxu1 %v9151_v26 }
 0x9ed   : > { %v4200_v26 = vpop.f32.mrb[40].mxu1 }
 0x9ee   : > { %v4206_v56 = vmax.f32 %v4200_v26, 0.0  ;;  %v5078_v19 = vpop.f32.mrb[41].mxu1 }
 0x9f0   : > { %v4211_v29 = vmul.f32 %v4210_v25, %v4206_v56 }
 0x9f2   : > { %v4216_v31 = vadd.f32 %v4215_v16, %v4211_v29 }
 0x9f4   : > { %v4217_v34 = vrot.slane %v4216_v31, 4 }
 0x9f6   : > { %v4218_v53 = vadd.f32 %v4217_v34, %v4216_v31 }
 0x9f8   : > { %v4219_v30 = vrot.slane %v4218_v53, 2 }
 0x9fa   : > { %v4220_v38 = vadd.f32 %v4219_v30, %v4218_v53 }
 0x9fc   : > { %v4221_v33 = vrot.slane %v4220_v38, 1 }
 0x9fe   : > { %v4222_v41 = vadd.f32 %v4221_v33, %v4220_v38 }
 0xa00   : > { %5112 = vmatmul.mubr.f32.vlgmr.msra.gmra.mrb[24].mxu0 %v4222_v41 }
 0xad3   : > { %v4305_v36 = vpop.f32.mrb[24].mxu0 }
 0xad4   : > { %v4309_v43 = vmul.f32 0.015625, %v4305_v36  ;;  %v5113_v1 = vpop.f32.mrb[25].mxu0 }
 0xad6   : > { %v4311_v9 = vsel %vm4310_vm12, %v4309_v43, -inf }
 0xad7   : > { %4312 = vmax.xlane.f32.xlu0 %v4311_v9 }
 0xb64   : > { %v4313_v8 = vpop.xlane.xlu0 %4312 }
 0xb65   : > { %v4314_v46 = vsub.f32 %v4309_v43, %v4313_v8 }
 0xb67   : > { %v4315_v12 = vmul.f32 1.442695, %v4314_v46 }
 0xb69   : > { %6133 = vpow2.f32 %v4315_v12 }
 0xb73   : > { %v6134_v49 = vpop.eup %6133 }
 0xb74   : > { %v4317_v13 = vsel %vm4310_vm12, %v6134_v49, 0.0 }
 0xb75   : > { %4318 = vadd.xlane.f32.xlu0 %v4317_v13 }
 0xc02   : > { %v4319_v32 = vpop.xlane.xlu0 %4318 }
 0xc03   : > { %6135 = vlog2.f32 %v4319_v32 }
 0xc0d   : > { %v6136_v57 = vpop.eup %6135 }
 0xc0e   : > { %v4321_v58 = vmul.f32 0.6931472, %v6136_v57 }
 0xc10   : > { %v4322_v35 = vsub.f32 %v4314_v46, %v4321_v58 }
 0xc12   : > { %4323 = vst.msk [vmem:[%s513_s21] sm:$0x1] %vm4310_vm12, %v4322_v35 }
 0xc13   : > { %6150 = shalt.err (!%p6147_p3)
}
 0xc14   : > { %s6151_s28 = scalar_lea.hbm %s9303_s29, 16  ;;  %s6155_s24 = scalar_lea.hbm %s9384_s16, 32 }
 0xc15   : > { %p6152_p4 = scmp.ne.s32.totalorder %s9303_s29, %s6151_s28  ;;  %p6156_p9 = scmp.lt.u32.totalorder %s9303_s29, %s9384_s16 }
 0xc16   : > { %p6157_p10 = scmp.lt.u32.totalorder %s6155_s24, %s6151_s28  ;;  %p6159_p12 = scmp.lt.u32.totalorder %s6151_s28, %s9303_s29 }
 0xc17   : > { %p6153_p7 = pnand %p6152_p4, %p6329_p5 }
 0xc18   : > { %p6158_p11 = por %p6157_p10, %p6156_p9 }
 0xc19   : > { %p6154_p8 = pneg %p6153_p7 }
 0xc1a   : > { %p6160_p13 = por %p6159_p12, %p6158_p11 }
 0xc1c   : > { %p6161_p0 = pnand %p6160_p13, %p6154_p8 }
 0xc1e   : > { %6164 = shalt.err (!%p6161_p0)
}
 0xc1f   : > { %6090 = dma.vmem_to_hbm [thread:$0]  (%p6329_p5), %s9305_s18, 16, %s9303_s29, %s4325_s27  }
 0xc20 PF: > { %s9385_s30 = sld [smem:[#allocation7_spill]]  ;;  %s9386_s25 = sld [smem:[#allocation5_spill]] }
 0xc26   : > { %p6096_p1 = scmp.ge.s32.totalorder %s9385_s30, 2  ;;  %s4349_s26 = sand.u32 1, %s9386_s25  }
 0xc27   : > { %s4350_s20 = scalar_lea.sflag [#allocation3], %s4349_s26 }
 0xc28   : > { %p6093_p2 = pnand %p6096_p1, %p6333_p6 }
 0xc2a   : > { %6182 = dma.done.wait (!%p6093_p2), %s4350_s20, 16  }
 0xc2b   : > { %6184 = vsyncadd (!%p6093_p2), %s4350_s20, 4294967280  ;;  %s9388_s24 = sld [smem:[#allocation8_spill]]  ;;  %s9389_s28 = sld [smem:[#allocation6_spill]] }
 0xc2c   : > { %s9390_s23 = sld [smem:[#allocation9_spill]]  ;;  %s9391_s21 = smov %s6191_s22 }
 0xc31   : > { %p26_p3 = scmp.ge.s32.totalorder %s9388_s24, 4   ;;  %s9392_s22 = smov %s9389_s28 }
 0xc33   :  { %28 = sbr.rel (!%p26_p3) target bundleno = 6 (0x6), region = 131 }
 0xc3a   :  { %4354 = vsyncpa [#allocation3], 1 }
 0xc3b   :  { %4356 = vsyncpa [#allocation3 + $0x1], 1 }

</bundles_post_ra>
